<compile_context>
chip_gen: v5e
topology: v5e:2x2
jax: 0.10.0
libtpu: 0.0.40
codegen_flags: <defaults>
</compile_context>

<pallas_src>
import functools

import jax
import jax.numpy as jnp
from jax.experimental import pallas as pl
from jax.experimental.pallas import tpu as pltpu

EPS = 1e-5
LANE = 128                        # channel dims padded to a multiple of this
_VMEM_LIMIT = 32 * 1024 * 1024    # explicit scoped-VMEM budget (fits v5e/v6e/v7x)


def _round_up(n, m=LANE):
    return ((n + m - 1) // m) * m


def _pick_tile(m):
    """Largest row tile (<=512, mem-bound sweet spot) that divides m."""
    for tm in (512, 256, 128, 64, 32, 16, 8):
        if m % tm == 0:
            return tm
    # TODO(synk): pad M + mask rows in the stats epilogue for pathological M.
    return m


# --------------------------------------------------------------------------
# Kernel 1: [optional relu(a*scale+bias)] @ W  +  per-channel sum / sum-of-sq
# --------------------------------------------------------------------------
def pallas_matmul_stats(a, w, scale=None, bias=None):
    m, k = a.shape
    n = w.shape[1]
    tm = _pick_tile(m)
    gm = m // tm
    fused_act = scale is not None

    def kernel(*refs):
        if fused_act:
            a_ref, sc_ref, bi_ref, w_ref, o_ref, s_ref, ss_ref = refs
            av = jnp.maximum(a_ref[...] * sc_ref[...] + bi_ref[...], 0.0)
        else:
            a_ref, w_ref, o_ref, s_ref, ss_ref = refs
            av = a_ref[...]
        y = jnp.dot(av, w_ref[...], preferred_element_type=jnp.float32)
        o_ref[...] = y
        # Per-tile partial statistics (combined in JAX) keep the grid parallel.
        s_ref[...] = jnp.sum(y, axis=0, keepdims=True)[None]
        ss_ref[...] = jnp.sum(y * y, axis=0, keepdims=True)[None]

    in_specs = [pl.BlockSpec((tm, k), lambda i: (i, 0))]
    args = [a]
    if fused_act:
        in_specs += [pl.BlockSpec((1, k), lambda i: (0, 0)),
                     pl.BlockSpec((1, k), lambda i: (0, 0))]
        args += [scale, bias]
    in_specs.append(pl.BlockSpec((k, n), lambda i: (0, 0)))
    args.append(w)

    y, s, ss = pl.pallas_call(
        kernel,
        out_shape=(jax.ShapeDtypeStruct((m, n), jnp.float32),
                   jax.ShapeDtypeStruct((gm, 1, n), jnp.float32),
                   jax.ShapeDtypeStruct((gm, 1, n), jnp.float32)),
        grid_spec=pltpu.PrefetchScalarGridSpec(
            num_scalar_prefetch=0,
            grid=(gm,),
            in_specs=in_specs,
            out_specs=[pl.BlockSpec((tm, n), lambda i: (i, 0)),
                       pl.BlockSpec((1, 1, n), lambda i: (i, 0, 0)),
                       pl.BlockSpec((1, 1, n), lambda i: (i, 0, 0))]),
        compiler_params=pltpu.CompilerParams(
            dimension_semantics=("parallel",),
            vmem_limit_bytes=_VMEM_LIMIT),
    )(*args)
    return y, jnp.sum(s, axis=0), jnp.sum(ss, axis=0)


# --------------------------------------------------------------------------
# Kernel 2: relu(BN1) -> 3x3 conv (pad=1, stride in {1,2}) -> BN2 stats
# --------------------------------------------------------------------------
def pallas_conv3x3_stats(y_prev, scale, bias, w, n_batch, h, w_sp, stride):
    """y_prev: (N*H*W, C) raw pre-BN conv1 output.  Returns (N*Ho*Wo, Cout)."""
    c = y_prev.shape[1]
    cout = w.shape[1]
    ho = (h + 2 - 3) // stride + 1
    wo = (w_sp + 2 - 3) // stride + 1
    m_out = n_batch * ho * wo
    assert stride in (1, 2), "Bottleneck uses stride 1 or 2"

    if stride == 1:
        y_in = y_prev.reshape(n_batch, h, w_sp, c)
        y_spec = pl.BlockSpec((1, h, w_sp, c), lambda i: (i, 0, 0, 0))
        scratch = pltpu.VMEM((h + 2, w_sp + 2, c), jnp.float32)

        def kernel(y_ref, sc_ref, bi_ref, w_ref, o_ref, s_ref, ss_ref, pad_ref):
            act = jnp.maximum(y_ref[0] * sc_ref[...] + bi_ref[...], 0.0)
            pad_ref[...] = jnp.zeros(pad_ref.shape, jnp.float32)
            pad_ref[1:h + 1, 1:w_sp + 1, :] = act
            acc = jnp.zeros((ho * wo, cout), jnp.float32)
            for dh in range(3):
                for dw in range(3):
                    win = pad_ref[dh:dh + ho, dw:dw + wo, :]
                    t = dh * 3 + dw
                    acc = acc + jnp.dot(win.reshape(ho * wo, c),
                                        w_ref[t * c:(t + 1) * c, :],
                                        preferred_element_type=jnp.float32)
            o_ref[...] = acc
            s_ref[...] = jnp.sum(acc, axis=0, keepdims=True)[None]
            ss_ref[...] = jnp.sum(acc * acc, axis=0, keepdims=True)[None]
    else:
        # stride == 2: split the activation into its four (h, w) parity planes
        # once in XLA so every in-kernel access is a contiguous slice.
        assert h % 2 == 0 and w_sp % 2 == 0
        hh, wh = h // 2, w_sp // 2            # == ho, wo
        y_in = (y_prev.reshape(n_batch, hh, 2, wh, 2, c)
                .transpose(0, 2, 4, 1, 3, 5))  # (N, 2, 2, hh, wh, C)
        y_spec = pl.BlockSpec((1, 2, 2, hh, wh, c),
                              lambda i: (i, 0, 0, 0, 0, 0))
        scratch = pltpu.VMEM((2, 2, ho + 1, wo + 1, c), jnp.float32)

        def kernel(y_ref, sc_ref, bi_ref, w_ref, o_ref, s_ref, ss_ref, pad_ref):
            pad_ref[...] = jnp.zeros(pad_ref.shape, jnp.float32)
            for rh in range(2):
                for rw in range(2):
                    plane = y_ref[0, rh, rw]
                    act = jnp.maximum(plane * sc_ref[...] + bi_ref[...], 0.0)
                    pad_ref[rh, rw, 1:, 1:, :] = act
            acc = jnp.zeros((ho * wo, cout), jnp.float32)
            for dh in range(3):
                prh = (dh + 1) % 2
                roff = 0 if dh == 0 else 1
                for dw in range(3):
                    prw = (dw + 1) % 2
                    coff = 0 if dw == 0 else 1
                    win = pad_ref[prh, prw, roff:roff + ho, coff:coff + wo, :]
                    t = dh * 3 + dw
                    acc = acc + jnp.dot(win.reshape(ho * wo, c),
                                        w_ref[t * c:(t + 1) * c, :],
                                        preferred_element_type=jnp.float32)
            o_ref[...] = acc
            s_ref[...] = jnp.sum(acc, axis=0, keepdims=True)[None]
            ss_ref[...] = jnp.sum(acc * acc, axis=0, keepdims=True)[None]

    y2, s, ss = pl.pallas_call(
        kernel,
        out_shape=(jax.ShapeDtypeStruct((m_out, cout), jnp.float32),
                   jax.ShapeDtypeStruct((n_batch, 1, cout), jnp.float32),
                   jax.ShapeDtypeStruct((n_batch, 1, cout), jnp.float32)),
        grid_spec=pltpu.PrefetchScalarGridSpec(
            num_scalar_prefetch=0,
            grid=(n_batch,),
            in_specs=[y_spec,
                      pl.BlockSpec((1, c), lambda i: (0, 0)),
                      pl.BlockSpec((1, c), lambda i: (0, 0)),
                      pl.BlockSpec((9 * c, cout), lambda i: (0, 0))],
            out_specs=[pl.BlockSpec((ho * wo, cout), lambda i: (i, 0)),
                       pl.BlockSpec((1, 1, cout), lambda i: (i, 0, 0)),
                       pl.BlockSpec((1, 1, cout), lambda i: (i, 0, 0))],
            scratch_shapes=[scratch]),
        compiler_params=pltpu.CompilerParams(
            dimension_semantics=("parallel",),
            vmem_limit_bytes=_VMEM_LIMIT),
    )(y_in, scale, bias, w)
    return y2, jnp.sum(s, axis=0), jnp.sum(ss, axis=0)


# --------------------------------------------------------------------------
# Kernel 3: residual merge  pre = y*sc+bi + (r*rsc+rbi | r);  out = relu(pre)
# --------------------------------------------------------------------------
def pallas_residual(y, sc, bi, r, rsc=None, rbi=None, want_pre=False):
    m, c = y.shape
    tm = _pick_tile(m)
    gm = m // tm
    has_proj = rsc is not None

    def kernel(*refs):
        y_ref, sc_ref, bi_ref, r_ref = refs[:4]
        rest = refs[4:]
        pre = y_ref[...] * sc_ref[...] + bi_ref[...]
        if has_proj:
            rsc_ref, rbi_ref = rest[:2]
            rest = rest[2:]
            pre = pre + r_ref[...] * rsc_ref[...] + rbi_ref[...]
        else:
            pre = pre + r_ref[...]
        rest[0][...] = jnp.maximum(pre, 0.0)
        if want_pre:
            rest[1][...] = pre

    row_spec = pl.BlockSpec((tm, c), lambda i: (i, 0))
    vec_spec = pl.BlockSpec((1, c), lambda i: (0, 0))
    in_specs = [row_spec, vec_spec, vec_spec, row_spec]
    args = [y, sc, bi, r]
    if has_proj:
        in_specs += [vec_spec, vec_spec]
        args += [rsc, rbi]

    if want_pre:
        out_shape = (jax.ShapeDtypeStruct((m, c), jnp.float32),
                     jax.ShapeDtypeStruct((m, c), jnp.float32))
        out_specs = [row_spec, row_spec]
    else:
        out_shape = jax.ShapeDtypeStruct((m, c), jnp.float32)
        out_specs = row_spec

    res = pl.pallas_call(
        kernel,
        out_shape=out_shape,
        grid_spec=pltpu.PrefetchScalarGridSpec(
            num_scalar_prefetch=0, grid=(gm,),
            in_specs=in_specs, out_specs=out_specs),
        compiler_params=pltpu.CompilerParams(
            dimension_semantics=("parallel",),
            vmem_limit_bytes=_VMEM_LIMIT),
    )(*args)
    return res if want_pre else (res,)


# ------------------------------- glue (JAX) --------------------------------
def bn_fold(s, ss, gamma, beta, m):
    """Training-mode BN folded into per-channel scale/shift (biased variance)."""
    mean = s / m
    var = jnp.maximum(ss / m - mean * mean, 0.0)   # clamp vs. cancellation
    inv = jax.lax.rsqrt(var + EPS)
    scale = gamma * inv
    shift = beta - mean * scale
    return scale, shift


@functools.partial(jax.jit, static_argnames=("stride", "is_last", "cout_real"))
def bottleneck_forward(x_nchw, packed, stride, is_last, cout_real):
    # NCHW -> NHWC once at the module boundary (hoist for full-ResNet use).
    x = jnp.transpose(x_nchw, (0, 2, 3, 1)).astype(jnp.float32)
    n, h, w_sp, cin = x.shape
    cin_p = packed["w1m"].shape[0]

    xp = jnp.pad(x, ((0, 0), (0, 0), (0, 0), (0, cin_p - cin)))
    m0 = n * h * w_sp
    x2d = xp.reshape(m0, cin_p)

    # conv1 (1x1) + bn1 statistics (fused epilogue).
    y1, s1, ss1 = pallas_matmul_stats(x2d, packed["w1m"])
    sc1, bi1 = bn_fold(s1, ss1, packed["g1"], packed["b1"], m0)

    # relu(bn1) prologue + conv2 (3x3, stride, pad=1) + bn2 statistics.
    ho = (h + 2 - 3) // stride + 1
    wo = (w_sp + 2 - 3) // stride + 1
    m2 = n * ho * wo
    y2, s2, ss2 = pallas_conv3x3_stats(y1, sc1, bi1, packed["w2m"],
                                       n, h, w_sp, stride)
    sc2, bi2 = bn_fold(s2, ss2, packed["g2"], packed["b2"], m2)

    # relu(bn2) prologue + conv3 (1x1) + bn3 statistics.
    y3, s3, ss3 = pallas_matmul_stats(y2, packed["w3m"], scale=sc2, bias=bi2)
    sc3, bi3 = bn_fold(s3, ss3, packed["g3"], packed["b3"], m2)

    # shortcut
    if "wsm" in packed:
        xs = xp[:, ::stride, ::stride, :].reshape(m2, cin_p)
        r, sr, ssr = pallas_matmul_stats(xs, packed["wsm"])
        scs, bis = bn_fold(sr, ssr, packed["gs"], packed["bs"], m2)
    else:  # identity shortcut: no rscale/rbias broadcasts
        r, scs, bis = x2d, None, None

    res = pallas_residual(y3, sc3, bi3, r, scs, bis, want_pre=is_last)

    def to_nchw(t2d):
        t = t2d[:, :cout_real].reshape(n, ho, wo, cout_real)
        return jnp.transpose(t, (0, 3, 1, 2))

    if is_last:
        return to_nchw(res[0]), to_nchw(res[1])
    return to_nchw(res[0])


# -------------------------- params, packing & ref ---------------------------
def init_params(key, in_planes, planes, stride, expansion=4):
    ks = jax.random.split(key, 4)
    p = {
        "w1": jax.random.normal(ks[0], (planes, in_planes, 1, 1),
                                jnp.float32) * 0.2,
        "w2": jax.random.normal(ks[1], (planes, planes, 3, 3),
                                jnp.float32) * 0.2,
        "w3": jax.random.normal(ks[2], (expansion * planes, planes, 1, 1),
                                jnp.float32) * 0.2,
        "g1": jnp.linspace(0.5, 1.5, planes, dtype=jnp.float32),
        "b1": jnp.linspace(-0.1, 0.1, planes, dtype=jnp.float32),
        "g2": jnp.linspace(0.8, 1.2, planes, dtype=jnp.float32),
        "b2": jnp.linspace(-0.2, 0.2, planes, dtype=jnp.float32),
        "g3": jnp.linspace(0.9, 1.1, expansion * planes, dtype=jnp.float32),
        "b3": jnp.linspace(-0.05, 0.05, expansion * planes, dtype=jnp.float32),
    }
    if stride != 1 or in_planes != expansion * planes:
        p["ws"] = jax.random.normal(ks[3], (expansion * planes, in_planes, 1, 1),
                                    jnp.float32) * 0.2
        p["gs"] = jnp.linspace(0.7, 1.3, expansion * planes, dtype=jnp.float32)
        p["bs"] = jnp.linspace(-0.15, 0.15, expansion * planes,
                               dtype=jnp.float32)
    return p


def pack_params(p, in_planes, planes, expansion=4):
    """Pack weights as matmul matrices, zero-padded to lane-dense widths."""
    cin_p = _round_up(in_planes)
    cpl_p = _round_up(planes)
    cex_p = _round_up(expansion * planes)

    def pad_mat(wm, rows, cols):
        return jnp.zeros((rows, cols), jnp.float32).at[
            :wm.shape[0], :wm.shape[1]].set(wm)

    def pad_vec(v, ncol):
        return jnp.zeros((1, ncol), jnp.float32).at[0, :v.shape[0]].set(v)

    w2m = jnp.zeros((9 * cpl_p, cpl_p), jnp.float32)
    for dh in range(3):
        for dw in range(3):
            t = dh * 3 + dw
            blk = p["w2"][:, :, dh, dw].T              # (cin, cout)
            w2m = w2m.at[t * cpl_p:t * cpl_p + planes, :planes].set(blk)

    packed = {
        "w1m": pad_mat(p["w1"].reshape(planes, in_planes).T, cin_p, cpl_p),
        "w2m": w2m,
        "w3m": pad_mat(p["w3"].reshape(expansion * planes, planes).T,
                       cpl_p, cex_p),
        "g1": pad_vec(p["g1"], cpl_p), "b1": pad_vec(p["b1"], cpl_p),
        "g2": pad_vec(p["g2"], cpl_p), "b2": pad_vec(p["b2"], cpl_p),
        "g3": pad_vec(p["g3"], cex_p), "b3": pad_vec(p["b3"], cex_p),
    }
    if "ws" in p:
        packed["wsm"] = pad_mat(
            p["ws"].reshape(expansion * planes, in_planes).T, cin_p, cex_p)
        packed["gs"] = pad_vec(p["gs"], cex_p)
        packed["bs"] = pad_vec(p["bs"], cex_p)
    return packed


def reference_forward(x, params, stride, is_last):
    def conv(x, w, s=1, pad=0):
        return jax.lax.conv_general_dilated(
            x, w, (s, s), [(pad, pad), (pad, pad)],
            dimension_numbers=("NCHW", "OIHW", "NCHW"))

    def bn(x, g, b):
        mean = jnp.mean(x, axis=(0, 2, 3), keepdims=True)
        var = jnp.var(x, axis=(0, 2, 3), keepdims=True)  # biased, like torch BN
        xn = (x - mean) * jax.lax.rsqrt(var + EPS)
        return xn * g.reshape(1, -1, 1, 1) + b.reshape(1, -1, 1, 1)

    out = jax.nn.relu(bn(conv(x, params["w1"]), params["g1"], params["b1"]))
    out = jax.nn.relu(bn(conv(out, params["w2"], stride, 1),
                         params["g2"], params["b2"]))
    out = bn(conv(out, params["w3"]), params["g3"], params["b3"])
    sc = (bn(conv(x, params["ws"], stride), params["gs"], params["bs"])
          if "ws" in params else x)
    pre = out + sc
    o = jax.nn.relu(pre)
    return (o, pre) if is_last else o


# ----------------------------------- main -----------------------------------
if __name__ == "__main__":
    key = jax.random.PRNGKey(0)
    kx, kp = jax.random.split(key)

    in_planes, planes, stride, is_last = 4, 4, 2, True
    n, h, w = 2, 16, 16

    x = jax.random.normal(kx, (n, in_planes, h, w), jnp.float32)
    params = init_params(kp, in_planes, planes, stride)
    packed = pack_params(params, in_planes, planes)

    out, preact = bottleneck_forward(x, packed, stride=stride,
                                     is_last=is_last, cout_real=4 * planes)
    jax.block_until_ready((out, preact))

    ref_out, ref_pre = reference_forward(x, params, stride, is_last)
    assert out.shape == (n, 4 * planes, h // stride, w // stride), out.shape
    err_o = float(jnp.max(jnp.abs(out - ref_out)))
    err_p = float(jnp.max(jnp.abs(preact - ref_pre)))
    assert err_o < 2e-4, ("out mismatch", err_o)
    assert err_p < 2e-4, ("preact mismatch", err_p)

    print("KERNEL_OK")
</pallas_src>

<mosaic_0001>
module attributes {stable_mosaic.version = 11 : i64} {
  func.func @kernel(%arg0: i32, %arg1: memref<512x128xf32, #tpu.memory_space<vmem>>, %arg2: memref<128x128xf32, #tpu.memory_space<vmem>>, %arg3: memref<512x128xf32, #tpu.memory_space<vmem>>, %arg4: memref<1x1x128xf32, #tpu.memory_space<vmem>>, %arg5: memref<1x1x128xf32, #tpu.memory_space<vmem>>) attributes {dimension_semantics = [#tpu.dimension_semantics<parallel>], iteration_bounds = array<i64: 1>, scalar_prefetch = 0 : i64, scratch_operands = 0 : i64, tpu.core_type = #tpu.core_type<tc>, window_params = [{transform_indices = @transform_0, window_bounds = array<i64: 512, 128>}, {pipeline_mode = #tpu.pipeline_mode<synchronous>, transform_indices = @transform_1, window_bounds = array<i64: 128, 128>}, {transform_indices = @transform_2, window_bounds = array<i64: 512, 128>}, {transform_indices = @transform_3, window_bounds = array<i64: 1, 1, 128>}, {transform_indices = @transform_4, window_bounds = array<i64: 1, 1, 128>}]} {
    %c0 = arith.constant 0 : index
    %c0_0 = arith.constant 0 : index
    %0 = vector.load %arg1[%c0, %c0_0] : memref<512x128xf32, #tpu.memory_space<vmem>>, vector<512x128xf32>
    %c0_1 = arith.constant 0 : index
    %c0_2 = arith.constant 0 : index
    %1 = vector.load %arg2[%c0_1, %c0_2] : memref<128x128xf32, #tpu.memory_space<vmem>>, vector<128x128xf32>
    %cst = arith.constant dense<0.000000e+00> : vector<512x128xf32>
    %2 = tpu.matmul %0, %1, %cst {dimension_numbers = #tpu.dot_dimension_numbers<[1], [0], [0], [1], [0, 0, 1, 1], [], []>} : vector<512x128xf32>, vector<128x128xf32>, vector<512x128xf32> -> vector<512x128xf32>
    %c0_3 = arith.constant 0 : index
    %c0_4 = arith.constant 0 : index
    %3 = vector.load %arg3[%c0_3, %c0_4] : memref<512x128xf32, #tpu.memory_space<vmem>>, vector<512x128xf32>
    tpu.vector_store %arg3[%c0_3, %c0_4], %2 {strides = array<i32>} : memref<512x128xf32, #tpu.memory_space<vmem>>, vector<512x128xf32>,
    %cst_5 = arith.constant dense<0.000000e+00> : vector<128xf32>
    %4 = vector.multi_reduction <add>, %2, %cst_5 [0] : vector<512x128xf32> to vector<128xf32>
    %5 = vector.shape_cast %4 : vector<128xf32> to vector<1x128xf32>
    %6 = vector.shape_cast %5 : vector<1x128xf32> to vector<1x1x128xf32>
    %c0_6 = arith.constant 0 : index
    %c0_7 = arith.constant 0 : index
    %c0_8 = arith.constant 0 : index
    %7 = vector.load %arg4[%c0_6, %c0_7, %c0_8] : memref<1x1x128xf32, #tpu.memory_space<vmem>>, vector<1x1x128xf32>
    tpu.vector_store %arg4[%c0_6, %c0_7, %c0_8], %6 {strides = array<i32>} : memref<1x1x128xf32, #tpu.memory_space<vmem>>, vector<1x1x128xf32>,
    %8 = arith.mulf %2, %2 : vector<512x128xf32>
    %cst_9 = arith.constant dense<0.000000e+00> : vector<128xf32>
    %9 = vector.multi_reduction <add>, %8, %cst_9 [0] : vector<512x128xf32> to vector<128xf32>
    %10 = vector.shape_cast %9 : vector<128xf32> to vector<1x128xf32>
    %11 = vector.shape_cast %10 : vector<1x128xf32> to vector<1x1x128xf32>
    %c0_10 = arith.constant 0 : index
    %c0_11 = arith.constant 0 : index
    %c0_12 = arith.constant 0 : index
    %12 = vector.load %arg5[%c0_10, %c0_11, %c0_12] : memref<1x1x128xf32, #tpu.memory_space<vmem>>, vector<1x1x128xf32>
    tpu.vector_store %arg5[%c0_10, %c0_11, %c0_12], %11 {strides = array<i32>} : memref<1x1x128xf32, #tpu.memory_space<vmem>>, vector<1x1x128xf32>,
    return
  }
  func.func @transform_0(%arg0: i32) -> (i32, i32) {
    %c0_i32 = arith.constant 0 : i32
    %c0_i32_0 = arith.constant 0 : i32
    return %arg0, %c0_i32 : i32, i32
  }
  func.func @transform_1(%arg0: i32) -> (i32, i32) {
    %c0_i32 = arith.constant 0 : i32
    %c0_i32_0 = arith.constant 0 : i32
    %c0_i32_1 = arith.constant 0 : i32
    return %c0_i32, %c0_i32_0 : i32, i32
  }
  func.func @transform_2(%arg0: i32) -> (i32, i32) {
    %c0_i32 = arith.constant 0 : i32
    %c0_i32_0 = arith.constant 0 : i32
    return %arg0, %c0_i32 : i32, i32
  }
  func.func @transform_3(%arg0: i32) -> (i32, i32, i32) {
    %c0_i32 = arith.constant 0 : i32
    %c0_i32_0 = arith.constant 0 : i32
    %c0_i32_1 = arith.constant 0 : i32
    return %arg0, %c0_i32, %c0_i32_0 : i32, i32, i32
  }
  func.func @transform_4(%arg0: i32) -> (i32, i32, i32) {
    %c0_i32 = arith.constant 0 : i32
    %c0_i32_0 = arith.constant 0 : i32
    %c0_i32_1 = arith.constant 0 : i32
    return %arg0, %c0_i32, %c0_i32_0 : i32, i32, i32
  }
}

module attributes {stable_mosaic.version = 11 : i64} {
  func.func @kernel(%arg0: i32, %arg1: memref<1x2x2x8x8x128xf32, #tpu.memory_space<vmem>>, %arg2: memref<1x128xf32, #tpu.memory_space<vmem>>, %arg3: memref<1x128xf32, #tpu.memory_space<vmem>>, %arg4: memref<1152x128xf32, #tpu.memory_space<vmem>>, %arg5: memref<64x128xf32, #tpu.memory_space<vmem>>, %arg6: memref<1x1x128xf32, #tpu.memory_space<vmem>>, %arg7: memref<1x1x128xf32, #tpu.memory_space<vmem>>, %arg8: memref<2x2x9x9x128xf32, #tpu.memory_space<vmem>>) attributes {dimension_semantics = [#tpu.dimension_semantics<parallel>], iteration_bounds = array<i64: 2>, scalar_prefetch = 0 : i64, scratch_operands = 1 : i64, tpu.core_type = #tpu.core_type<tc>, window_params = [{transform_indices = @transform_0, window_bounds = array<i64: 1, 2, 2, 8, 8, 128>}, {pipeline_mode = #tpu.pipeline_mode<synchronous>, transform_indices = @transform_1, window_bounds = array<i64: 1, 128>}, {pipeline_mode = #tpu.pipeline_mode<synchronous>, transform_indices = @transform_2, window_bounds = array<i64: 1, 128>}, {pipeline_mode = #tpu.pipeline_mode<synchronous>, transform_indices = @transform_3, window_bounds = array<i64: 1152, 128>}, {transform_indices = @transform_4, window_bounds = array<i64: 64, 128>}, {transform_indices = @transform_5, window_bounds = array<i64: 1, 1, 128>}, {transform_indices = @transform_6, window_bounds = array<i64: 1, 1, 128>}]} {
    %cst = arith.constant 0.000000e+00 : f32
    %0 = vector.broadcast %cst : f32 to vector<2x2x9x9x128xf32>
    %c0 = arith.constant 0 : index
    %c0_0 = arith.constant 0 : index
    %c0_1 = arith.constant 0 : index
    %c0_2 = arith.constant 0 : index
    %c0_3 = arith.constant 0 : index
    %1 = vector.load %arg8[%c0, %c0_0, %c0_1, %c0_2, %c0_3] : memref<2x2x9x9x128xf32, #tpu.memory_space<vmem>>, vector<2x2x9x9x128xf32>
    tpu.vector_store %arg8[%c0, %c0_0, %c0_1, %c0_2, %c0_3], %0 {strides = array<i32>} : memref<2x2x9x9x128xf32, #tpu.memory_space<vmem>>, vector<2x2x9x9x128xf32>,
    %c0_4 = arith.constant 0 : index
    %c0_5 = arith.constant 0 : index
    %c0_6 = arith.constant 0 : index
    %c0_7 = arith.constant 0 : index
    %c0_8 = arith.constant 0 : index
    %c0_9 = arith.constant 0 : index
    %2 = vector.load %arg1[%c0_4, %c0_5, %c0_6, %c0_7, %c0_8, %c0_9] : memref<1x2x2x8x8x128xf32, #tpu.memory_space<vmem>>, vector<1x1x1x8x8x128xf32>
    %3 = vector.shape_cast %2 : vector<1x1x1x8x8x128xf32> to vector<8x8x128xf32>
    %c0_10 = arith.constant 0 : index
    %c0_11 = arith.constant 0 : index
    %4 = vector.load %arg2[%c0_10, %c0_11] : memref<1x128xf32, #tpu.memory_space<vmem>>, vector<1x128xf32>
    %5 = vector.shape_cast %4 : vector<1x128xf32> to vector<1x1x128xf32>
    %6 = vector.broadcast %5 : vector<1x1x128xf32> to vector<8x8x128xf32>
    %7 = arith.mulf %3, %6 : vector<8x8x128xf32>
    %c0_12 = arith.constant 0 : index
    %c0_13 = arith.constant 0 : index
    %8 = vector.load %arg3[%c0_12, %c0_13] : memref<1x128xf32, #tpu.memory_space<vmem>>, vector<1x128xf32>
    %9 = vector.shape_cast %8 : vector<1x128xf32> to vector<1x1x128xf32>
    %10 = vector.broadcast %9 : vector<1x1x128xf32> to vector<8x8x128xf32>
    %11 = arith.addf %7, %10 : vector<8x8x128xf32>
    %cst_14 = arith.constant 0.000000e+00 : f32
    %12 = vector.broadcast %cst_14 : f32 to vector<8x8x128xf32>
    %13 = arith.maximumf %11, %12 : vector<8x8x128xf32>
    %c0_15 = arith.constant 0 : index
    %c0_16 = arith.constant 0 : index
    %c1 = arith.constant 1 : index
    %c1_17 = arith.constant 1 : index
    %c0_18 = arith.constant 0 : index
    %14 = vector.load %arg8[%c0_15, %c0_16, %c1, %c1_17, %c0_18] : memref<2x2x9x9x128xf32, #tpu.memory_space<vmem>>, vector<1x1x8x8x128xf32>
    %15 = vector.shape_cast %14 : vector<1x1x8x8x128xf32> to vector<8x8x128xf32>
    %16 = vector.shape_cast %13 : vector<8x8x128xf32> to vector<1x1x8x8x128xf32>
    tpu.vector_store %arg8[%c0_15, %c0_16, %c1, %c1_17, %c0_18], %16 {strides = array<i32>} : memref<2x2x9x9x128xf32, #tpu.memory_space<vmem>>, vector<1x1x8x8x128xf32>,
    %c0_19 = arith.constant 0 : index
    %c0_20 = arith.constant 0 : index
    %c1_21 = arith.constant 1 : index
    %c0_22 = arith.constant 0 : index
    %c0_23 = arith.constant 0 : index
    %c0_24 = arith.constant 0 : index
    %17 = vector.load %arg1[%c0_19, %c0_20, %c1_21, %c0_22, %c0_23, %c0_24] : memref<1x2x2x8x8x128xf32, #tpu.memory_space<vmem>>, vector<1x1x1x8x8x128xf32>
    %18 = vector.shape_cast %17 : vector<1x1x1x8x8x128xf32> to vector<8x8x128xf32>
    %c0_25 = arith.constant 0 : index
    %c0_26 = arith.constant 0 : index
    %19 = vector.load %arg2[%c0_25, %c0_26] : memref<1x128xf32, #tpu.memory_space<vmem>>, vector<1x128xf32>
    %20 = vector.shape_cast %19 : vector<1x128xf32> to vector<1x1x128xf32>
    %21 = vector.broadcast %20 : vector<1x1x128xf32> to vector<8x8x128xf32>
    %22 = arith.mulf %18, %21 : vector<8x8x128xf32>
    %c0_27 = arith.constant 0 : index
    %c0_28 = arith.constant 0 : index
    %23 = vector.load %arg3[%c0_27, %c0_28] : memref<1x128xf32, #tpu.memory_space<vmem>>, vector<1x128xf32>
    %24 = vector.shape_cast %23 : vector<1x128xf32> to vector<1x1x128xf32>
    %25 = vector.broadcast %24 : vector<1x1x128xf32> to vector<8x8x128xf32>
    %26 = arith.addf %22, %25 : vector<8x8x128xf32>
    %cst_29 = arith.constant 0.000000e+00 : f32
    %27 = vector.broadcast %cst_29 : f32 to vector<8x8x128xf32>
    %28 = arith.maximumf %26, %27 : vector<8x8x128xf32>
    %c0_30 = arith.constant 0 : index
    %c1_31 = arith.constant 1 : index
    %c1_32 = arith.constant 1 : index
    %c1_33 = arith.constant 1 : index
    %c0_34 = arith.constant 0 : index
    %29 = vector.load %arg8[%c0_30, %c1_31, %c1_32, %c1_33, %c0_34] : memref<2x2x9x9x128xf32, #tpu.memory_space<vmem>>, vector<1x1x8x8x128xf32>
    %30 = vector.shape_cast %29 : vector<1x1x8x8x128xf32> to vector<8x8x128xf32>
    %31 = vector.shape_cast %28 : vector<8x8x128xf32> to vector<1x1x8x8x128xf32>
    tpu.vector_store %arg8[%c0_30, %c1_31, %c1_32, %c1_33, %c0_34], %31 {strides = array<i32>} : memref<2x2x9x9x128xf32, #tpu.memory_space<vmem>>, vector<1x1x8x8x128xf32>,
    %c0_35 = arith.constant 0 : index
    %c1_36 = arith.constant 1 : index
    %c0_37 = arith.constant 0 : index
    %c0_38 = arith.constant 0 : index
    %c0_39 = arith.constant 0 : index
    %c0_40 = arith.constant 0 : index
    %32 = vector.load %arg1[%c0_35, %c1_36, %c0_37, %c0_38, %c0_39, %c0_40] : memref<1x2x2x8x8x128xf32, #tpu.memory_space<vmem>>, vector<1x1x1x8x8x128xf32>
    %33 = vector.shape_cast %32 : vector<1x1x1x8x8x128xf32> to vector<8x8x128xf32>
    %c0_41 = arith.constant 0 : index
    %c0_42 = arith.constant 0 : index
    %34 = vector.load %arg2[%c0_41, %c0_42] : memref<1x128xf32, #tpu.memory_space<vmem>>, vector<1x128xf32>
    %35 = vector.shape_cast %34 : vector<1x128xf32> to vector<1x1x128xf32>
    %36 = vector.broadcast %35 : vector<1x1x128xf32> to vector<8x8x128xf32>
    %37 = arith.mulf %33, %36 : vector<8x8x128xf32>
    %c0_43 = arith.constant 0 : index
    %c0_44 = arith.constant 0 : index
    %38 = vector.load %arg3[%c0_43, %c0_44] : memref<1x128xf32, #tpu.memory_space<vmem>>, vector<1x128xf32>
    %39 = vector.shape_cast %38 : vector<1x128xf32> to vector<1x1x128xf32>
    %40 = vector.broadcast %39 : vector<1x1x128xf32> to vector<8x8x128xf32>
    %41 = arith.addf %37, %40 : vector<8x8x128xf32>
    %cst_45 = arith.constant 0.000000e+00 : f32
    %42 = vector.broadcast %cst_45 : f32 to vector<8x8x128xf32>
    %43 = arith.maximumf %41, %42 : vector<8x8x128xf32>
    %c1_46 = arith.constant 1 : index
    %c0_47 = arith.constant 0 : index
    %c1_48 = arith.constant 1 : index
    %c1_49 = arith.constant 1 : index
    %c0_50 = arith.constant 0 : index
    %44 = vector.load %arg8[%c1_46, %c0_47, %c1_48, %c1_49, %c0_50] : memref<2x2x9x9x128xf32, #tpu.memory_space<vmem>>, vector<1x1x8x8x128xf32>
    %45 = vector.shape_cast %44 : vector<1x1x8x8x128xf32> to vector<8x8x128xf32>
    %46 = vector.shape_cast %43 : vector<8x8x128xf32> to vector<1x1x8x8x128xf32>
    tpu.vector_store %arg8[%c1_46, %c0_47, %c1_48, %c1_49, %c0_50], %46 {strides = array<i32>} : memref<2x2x9x9x128xf32, #tpu.memory_space<vmem>>, vector<1x1x8x8x128xf32>,
    %c0_51 = arith.constant 0 : index
    %c1_52 = arith.constant 1 : index
    %c1_53 = arith.constant 1 : index
    %c0_54 = arith.constant 0 : index
    %c0_55 = arith.constant 0 : index
    %c0_56 = arith.constant 0 : index
    %47 = vector.load %arg1[%c0_51, %c1_52, %c1_53, %c0_54, %c0_55, %c0_56] : memref<1x2x2x8x8x128xf32, #tpu.memory_space<vmem>>, vector<1x1x1x8x8x128xf32>
    %48 = vector.shape_cast %47 : vector<1x1x1x8x8x128xf32> to vector<8x8x128xf32>
    %c0_57 = arith.constant 0 : index
    %c0_58 = arith.constant 0 : index
    %49 = vector.load %arg2[%c0_57, %c0_58] : memref<1x128xf32, #tpu.memory_space<vmem>>, vector<1x128xf32>
    %50 = vector.shape_cast %49 : vector<1x128xf32> to vector<1x1x128xf32>
    %51 = vector.broadcast %50 : vector<1x1x128xf32> to vector<8x8x128xf32>
    %52 = arith.mulf %48, %51 : vector<8x8x128xf32>
    %c0_59 = arith.constant 0 : index
    %c0_60 = arith.constant 0 : index
    %53 = vector.load %arg3[%c0_59, %c0_60] : memref<1x128xf32, #tpu.memory_space<vmem>>, vector<1x128xf32>
    %54 = vector.shape_cast %53 : vector<1x128xf32> to vector<1x1x128xf32>
    %55 = vector.broadcast %54 : vector<1x1x128xf32> to vector<8x8x128xf32>
    %56 = arith.addf %52, %55 : vector<8x8x128xf32>
    %cst_61 = arith.constant 0.000000e+00 : f32
    %57 = vector.broadcast %cst_61 : f32 to vector<8x8x128xf32>
    %58 = arith.maximumf %56, %57 : vector<8x8x128xf32>
    %c1_62 = arith.constant 1 : index
    %c1_63 = arith.constant 1 : index
    %c1_64 = arith.constant 1 : index
    %c1_65 = arith.constant 1 : index
    %c0_66 = arith.constant 0 : index
    %59 = vector.load %arg8[%c1_62, %c1_63, %c1_64, %c1_65, %c0_66] : memref<2x2x9x9x128xf32, #tpu.memory_space<vmem>>, vector<1x1x8x8x128xf32>
    %60 = vector.shape_cast %59 : vector<1x1x8x8x128xf32> to vector<8x8x128xf32>
    %61 = vector.shape_cast %58 : vector<8x8x128xf32> to vector<1x1x8x8x128xf32>
    tpu.vector_store %arg8[%c1_62, %c1_63, %c1_64, %c1_65, %c0_66], %61 {strides = array<i32>} : memref<2x2x9x9x128xf32, #tpu.memory_space<vmem>>, vector<1x1x8x8x128xf32>,
    %cst_67 = arith.constant 0.000000e+00 : f32
    %62 = vector.broadcast %cst_67 : f32 to vector<64x128xf32>
    %c1_68 = arith.constant 1 : index
    %c1_69 = arith.constant 1 : index
    %c0_70 = arith.constant 0 : index
    %c0_71 = arith.constant 0 : index
    %c0_72 = arith.constant 0 : index
    %63 = vector.load %arg8[%c1_68, %c1_69, %c0_70, %c0_71, %c0_72] : memref<2x2x9x9x128xf32, #tpu.memory_space<vmem>>, vector<1x1x8x8x128xf32>
    %64 = vector.shape_cast %63 : vector<1x1x8x8x128xf32> to vector<8x8x128xf32>
    %65 = vector.shape_cast %64 : vector<8x8x128xf32> to vector<64x128xf32>
    %c0_73 = arith.constant 0 : index
    %c0_74 = arith.constant 0 : index
    %66 = vector.load %arg4[%c0_73, %c0_74] : memref<1152x128xf32, #tpu.memory_space<vmem>>, vector<128x128xf32>
    %cst_75 = arith.constant dense<0.000000e+00> : vector<64x128xf32>
    %67 = tpu.matmul %65, %66, %cst_75 {dimension_numbers = #tpu.dot_dimension_numbers<[1], [0], [0], [1], [0, 0, 1, 1], [], []>} : vector<64x128xf32>, vector<128x128xf32>, vector<64x128xf32> -> vector<64x128xf32>
    %68 = arith.addf %62, %67 : vector<64x128xf32>
    %c1_76 = arith.constant 1 : index
    %c0_77 = arith.constant 0 : index
    %c0_78 = arith.constant 0 : index
    %c1_79 = arith.constant 1 : index
    %c0_80 = arith.constant 0 : index
    %69 = vector.load %arg8[%c1_76, %c0_77, %c0_78, %c1_79, %c0_80] : memref<2x2x9x9x128xf32, #tpu.memory_space<vmem>>, vector<1x1x8x8x128xf32>
    %70 = vector.shape_cast %69 : vector<1x1x8x8x128xf32> to vector<8x8x128xf32>
    %71 = vector.shape_cast %70 : vector<8x8x128xf32> to vector<64x128xf32>
    %c128 = arith.constant 128 : index
    %c0_81 = arith.constant 0 : index
    %72 = vector.load %arg4[%c128, %c0_81] : memref<1152x128xf32, #tpu.memory_space<vmem>>, vector<128x128xf32>
    %cst_82 = arith.constant dense<0.000000e+00> : vector<64x128xf32>
    %73 = tpu.matmul %71, %72, %cst_82 {dimension_numbers = #tpu.dot_dimension_numbers<[1], [0], [0], [1], [0, 0, 1, 1], [], []>} : vector<64x128xf32>, vector<128x128xf32>, vector<64x128xf32> -> vector<64x128xf32>
    %74 = arith.addf %68, %73 : vector<64x128xf32>
    %c1_83 = arith.constant 1 : index
    %c1_84 = arith.constant 1 : index
    %c0_85 = arith.constant 0 : index
    %c1_86 = arith.constant 1 : index
    %c0_87 = arith.constant 0 : index
    %75 = vector.load %arg8[%c1_83, %c1_84, %c0_85, %c1_86, %c0_87] : memref<2x2x9x9x128xf32, #tpu.memory_space<vmem>>, vector<1x1x8x8x128xf32>
    %76 = vector.shape_cast %75 : vector<1x1x8x8x128xf32> to vector<8x8x128xf32>
    %77 = vector.shape_cast %76 : vector<8x8x128xf32> to vector<64x128xf32>
    %c256 = arith.constant 256 : index
    %c0_88 = arith.constant 0 : index
    %78 = vector.load %arg4[%c256, %c0_88] : memref<1152x128xf32, #tpu.memory_space<vmem>>, vector<128x128xf32>
    %cst_89 = arith.constant dense<0.000000e+00> : vector<64x128xf32>
    %79 = tpu.matmul %77, %78, %cst_89 {dimension_numbers = #tpu.dot_dimension_numbers<[1], [0], [0], [1], [0, 0, 1, 1], [], []>} : vector<64x128xf32>, vector<128x128xf32>, vector<64x128xf32> -> vector<64x128xf32>
    %80 = arith.addf %74, %79 : vector<64x128xf32>
    %c0_90 = arith.constant 0 : index
    %c1_91 = arith.constant 1 : index
    %c1_92 = arith.constant 1 : index
    %c0_93 = arith.constant 0 : index
    %c0_94 = arith.constant 0 : index
    %81 = vector.load %arg8[%c0_90, %c1_91, %c1_92, %c0_93, %c0_94] : memref<2x2x9x9x128xf32, #tpu.memory_space<vmem>>, vector<1x1x8x8x128xf32>
    %82 = vector.shape_cast %81 : vector<1x1x8x8x128xf32> to vector<8x8x128xf32>
    %83 = vector.shape_cast %82 : vector<8x8x128xf32> to vector<64x128xf32>
    %c384 = arith.constant 384 : index
    %c0_95 = arith.constant 0 : index
    %84 = vector.load %arg4[%c384, %c0_95] : memref<1152x128xf32, #tpu.memory_space<vmem>>, vector<128x128xf32>
    %cst_96 = arith.constant dense<0.000000e+00> : vector<64x128xf32>
    %85 = tpu.matmul %83, %84, %cst_96 {dimension_numbers = #tpu.dot_dimension_numbers<[1], [0], [0], [1], [0, 0, 1, 1], [], []>} : vector<64x128xf32>, vector<128x128xf32>, vector<64x128xf32> -> vector<64x128xf32>
    %86 = arith.addf %80, %85 : vector<64x128xf32>
    %c0_97 = arith.constant 0 : index
    %c0_98 = arith.constant 0 : index
    %c1_99 = arith.constant 1 : index
    %c1_100 = arith.constant 1 : index
    %c0_101 = arith.constant 0 : index
    %87 = vector.load %arg8[%c0_97, %c0_98, %c1_99, %c1_100, %c0_101] : memref<2x2x9x9x128xf32, #tpu.memory_space<vmem>>, vector<1x1x8x8x128xf32>
    %88 = vector.shape_cast %87 : vector<1x1x8x8x128xf32> to vector<8x8x128xf32>
    %89 = vector.shape_cast %88 : vector<8x8x128xf32> to vector<64x128xf32>
    %c512 = arith.constant 512 : index
    %c0_102 = arith.constant 0 : index
    %90 = vector.load %arg4[%c512, %c0_102] : memref<1152x128xf32, #tpu.memory_space<vmem>>, vector<128x128xf32>
    %cst_103 = arith.constant dense<0.000000e+00> : vector<64x128xf32>
    %91 = tpu.matmul %89, %90, %cst_103 {dimension_numbers = #tpu.dot_dimension_numbers<[1], [0], [0], [1], [0, 0, 1, 1], [], []>} : vector<64x128xf32>, vector<128x128xf32>, vector<64x128xf32> -> vector<64x128xf32>
    %92 = arith.addf %86, %91 : vector<64x128xf32>
    %c0_104 = arith.constant 0 : index
    %c1_105 = arith.constant 1 : index
    %c1_106 = arith.constant 1 : index
    %c1_107 = arith.constant 1 : index
    %c0_108 = arith.constant 0 : index
    %93 = vector.load %arg8[%c0_104, %c1_105, %c1_106, %c1_107, %c0_108] : memref<2x2x9x9x128xf32, #tpu.memory_space<vmem>>, vector<1x1x8x8x128xf32>
    %94 = vector.shape_cast %93 : vector<1x1x8x8x128xf32> to vector<8x8x128xf32>
    %95 = vector.shape_cast %94 : vector<8x8x128xf32> to vector<64x128xf32>
    %c640 = arith.constant 640 : index
    %c0_109 = arith.constant 0 : index
    %96 = vector.load %arg4[%c640, %c0_109] : memref<1152x128xf32, #tpu.memory_space<vmem>>, vector<128x128xf32>
    %cst_110 = arith.constant dense<0.000000e+00> : vector<64x128xf32>
    %97 = tpu.matmul %95, %96, %cst_110 {dimension_numbers = #tpu.dot_dimension_numbers<[1], [0], [0], [1], [0, 0, 1, 1], [], []>} : vector<64x128xf32>, vector<128x128xf32>, vector<64x128xf32> -> vector<64x128xf32>
    %98 = arith.addf %92, %97 : vector<64x128xf32>
    %c1_111 = arith.constant 1 : index
    %c1_112 = arith.constant 1 : index
    %c1_113 = arith.constant 1 : index
    %c0_114 = arith.constant 0 : index
    %c0_115 = arith.constant 0 : index
    %99 = vector.load %arg8[%c1_111, %c1_112, %c1_113, %c0_114, %c0_115] : memref<2x2x9x9x128xf32, #tpu.memory_space<vmem>>, vector<1x1x8x8x128xf32>
    %100 = vector.shape_cast %99 : vector<1x1x8x8x128xf32> to vector<8x8x128xf32>
    %101 = vector.shape_cast %100 : vector<8x8x128xf32> to vector<64x128xf32>
    %c768 = arith.constant 768 : index
    %c0_116 = arith.constant 0 : index
    %102 = vector.load %arg4[%c768, %c0_116] : memref<1152x128xf32, #tpu.memory_space<vmem>>, vector<128x128xf32>
    %cst_117 = arith.constant dense<0.000000e+00> : vector<64x128xf32>
    %103 = tpu.matmul %101, %102, %cst_117 {dimension_numbers = #tpu.dot_dimension_numbers<[1], [0], [0], [1], [0, 0, 1, 1], [], []>} : vector<64x128xf32>, vector<128x128xf32>, vector<64x128xf32> -> vector<64x128xf32>
    %104 = arith.addf %98, %103 : vector<64x128xf32>
    %c1_118 = arith.constant 1 : index
    %c0_119 = arith.constant 0 : index
    %c1_120 = arith.constant 1 : index
    %c1_121 = arith.constant 1 : index
    %c0_122 = arith.constant 0 : index
    %105 = vector.load %arg8[%c1_118, %c0_119, %c1_120, %c1_121, %c0_122] : memref<2x2x9x9x128xf32, #tpu.memory_space<vmem>>, vector<1x1x8x8x128xf32>
    %106 = vector.shape_cast %105 : vector<1x1x8x8x128xf32> to vector<8x8x128xf32>
    %107 = vector.shape_cast %106 : vector<8x8x128xf32> to vector<64x128xf32>
    %c896 = arith.constant 896 : index
    %c0_123 = arith.constant 0 : index
    %108 = vector.load %arg4[%c896, %c0_123] : memref<1152x128xf32, #tpu.memory_space<vmem>>, vector<128x128xf32>
    %cst_124 = arith.constant dense<0.000000e+00> : vector<64x128xf32>
    %109 = tpu.matmul %107, %108, %cst_124 {dimension_numbers = #tpu.dot_dimension_numbers<[1], [0], [0], [1], [0, 0, 1, 1], [], []>} : vector<64x128xf32>, vector<128x128xf32>, vector<64x128xf32> -> vector<64x128xf32>
    %110 = arith.addf %104, %109 : vector<64x128xf32>
    %c1_125 = arith.constant 1 : index
    %c1_126 = arith.constant 1 : index
    %c1_127 = arith.constant 1 : index
    %c1_128 = arith.constant 1 : index
    %c0_129 = arith.constant 0 : index
    %111 = vector.load %arg8[%c1_125, %c1_126, %c1_127, %c1_128, %c0_129] : memref<2x2x9x9x128xf32, #tpu.memory_space<vmem>>, vector<1x1x8x8x128xf32>
    %112 = vector.shape_cast %111 : vector<1x1x8x8x128xf32> to vector<8x8x128xf32>
    %113 = vector.shape_cast %112 : vector<8x8x128xf32> to vector<64x128xf32>
    %c1024 = arith.constant 1024 : index
    %c0_130 = arith.constant 0 : index
    %114 = vector.load %arg4[%c1024, %c0_130] : memref<1152x128xf32, #tpu.memory_space<vmem>>, vector<128x128xf32>
    %cst_131 = arith.constant dense<0.000000e+00> : vector<64x128xf32>
    %115 = tpu.matmul %113, %114, %cst_131 {dimension_numbers = #tpu.dot_dimension_numbers<[1], [0], [0], [1], [0, 0, 1, 1], [], []>} : vector<64x128xf32>, vector<128x128xf32>, vector<64x128xf32> -> vector<64x128xf32>
    %116 = arith.addf %110, %115 : vector<64x128xf32>
    %c0_132 = arith.constant 0 : index
    %c0_133 = arith.constant 0 : index
    %117 = vector.load %arg5[%c0_132, %c0_133] : memref<64x128xf32, #tpu.memory_space<vmem>>, vector<64x128xf32>
    tpu.vector_store %arg5[%c0_132, %c0_133], %116 {strides = array<i32>} : memref<64x128xf32, #tpu.memory_space<vmem>>, vector<64x128xf32>,
    %cst_134 = arith.constant dense<0.000000e+00> : vector<128xf32>
    %118 = vector.multi_reduction <add>, %116, %cst_134 [0] : vector<64x128xf32> to vector<128xf32>
    %119 = vector.shape_cast %118 : vector<128xf32> to vector<1x128xf32>
    %120 = vector.shape_cast %119 : vector<1x128xf32> to vector<1x1x128xf32>
    %c0_135 = arith.constant 0 : index
    %c0_136 = arith.constant 0 : index
    %c0_137 = arith.constant 0 : index
    %121 = vector.load %arg6[%c0_135, %c0_136, %c0_137] : memref<1x1x128xf32, #tpu.memory_space<vmem>>, vector<1x1x128xf32>
    tpu.vector_store %arg6[%c0_135, %c0_136, %c0_137], %120 {strides = array<i32>} : memref<1x1x128xf32, #tpu.memory_space<vmem>>, vector<1x1x128xf32>,
    %122 = arith.mulf %116, %116 : vector<64x128xf32>
    %cst_138 = arith.constant dense<0.000000e+00> : vector<128xf32>
    %123 = vector.multi_reduction <add>, %122, %cst_138 [0] : vector<64x128xf32> to vector<128xf32>
    %124 = vector.shape_cast %123 : vector<128xf32> to vector<1x128xf32>
    %125 = vector.shape_cast %124 : vector<1x128xf32> to vector<1x1x128xf32>
    %c0_139 = arith.constant 0 : index
    %c0_140 = arith.constant 0 : index
    %c0_141 = arith.constant 0 : index
    %126 = vector.load %arg7[%c0_139, %c0_140, %c0_141] : memref<1x1x128xf32, #tpu.memory_space<vmem>>, vector<1x1x128xf32>
    tpu.vector_store %arg7[%c0_139, %c0_140, %c0_141], %125 {strides = array<i32>} : memref<1x1x128xf32, #tpu.memory_space<vmem>>, vector<1x1x128xf32>,
    return
  }
  func.func @transform_0(%arg0: i32) -> (i32, i32, i32, i32, i32, i32) {
    %c0_i32 = arith.constant 0 : i32
    %c0_i32_0 = arith.constant 0 : i32
    %c0_i32_1 = arith.constant 0 : i32
    %c0_i32_2 = arith.constant 0 : i32
    %c0_i32_3 = arith.constant 0 : i32
    %c0_i32_4 = arith.constant 0 : i32
    return %arg0, %c0_i32, %c0_i32_0, %c0_i32_1, %c0_i32_2, %c0_i32_3 : i32, i32, i32, i32, i32, i32
  }
  func.func @transform_1(%arg0: i32) -> (i32, i32) {
    %c0_i32 = arith.constant 0 : i32
    %c0_i32_0 = arith.constant 0 : i32
    %c0_i32_1 = arith.constant 0 : i32
    return %c0_i32, %c0_i32_0 : i32, i32
  }
  func.func @transform_2(%arg0: i32) -> (i32, i32) {
    %c0_i32 = arith.constant 0 : i32
    %c0_i32_0 = arith.constant 0 : i32
    %c0_i32_1 = arith.constant 0 : i32
    return %c0_i32, %c0_i32_0 : i32, i32
  }
  func.func @transform_3(%arg0: i32) -> (i32, i32) {
    %c0_i32 = arith.constant 0 : i32
    %c0_i32_0 = arith.constant 0 : i32
    %c0_i32_1 = arith.constant 0 : i32
    return %c0_i32, %c0_i32_0 : i32, i32
  }
  func.func @transform_4(%arg0: i32) -> (i32, i32) {
    %c0_i32 = arith.constant 0 : i32
    %c0_i32_0 = arith.constant 0 : i32
    return %arg0, %c0_i32 : i32, i32
  }
  func.func @transform_5(%arg0: i32) -> (i32, i32, i32) {
    %c0_i32 = arith.constant 0 : i32
    %c0_i32_0 = arith.constant 0 : i32
    %c0_i32_1 = arith.constant 0 : i32
    return %arg0, %c0_i32, %c0_i32_0 : i32, i32, i32
  }
  func.func @transform_6(%arg0: i32) -> (i32, i32, i32) {
    %c0_i32 = arith.constant 0 : i32
    %c0_i32_0 = arith.constant 0 : i32
    %c0_i32_1 = arith.constant 0 : i32
    return %arg0, %c0_i32, %c0_i32_0 : i32, i32, i32
  }
}

module attributes {stable_mosaic.version = 11 : i64} {
  func.func @kernel(%arg0: i32, %arg1: memref<128x128xf32, #tpu.memory_space<vmem>>, %arg2: memref<1x128xf32, #tpu.memory_space<vmem>>, %arg3: memref<1x128xf32, #tpu.memory_space<vmem>>, %arg4: memref<128x128xf32, #tpu.memory_space<vmem>>, %arg5: memref<128x128xf32, #tpu.memory_space<vmem>>, %arg6: memref<1x1x128xf32, #tpu.memory_space<vmem>>, %arg7: memref<1x1x128xf32, #tpu.memory_space<vmem>>) attributes {dimension_semantics = [#tpu.dimension_semantics<parallel>], iteration_bounds = array<i64: 1>, scalar_prefetch = 0 : i64, scratch_operands = 0 : i64, tpu.core_type = #tpu.core_type<tc>, window_params = [{transform_indices = @transform_0, window_bounds = array<i64: 128, 128>}, {pipeline_mode = #tpu.pipeline_mode<synchronous>, transform_indices = @transform_1, window_bounds = array<i64: 1, 128>}, {pipeline_mode = #tpu.pipeline_mode<synchronous>, transform_indices = @transform_2, window_bounds = array<i64: 1, 128>}, {pipeline_mode = #tpu.pipeline_mode<synchronous>, transform_indices = @transform_3, window_bounds = array<i64: 128, 128>}, {transform_indices = @transform_4, window_bounds = array<i64: 128, 128>}, {transform_indices = @transform_5, window_bounds = array<i64: 1, 1, 128>}, {transform_indices = @transform_6, window_bounds = array<i64: 1, 1, 128>}]} {
    %c0 = arith.constant 0 : index
    %c0_0 = arith.constant 0 : index
    %0 = vector.load %arg1[%c0, %c0_0] : memref<128x128xf32, #tpu.memory_space<vmem>>, vector<128x128xf32>
    %c0_1 = arith.constant 0 : index
    %c0_2 = arith.constant 0 : index
    %1 = vector.load %arg2[%c0_1, %c0_2] : memref<1x128xf32, #tpu.memory_space<vmem>>, vector<1x128xf32>
    %2 = vector.broadcast %1 : vector<1x128xf32> to vector<128x128xf32>
    %3 = arith.mulf %0, %2 : vector<128x128xf32>
    %c0_3 = arith.constant 0 : index
    %c0_4 = arith.constant 0 : index
    %4 = vector.load %arg3[%c0_3, %c0_4] : memref<1x128xf32, #tpu.memory_space<vmem>>, vector<1x128xf32>
    %5 = vector.broadcast %4 : vector<1x128xf32> to vector<128x128xf32>
    %6 = arith.addf %3, %5 : vector<128x128xf32>
    %cst = arith.constant 0.000000e+00 : f32
    %7 = vector.broadcast %cst : f32 to vector<128x128xf32>
    %8 = arith.maximumf %6, %7 : vector<128x128xf32>
    %c0_5 = arith.constant 0 : index
    %c0_6 = arith.constant 0 : index
    %9 = vector.load %arg4[%c0_5, %c0_6] : memref<128x128xf32, #tpu.memory_space<vmem>>, vector<128x128xf32>
    %cst_7 = arith.constant dense<0.000000e+00> : vector<128x128xf32>
    %10 = tpu.matmul %8, %9, %cst_7 {dimension_numbers = #tpu.dot_dimension_numbers<[1], [0], [0], [1], [0, 0, 1, 1], [], []>} : vector<128x128xf32>, vector<128x128xf32>, vector<128x128xf32> -> vector<128x128xf32>
    %c0_8 = arith.constant 0 : index
    %c0_9 = arith.constant 0 : index
    %11 = vector.load %arg5[%c0_8, %c0_9] : memref<128x128xf32, #tpu.memory_space<vmem>>, vector<128x128xf32>
    tpu.vector_store %arg5[%c0_8, %c0_9], %10 {strides = array<i32>} : memref<128x128xf32, #tpu.memory_space<vmem>>, vector<128x128xf32>,
    %cst_10 = arith.constant dense<0.000000e+00> : vector<128xf32>
    %12 = vector.multi_reduction <add>, %10, %cst_10 [0] : vector<128x128xf32> to vector<128xf32>
    %13 = vector.shape_cast %12 : vector<128xf32> to vector<1x128xf32>
    %14 = vector.shape_cast %13 : vector<1x128xf32> to vector<1x1x128xf32>
    %c0_11 = arith.constant 0 : index
    %c0_12 = arith.constant 0 : index
    %c0_13 = arith.constant 0 : index
    %15 = vector.load %arg6[%c0_11, %c0_12, %c0_13] : memref<1x1x128xf32, #tpu.memory_space<vmem>>, vector<1x1x128xf32>
    tpu.vector_store %arg6[%c0_11, %c0_12, %c0_13], %14 {strides = array<i32>} : memref<1x1x128xf32, #tpu.memory_space<vmem>>, vector<1x1x128xf32>,
    %16 = arith.mulf %10, %10 : vector<128x128xf32>
    %cst_14 = arith.constant dense<0.000000e+00> : vector<128xf32>
    %17 = vector.multi_reduction <add>, %16, %cst_14 [0] : vector<128x128xf32> to vector<128xf32>
    %18 = vector.shape_cast %17 : vector<128xf32> to vector<1x128xf32>
    %19 = vector.shape_cast %18 : vector<1x128xf32> to vector<1x1x128xf32>
    %c0_15 = arith.constant 0 : index
    %c0_16 = arith.constant 0 : index
    %c0_17 = arith.constant 0 : index
    %20 = vector.load %arg7[%c0_15, %c0_16, %c0_17] : memref<1x1x128xf32, #tpu.memory_space<vmem>>, vector<1x1x128xf32>
    tpu.vector_store %arg7[%c0_15, %c0_16, %c0_17], %19 {strides = array<i32>} : memref<1x1x128xf32, #tpu.memory_space<vmem>>, vector<1x1x128xf32>,
    return
  }
  func.func @transform_0(%arg0: i32) -> (i32, i32) {
    %c0_i32 = arith.constant 0 : i32
    %c0_i32_0 = arith.constant 0 : i32
    return %arg0, %c0_i32 : i32, i32
  }
  func.func @transform_1(%arg0: i32) -> (i32, i32) {
    %c0_i32 = arith.constant 0 : i32
    %c0_i32_0 = arith.constant 0 : i32
    %c0_i32_1 = arith.constant 0 : i32
    return %c0_i32, %c0_i32_0 : i32, i32
  }
  func.func @transform_2(%arg0: i32) -> (i32, i32) {
    %c0_i32 = arith.constant 0 : i32
    %c0_i32_0 = arith.constant 0 : i32
    %c0_i32_1 = arith.constant 0 : i32
    return %c0_i32, %c0_i32_0 : i32, i32
  }
  func.func @transform_3(%arg0: i32) -> (i32, i32) {
    %c0_i32 = arith.constant 0 : i32
    %c0_i32_0 = arith.constant 0 : i32
    %c0_i32_1 = arith.constant 0 : i32
    return %c0_i32, %c0_i32_0 : i32, i32
  }
  func.func @transform_4(%arg0: i32) -> (i32, i32) {
    %c0_i32 = arith.constant 0 : i32
    %c0_i32_0 = arith.constant 0 : i32
    return %arg0, %c0_i32 : i32, i32
  }
  func.func @transform_5(%arg0: i32) -> (i32, i32, i32) {
    %c0_i32 = arith.constant 0 : i32
    %c0_i32_0 = arith.constant 0 : i32
    %c0_i32_1 = arith.constant 0 : i32
    return %arg0, %c0_i32, %c0_i32_0 : i32, i32, i32
  }
  func.func @transform_6(%arg0: i32) -> (i32, i32, i32) {
    %c0_i32 = arith.constant 0 : i32
    %c0_i32_0 = arith.constant 0 : i32
    %c0_i32_1 = arith.constant 0 : i32
    return %arg0, %c0_i32, %c0_i32_0 : i32, i32, i32
  }
}

module attributes {stable_mosaic.version = 11 : i64} {
  func.func @kernel(%arg0: i32, %arg1: memref<128x128xf32, #tpu.memory_space<vmem>>, %arg2: memref<128x128xf32, #tpu.memory_space<vmem>>, %arg3: memref<128x128xf32, #tpu.memory_space<vmem>>, %arg4: memref<1x1x128xf32, #tpu.memory_space<vmem>>, %arg5: memref<1x1x128xf32, #tpu.memory_space<vmem>>) attributes {dimension_semantics = [#tpu.dimension_semantics<parallel>], iteration_bounds = array<i64: 1>, scalar_prefetch = 0 : i64, scratch_operands = 0 : i64, tpu.core_type = #tpu.core_type<tc>, window_params = [{transform_indices = @transform_0, window_bounds = array<i64: 128, 128>}, {pipeline_mode = #tpu.pipeline_mode<synchronous>, transform_indices = @transform_1, window_bounds = array<i64: 128, 128>}, {transform_indices = @transform_2, window_bounds = array<i64: 128, 128>}, {transform_indices = @transform_3, window_bounds = array<i64: 1, 1, 128>}, {transform_indices = @transform_4, window_bounds = array<i64: 1, 1, 128>}]} {
    %c0 = arith.constant 0 : index
    %c0_0 = arith.constant 0 : index
    %0 = vector.load %arg1[%c0, %c0_0] : memref<128x128xf32, #tpu.memory_space<vmem>>, vector<128x128xf32>
    %c0_1 = arith.constant 0 : index
    %c0_2 = arith.constant 0 : index
    %1 = vector.load %arg2[%c0_1, %c0_2] : memref<128x128xf32, #tpu.memory_space<vmem>>, vector<128x128xf32>
    %cst = arith.constant dense<0.000000e+00> : vector<128x128xf32>
    %2 = tpu.matmul %0, %1, %cst {dimension_numbers = #tpu.dot_dimension_numbers<[1], [0], [0], [1], [0, 0, 1, 1], [], []>} : vector<128x128xf32>, vector<128x128xf32>, vector<128x128xf32> -> vector<128x128xf32>
    %c0_3 = arith.constant 0 : index
    %c0_4 = arith.constant 0 : index
    %3 = vector.load %arg3[%c0_3, %c0_4] : memref<128x128xf32, #tpu.memory_space<vmem>>, vector<128x128xf32>
    tpu.vector_store %arg3[%c0_3, %c0_4], %2 {strides = array<i32>} : memref<128x128xf32, #tpu.memory_space<vmem>>, vector<128x128xf32>,
    %cst_5 = arith.constant dense<0.000000e+00> : vector<128xf32>
    %4 = vector.multi_reduction <add>, %2, %cst_5 [0] : vector<128x128xf32> to vector<128xf32>
    %5 = vector.shape_cast %4 : vector<128xf32> to vector<1x128xf32>
    %6 = vector.shape_cast %5 : vector<1x128xf32> to vector<1x1x128xf32>
    %c0_6 = arith.constant 0 : index
    %c0_7 = arith.constant 0 : index
    %c0_8 = arith.constant 0 : index
    %7 = vector.load %arg4[%c0_6, %c0_7, %c0_8] : memref<1x1x128xf32, #tpu.memory_space<vmem>>, vector<1x1x128xf32>
    tpu.vector_store %arg4[%c0_6, %c0_7, %c0_8], %6 {strides = array<i32>} : memref<1x1x128xf32, #tpu.memory_space<vmem>>, vector<1x1x128xf32>,
    %8 = arith.mulf %2, %2 : vector<128x128xf32>
    %cst_9 = arith.constant dense<0.000000e+00> : vector<128xf32>
    %9 = vector.multi_reduction <add>, %8, %cst_9 [0] : vector<128x128xf32> to vector<128xf32>
    %10 = vector.shape_cast %9 : vector<128xf32> to vector<1x128xf32>
    %11 = vector.shape_cast %10 : vector<1x128xf32> to vector<1x1x128xf32>
    %c0_10 = arith.constant 0 : index
    %c0_11 = arith.constant 0 : index
    %c0_12 = arith.constant 0 : index
    %12 = vector.load %arg5[%c0_10, %c0_11, %c0_12] : memref<1x1x128xf32, #tpu.memory_space<vmem>>, vector<1x1x128xf32>
    tpu.vector_store %arg5[%c0_10, %c0_11, %c0_12], %11 {strides = array<i32>} : memref<1x1x128xf32, #tpu.memory_space<vmem>>, vector<1x1x128xf32>,
    return
  }
  func.func @transform_0(%arg0: i32) -> (i32, i32) {
    %c0_i32 = arith.constant 0 : i32
    %c0_i32_0 = arith.constant 0 : i32
    return %arg0, %c0_i32 : i32, i32
  }
  func.func @transform_1(%arg0: i32) -> (i32, i32) {
    %c0_i32 = arith.constant 0 : i32
    %c0_i32_0 = arith.constant 0 : i32
    %c0_i32_1 = arith.constant 0 : i32
    return %c0_i32, %c0_i32_0 : i32, i32
  }
  func.func @transform_2(%arg0: i32) -> (i32, i32) {
    %c0_i32 = arith.constant 0 : i32
    %c0_i32_0 = arith.constant 0 : i32
    return %arg0, %c0_i32 : i32, i32
  }
  func.func @transform_3(%arg0: i32) -> (i32, i32, i32) {
    %c0_i32 = arith.constant 0 : i32
    %c0_i32_0 = arith.constant 0 : i32
    %c0_i32_1 = arith.constant 0 : i32
    return %arg0, %c0_i32, %c0_i32_0 : i32, i32, i32
  }
  func.func @transform_4(%arg0: i32) -> (i32, i32, i32) {
    %c0_i32 = arith.constant 0 : i32
    %c0_i32_0 = arith.constant 0 : i32
    %c0_i32_1 = arith.constant 0 : i32
    return %arg0, %c0_i32, %c0_i32_0 : i32, i32, i32
  }
}

module attributes {stable_mosaic.version = 11 : i64} {
  func.func @kernel(%arg0: i32, %arg1: memref<128x128xf32, #tpu.memory_space<vmem>>, %arg2: memref<1x128xf32, #tpu.memory_space<vmem>>, %arg3: memref<1x128xf32, #tpu.memory_space<vmem>>, %arg4: memref<128x128xf32, #tpu.memory_space<vmem>>, %arg5: memref<1x128xf32, #tpu.memory_space<vmem>>, %arg6: memref<1x128xf32, #tpu.memory_space<vmem>>, %arg7: memref<128x128xf32, #tpu.memory_space<vmem>>, %arg8: memref<128x128xf32, #tpu.memory_space<vmem>>) attributes {dimension_semantics = [#tpu.dimension_semantics<parallel>], iteration_bounds = array<i64: 1>, scalar_prefetch = 0 : i64, scratch_operands = 0 : i64, tpu.core_type = #tpu.core_type<tc>, window_params = [{transform_indices = @transform_0, window_bounds = array<i64: 128, 128>}, {pipeline_mode = #tpu.pipeline_mode<synchronous>, transform_indices = @transform_1, window_bounds = array<i64: 1, 128>}, {pipeline_mode = #tpu.pipeline_mode<synchronous>, transform_indices = @transform_2, window_bounds = array<i64: 1, 128>}, {transform_indices = @transform_3, window_bounds = array<i64: 128, 128>}, {pipeline_mode = #tpu.pipeline_mode<synchronous>, transform_indices = @transform_4, window_bounds = array<i64: 1, 128>}, {pipeline_mode = #tpu.pipeline_mode<synchronous>, transform_indices = @transform_5, window_bounds = array<i64: 1, 128>}, {transform_indices = @transform_6, window_bounds = array<i64: 128, 128>}, {transform_indices = @transform_7, window_bounds = array<i64: 128, 128>}]} {
    %c0 = arith.constant 0 : index
    %c0_0 = arith.constant 0 : index
    %0 = vector.load %arg1[%c0, %c0_0] : memref<128x128xf32, #tpu.memory_space<vmem>>, vector<128x128xf32>
    %c0_1 = arith.constant 0 : index
    %c0_2 = arith.constant 0 : index
    %1 = vector.load %arg2[%c0_1, %c0_2] : memref<1x128xf32, #tpu.memory_space<vmem>>, vector<1x128xf32>
    %2 = vector.broadcast %1 : vector<1x128xf32> to vector<128x128xf32>
    %3 = arith.mulf %0, %2 : vector<128x128xf32>
    %c0_3 = arith.constant 0 : index
    %c0_4 = arith.constant 0 : index
    %4 = vector.load %arg3[%c0_3, %c0_4] : memref<1x128xf32, #tpu.memory_space<vmem>>, vector<1x128xf32>
    %5 = vector.broadcast %4 : vector<1x128xf32> to vector<128x128xf32>
    %6 = arith.addf %3, %5 : vector<128x128xf32>
    %c0_5 = arith.constant 0 : index
    %c0_6 = arith.constant 0 : index
    %7 = vector.load %arg4[%c0_5, %c0_6] : memref<128x128xf32, #tpu.memory_space<vmem>>, vector<128x128xf32>
    %c0_7 = arith.constant 0 : index
    %c0_8 = arith.constant 0 : index
    %8 = vector.load %arg5[%c0_7, %c0_8] : memref<1x128xf32, #tpu.memory_space<vmem>>, vector<1x128xf32>
    %9 = vector.broadcast %8 : vector<1x128xf32> to vector<128x128xf32>
    %10 = arith.mulf %7, %9 : vector<128x128xf32>
    %11 = arith.addf %6, %10 : vector<128x128xf32>
    %c0_9 = arith.constant 0 : index
    %c0_10 = arith.constant 0 : index
    %12 = vector.load %arg6[%c0_9, %c0_10] : memref<1x128xf32, #tpu.memory_space<vmem>>, vector<1x128xf32>
    %13 = vector.broadcast %12 : vector<1x128xf32> to vector<128x128xf32>
    %14 = arith.addf %11, %13 : vector<128x128xf32>
    %cst = arith.constant 0.000000e+00 : f32
    %15 = vector.broadcast %cst : f32 to vector<128x128xf32>
    %16 = arith.maximumf %14, %15 : vector<128x128xf32>
    %c0_11 = arith.constant 0 : index
    %c0_12 = arith.constant 0 : index
    %17 = vector.load %arg7[%c0_11, %c0_12] : memref<128x128xf32, #tpu.memory_space<vmem>>, vector<128x128xf32>
    tpu.vector_store %arg7[%c0_11, %c0_12], %16 {strides = array<i32>} : memref<128x128xf32, #tpu.memory_space<vmem>>, vector<128x128xf32>,
    %c0_13 = arith.constant 0 : index
    %c0_14 = arith.constant 0 : index
    %18 = vector.load %arg8[%c0_13, %c0_14] : memref<128x128xf32, #tpu.memory_space<vmem>>, vector<128x128xf32>
    tpu.vector_store %arg8[%c0_13, %c0_14], %14 {strides = array<i32>} : memref<128x128xf32, #tpu.memory_space<vmem>>, vector<128x128xf32>,
    return
  }
  func.func @transform_0(%arg0: i32) -> (i32, i32) {
    %c0_i32 = arith.constant 0 : i32
    %c0_i32_0 = arith.constant 0 : i32
    return %arg0, %c0_i32 : i32, i32
  }
  func.func @transform_1(%arg0: i32) -> (i32, i32) {
    %c0_i32 = arith.constant 0 : i32
    %c0_i32_0 = arith.constant 0 : i32
    %c0_i32_1 = arith.constant 0 : i32
    return %c0_i32, %c0_i32_0 : i32, i32
  }
  func.func @transform_2(%arg0: i32) -> (i32, i32) {
    %c0_i32 = arith.constant 0 : i32
    %c0_i32_0 = arith.constant 0 : i32
    %c0_i32_1 = arith.constant 0 : i32
    return %c0_i32, %c0_i32_0 : i32, i32
  }
  func.func @transform_3(%arg0: i32) -> (i32, i32) {
    %c0_i32 = arith.constant 0 : i32
    %c0_i32_0 = arith.constant 0 : i32
    return %arg0, %c0_i32 : i32, i32
  }
  func.func @transform_4(%arg0: i32) -> (i32, i32) {
    %c0_i32 = arith.constant 0 : i32
    %c0_i32_0 = arith.constant 0 : i32
    %c0_i32_1 = arith.constant 0 : i32
    return %c0_i32, %c0_i32_0 : i32, i32
  }
  func.func @transform_5(%arg0: i32) -> (i32, i32) {
    %c0_i32 = arith.constant 0 : i32
    %c0_i32_0 = arith.constant 0 : i32
    %c0_i32_1 = arith.constant 0 : i32
    return %c0_i32, %c0_i32_0 : i32, i32
  }
  func.func @transform_6(%arg0: i32) -> (i32, i32) {
    %c0_i32 = arith.constant 0 : i32
    %c0_i32_0 = arith.constant 0 : i32
    return %arg0, %c0_i32 : i32, i32
  }
  func.func @transform_7(%arg0: i32) -> (i32, i32) {
    %c0_i32 = arith.constant 0 : i32
    %c0_i32_0 = arith.constant 0 : i32
    return %arg0, %c0_i32 : i32, i32
  }
}

</mosaic_0001>

<bundles_post_ra>
// kernel: bottleneck_forward.5
= control target key start
LH: loop header
LB: loop body
LE: loop exit
PB: predicated region body
PF: predicated region fallthrough
CT: control target
= control target key end

     0   :  { %s1376_s1 = inlined_call_operand.vmem [shape: f32[128,128], index: 1, kind: input, shape index: {}]   ;;  %s1377_s0 = inlined_call_operand.vmem [shape: f32[512,128], index: 0, kind: input, shape index: {}]   ;;  %s1378_s2 = inlined_call_operand.vmem [shape: f32[512,128], index: 2, kind: output, shape index: {0}]   ;;  %s1379_s3 = inlined_call_operand.vmem [shape: f32[1,1,128], index: 3, kind: output, shape index: {1}]   ;;  %s1380_s4 = inlined_call_operand.vmem [shape: f32[1,1,128], index: 4, kind: output, shape index: {2}]  }
   0x1   :  { %v93_v0 = vld [vmem:[%s1376_s1 + $0x78] sm:$0xff]  ;;  %v92_v1 = vld [vmem:[%s1376_s1 + $0x70] sm:$0xff]  ;;  %v91_v2 = vld [vmem:[%s1376_s1 + $0x68] sm:$0xff] }
   0x2   :  { %94 = vmatpush.msra.mxu0 %v93_v0  ;;  %583 = vmatpush.msra.mxu1 %v93_v0  ;;  %v90_v3 = vld [vmem:[%s1376_s1 + $0x60] sm:$0xff]  ;;  %v89_v4 = vld [vmem:[%s1376_s1 + $0x58] sm:$0xff]  ;;  %v88_v5 = vld [vmem:[%s1376_s1 + $0x50] sm:$0xff] }
   0x3   :  { %584 = vmatpush.msra.mxu2 %v93_v0  ;;  %585 = vmatpush.msra.mxu3 %v93_v0  ;;  %v87_v6 = vld [vmem:[%s1376_s1 + $0x48] sm:$0xff]  ;;  %v86_v7 = vld [vmem:[%s1376_s1 + $0x40] sm:$0xff]  ;;  %v85_v8 = vld [vmem:[%s1376_s1 + $0x38] sm:$0xff] }
   0x4   :  { %95 = vmatpush.msra.mxu0 %v92_v1  ;;  %586 = vmatpush.msra.mxu1 %v92_v1  ;;  %v84_v9 = vld [vmem:[%s1376_s1 + $0x30] sm:$0xff]  ;;  %v83_v10 = vld [vmem:[%s1376_s1 + $0x28] sm:$0xff]  ;;  %v82_v11 = vld [vmem:[%s1376_s1 + $0x20] sm:$0xff] }
   0x5   :  { %587 = vmatpush.msra.mxu2 %v92_v1  ;;  %588 = vmatpush.msra.mxu3 %v92_v1  ;;  %v81_v12 = vld [vmem:[%s1376_s1 + $0x18] sm:$0xff]  ;;  %v80_v13 = vld [vmem:[%s1376_s1 + $0x10] sm:$0xff]  ;;  %v79_v14 = vld [vmem:[%s1376_s1 + $0x8] sm:$0xff] }
   0x6   :  { %96 = vmatpush.msra.mxu0 %v91_v2  ;;  %589 = vmatpush.msra.mxu1 %v91_v2  ;;  %v78_v15 = vld [vmem:[%s1376_s1] sm:$0xff]  ;;  %v15_v18 = vld [vmem:[%s1377_s0 + $0x8] sm:$0xff]  ;;  %v16_v20 = vld [vmem:[%s1377_s0 + $0x10] sm:$0xff] }
   0x7   :  { %590 = vmatpush.msra.mxu2 %v91_v2  ;;  %591 = vmatpush.msra.mxu3 %v91_v2  ;;  %v14_v16 = vld [vmem:[%s1377_s0] sm:$0xff]  ;;  %v31_v19 = vld [vmem:[%s1377_s0 + $0x88] sm:$0xff]  ;;  %v32_v21 = vld [vmem:[%s1377_s0 + $0x90] sm:$0xff] }
   0x8   :  { %97 = vmatpush.msra.mxu0 %v90_v3  ;;  %592 = vmatpush.msra.mxu1 %v90_v3  ;;  %v30_v17 = vld [vmem:[%s1377_s0 + $0x80] sm:$0xff]  ;;  %v17_v22 = vld [vmem:[%s1377_s0 + $0x18] sm:$0xff]  ;;  %v47_v27 = vld [vmem:[%s1377_s0 + $0x108] sm:$0xff] }
   0x9   :  { %593 = vmatpush.msra.mxu2 %v90_v3  ;;  %594 = vmatpush.msra.mxu3 %v90_v3  ;;  %v33_v23 = vld [vmem:[%s1377_s0 + $0x98] sm:$0xff]  ;;  %v46_v24 = vld [vmem:[%s1377_s0 + $0x100] sm:$0xff]  ;;  %v19_v28 = vld [vmem:[%s1377_s0 + $0x28] sm:$0xff] }
   0xa   :  { %98 = vmatpush.msra.mxu0 %v89_v4  ;;  %595 = vmatpush.msra.mxu1 %v89_v4  ;;  %v18_v25 = vld [vmem:[%s1377_s0 + $0x20] sm:$0xff]  ;;  %v35_v29 = vld [vmem:[%s1377_s0 + $0xa8] sm:$0xff]  ;;  %v48_v30 = vld [vmem:[%s1377_s0 + $0x110] sm:$0xff] }
   0xb   :  { %596 = vmatpush.msra.mxu2 %v89_v4  ;;  %597 = vmatpush.msra.mxu3 %v89_v4  ;;  %v34_v26 = vld [vmem:[%s1377_s0 + $0xa0] sm:$0xff]  ;;  %v20_v31 = vld [vmem:[%s1377_s0 + $0x30] sm:$0xff]  ;;  %v49_v33 = vld [vmem:[%s1377_s0 + $0x118] sm:$0xff] }
   0xc   :  { %99 = vmatpush.msra.mxu0 %v88_v5  ;;  %598 = vmatpush.msra.mxu1 %v88_v5  ;;  %v36_v32 = vld [vmem:[%s1377_s0 + $0xb0] sm:$0xff]  ;;  %v21_v34 = vld [vmem:[%s1377_s0 + $0x38] sm:$0xff]  ;;  %v50_v36 = vld [vmem:[%s1377_s0 + $0x120] sm:$0xff] }
   0xd   :  { %599 = vmatpush.msra.mxu2 %v88_v5  ;;  %600 = vmatpush.msra.mxu3 %v88_v5  ;;  %v37_v35 = vld [vmem:[%s1377_s0 + $0xb8] sm:$0xff]  ;;  %v62_v37 = vld [vmem:[%s1377_s0 + $0x180] sm:$0xff]  ;;  %v51_v40 = vld [vmem:[%s1377_s0 + $0x128] sm:$0xff] }
   0xe   :  { %100 = vmatpush.msra.mxu0 %v87_v6  ;;  %601 = vmatpush.msra.mxu1 %v87_v6  ;;  %v22_v38 = vld [vmem:[%s1377_s0 + $0x40] sm:$0xff]  ;;  %v63_v41 = vld [vmem:[%s1377_s0 + $0x188] sm:$0xff]  ;;  %v52_v44 = vld [vmem:[%s1377_s0 + $0x130] sm:$0xff] }
   0xf   :  { %602 = vmatpush.msra.mxu2 %v87_v6  ;;  %603 = vmatpush.msra.mxu3 %v87_v6  ;;  %v38_v39 = vld [vmem:[%s1377_s0 + $0xc0] sm:$0xff]  ;;  %v23_v42 = vld [vmem:[%s1377_s0 + $0x48] sm:$0xff]  ;;  %v64_v45 = vld [vmem:[%s1377_s0 + $0x190] sm:$0xff] }
  0x10   :  { %101 = vmatpush.msra.mxu0 %v86_v7  ;;  %604 = vmatpush.msra.mxu1 %v86_v7  ;;  %v39_v43 = vld [vmem:[%s1377_s0 + $0xc8] sm:$0xff]  ;;  %v24_v46 = vld [vmem:[%s1377_s0 + $0x50] sm:$0xff]  ;;  %v53_v48 = vld [vmem:[%s1377_s0 + $0x138] sm:$0xff] }
  0x11   :  { %605 = vmatpush.msra.mxu2 %v86_v7  ;;  %606 = vmatpush.msra.mxu3 %v86_v7  ;;  %v40_v47 = vld [vmem:[%s1377_s0 + $0xd0] sm:$0xff]  ;;  %v65_v49 = vld [vmem:[%s1377_s0 + $0x198] sm:$0xff]  ;;  %v54_v52 = vld [vmem:[%s1377_s0 + $0x140] sm:$0xff] }
  0x12   :  { %102 = vmatpush.msra.mxu0 %v85_v8  ;;  %607 = vmatpush.msra.mxu1 %v85_v8  ;;  %v25_v50 = vld [vmem:[%s1377_s0 + $0x58] sm:$0xff]  ;;  %v66_v53 = vld [vmem:[%s1377_s0 + $0x1a0] sm:$0xff]  ;;  %v55_v56 = vld [vmem:[%s1377_s0 + $0x148] sm:$0xff] }
  0x13   :  { %608 = vmatpush.msra.mxu2 %v85_v8  ;;  %609 = vmatpush.msra.mxu3 %v85_v8  ;;  %v41_v51 = vld [vmem:[%s1377_s0 + $0xd8] sm:$0xff]  ;;  %v26_v54 = vld [vmem:[%s1377_s0 + $0x60] sm:$0xff]  ;;  %v67_v57 = vld [vmem:[%s1377_s0 + $0x1a8] sm:$0xff] }
  0x14   :  { %103 = vmatpush.msra.mxu0 %v84_v9  ;;  %610 = vmatpush.msra.mxu1 %v84_v9  ;;  %v42_v55 = vld [vmem:[%s1377_s0 + $0xe0] sm:$0xff]  ;;  %v27_v58 = vld [vmem:[%s1377_s0 + $0x68] sm:$0xff]  ;;  %v56_v60 = vld [vmem:[%s1377_s0 + $0x150] sm:$0xff] }
  0x15   :  { %611 = vmatpush.msra.mxu2 %v84_v9  ;;  %612 = vmatpush.msra.mxu3 %v84_v9  ;;  %v43_v59 = vld [vmem:[%s1377_s0 + $0xe8] sm:$0xff]  ;;  %v68_v61 = vld [vmem:[%s1377_s0 + $0x1b0] sm:$0xff]  ;;  %v57_v0 = vld [vmem:[%s1377_s0 + $0x158] sm:$0xff] }
  0x16   :  { %104 = vmatpush.msra.mxu0 %v83_v10  ;;  %613 = vmatpush.msra.mxu1 %v83_v10  ;;  %v28_v62 = vld [vmem:[%s1377_s0 + $0x70] sm:$0xff]  ;;  %v69_v1 = vld [vmem:[%s1377_s0 + $0x1b8] sm:$0xff]  ;;  %v58_v4 = vld [vmem:[%s1377_s0 + $0x160] sm:$0xff] }
  0x17   :  { %614 = vmatpush.msra.mxu2 %v83_v10  ;;  %615 = vmatpush.msra.mxu3 %v83_v10  ;;  %v44_v63 = vld [vmem:[%s1377_s0 + $0xf0] sm:$0xff]  ;;  %v29_v2 = vld [vmem:[%s1377_s0 + $0x78] sm:$0xff]  ;;  %v70_v5 = vld [vmem:[%s1377_s0 + $0x1c0] sm:$0xff] }
  0x18   :  { %105 = vmatpush.msra.mxu0 %v82_v11  ;;  %616 = vmatpush.msra.mxu1 %v82_v11  ;;  %v45_v3 = vld [vmem:[%s1377_s0 + $0xf8] sm:$0xff]  ;;  %v59_v8 = vld [vmem:[%s1377_s0 + $0x168] sm:$0xff] }
  0x19   :  { %617 = vmatpush.msra.mxu2 %v82_v11  ;;  %618 = vmatpush.msra.mxu3 %v82_v11  ;;  %v71_v9 = vld [vmem:[%s1377_s0 + $0x1c8] sm:$0xff] }
  0x1a   :  { %106 = vmatpush.msra.mxu0 %v81_v12  ;;  %619 = vmatpush.msra.mxu1 %v81_v12 }
  0x1b   :  { %620 = vmatpush.msra.mxu2 %v81_v12  ;;  %621 = vmatpush.msra.mxu3 %v81_v12 }
  0x1c   :  { %107 = vmatpush.msra.mxu0 %v80_v13  ;;  %622 = vmatpush.msra.mxu1 %v80_v13 }
  0x1d   :  { %623 = vmatpush.msra.mxu2 %v80_v13  ;;  %624 = vmatpush.msra.mxu3 %v80_v13 }
  0x1e   :  { %108 = vmatpush.msra.mxu0 %v79_v14  ;;  %625 = vmatpush.msra.mxu1 %v79_v14 }
  0x1f   :  { %626 = vmatpush.msra.mxu2 %v79_v14  ;;  %627 = vmatpush.msra.mxu3 %v79_v14 }
  0x20   :  { %109 = vmatpush.msra.mxu0 %v78_v15  ;;  %628 = vmatpush.msra.mxu1 %v78_v15 }
  0x21   :  { %110 = vmatmul.f32.vlgmr.msra.gmra.mxu0 %v14_v16  ;;  %158 = vmatmul.f32.vlgmr.msra.gmra.mxu1 %v30_v17  ;;  %v60_v16 = vld [vmem:[%s1377_s0 + $0x170] sm:$0xff] }
  0x22   :  { %629 = vmatpush.msra.mxu2 %v78_v15  ;;  %630 = vmatpush.msra.mxu3 %v78_v15  ;;  %v72_v17 = vld [vmem:[%s1377_s0 + $0x1d0] sm:$0xff] }
  0x23   :  { %206 = vmatmul.f32.vlgmr.msra.gmra.mxu2 %v46_v24  ;;  %254 = vmatmul.f32.vlgmr.msra.gmra.mxu3 %v62_v37  ;;  %v73_v24 = vld [vmem:[%s1377_s0 + $0x1d8] sm:$0xff]  ;;  %v75_v37 = vld [vmem:[%s1377_s0 + $0x1e8] sm:$0xff] }
  0x29   :  { %113 = vmatmul.f32.gmra.mxu0 %v15_v18  ;;  %161 = vmatmul.f32.gmra.mxu1 %v31_v19 }
  0x2b   :  { %209 = vmatmul.f32.gmra.mxu2 %v47_v27  ;;  %257 = vmatmul.f32.gmra.mxu3 %v63_v41  ;;  %v76_v41 = vld [vmem:[%s1377_s0 + $0x1f0] sm:$0xff] }
  0x31   :  { %116 = vmatmul.f32.gmra.mxu0 %v16_v20  ;;  %164 = vmatmul.f32.gmra.mxu1 %v32_v21 }
  0x33   :  { %212 = vmatmul.f32.gmra.mxu2 %v48_v30  ;;  %260 = vmatmul.f32.gmra.mxu3 %v64_v45  ;;  %v74_v30 = vld [vmem:[%s1377_s0 + $0x1e0] sm:$0xff]  ;;  %v77_v45 = vld [vmem:[%s1377_s0 + $0x1f8] sm:$0xff] }
  0x39   :  { %119 = vmatmul.f32.gmra.mxu0 %v17_v22  ;;  %167 = vmatmul.f32.gmra.mxu1 %v33_v23  ;;  %v61_v23 = vld [vmem:[%s1377_s0 + $0x178] sm:$0xff] }
  0x3b   :  { %215 = vmatmul.f32.gmra.mxu2 %v49_v33  ;;  %263 = vmatmul.f32.gmra.mxu3 %v65_v49 }
  0x41   :  { %122 = vmatmul.f32.gmra.mxu0 %v18_v25  ;;  %170 = vmatmul.f32.gmra.mxu1 %v34_v26 }
  0x43   :  { %218 = vmatmul.f32.gmra.mxu2 %v50_v36  ;;  %266 = vmatmul.f32.gmra.mxu3 %v66_v53 }
  0x49   :  { %125 = vmatmul.f32.gmra.mxu0 %v19_v28  ;;  %173 = vmatmul.f32.gmra.mxu1 %v35_v29 }
  0x4b   :  { %221 = vmatmul.f32.gmra.mxu2 %v51_v40  ;;  %269 = vmatmul.f32.gmra.mxu3 %v67_v57 }
  0x51   :  { %128 = vmatmul.f32.gmra.mxu0 %v20_v31  ;;  %176 = vmatmul.f32.gmra.mxu1 %v36_v32 }
  0x53   :  { %224 = vmatmul.f32.gmra.mxu2 %v52_v44  ;;  %272 = vmatmul.f32.gmra.mxu3 %v68_v61 }
  0x59   :  { %131 = vmatmul.f32.gmra.mxu0 %v21_v34  ;;  %179 = vmatmul.f32.gmra.mxu1 %v37_v35 }
  0x5b   :  { %227 = vmatmul.f32.gmra.mxu2 %v53_v48  ;;  %275 = vmatmul.f32.gmra.mxu3 %v69_v1 }
  0x61   :  { %134 = vmatmul.f32.gmra.mxu0 %v22_v38  ;;  %182 = vmatmul.f32.gmra.mxu1 %v38_v39 }
  0x63   :  { %230 = vmatmul.f32.gmra.mxu2 %v54_v52  ;;  %278 = vmatmul.f32.gmra.mxu3 %v70_v5 }
  0x69   :  { %137 = vmatmul.f32.gmra.mxu0 %v23_v42  ;;  %185 = vmatmul.f32.gmra.mxu1 %v39_v43 }
  0x6b   :  { %233 = vmatmul.f32.gmra.mxu2 %v55_v56  ;;  %281 = vmatmul.f32.gmra.mxu3 %v71_v9 }
  0x71   :  { %140 = vmatmul.f32.gmra.mxu0 %v24_v46  ;;  %188 = vmatmul.f32.gmra.mxu1 %v40_v47 }
  0x73   :  { %236 = vmatmul.f32.gmra.mxu2 %v56_v60  ;;  %284 = vmatmul.f32.gmra.mxu3 %v72_v17 }
  0x79   :  { %143 = vmatmul.f32.gmra.mxu0 %v25_v50  ;;  %191 = vmatmul.f32.gmra.mxu1 %v41_v51 }
  0x7b   :  { %239 = vmatmul.f32.gmra.mxu2 %v57_v0  ;;  %287 = vmatmul.f32.gmra.mxu3 %v73_v24 }
  0x81   :  { %146 = vmatmul.f32.gmra.mxu0 %v26_v54  ;;  %194 = vmatmul.f32.gmra.mxu1 %v42_v55 }
  0x83   :  { %242 = vmatmul.f32.gmra.mxu2 %v58_v4  ;;  %290 = vmatmul.f32.gmra.mxu3 %v74_v30 }
  0x89   :  { %149 = vmatmul.f32.gmra.mxu0 %v27_v58  ;;  %197 = vmatmul.f32.gmra.mxu1 %v43_v59 }
  0x8b   :  { %245 = vmatmul.f32.gmra.mxu2 %v59_v8  ;;  %293 = vmatmul.f32.gmra.mxu3 %v75_v37 }
  0x91   :  { %152 = vmatmul.f32.gmra.mxu0 %v28_v62  ;;  %200 = vmatmul.f32.gmra.mxu1 %v44_v63 }
  0x93   :  { %248 = vmatmul.f32.gmra.mxu2 %v60_v16  ;;  %296 = vmatmul.f32.gmra.mxu3 %v76_v41 }
  0x99   :  { %155 = vmatmul.f32.gmra.mxu0 %v29_v2  ;;  %203 = vmatmul.f32.gmra.mxu1 %v45_v3 }
  0x9b   :  { %251 = vmatmul.f32.gmra.mxu2 %v61_v23  ;;  %299 = vmatmul.f32.gmra.mxu3 %v77_v45 }
  0x9e   :  { %v111_v6 = vpop.f32.mrf.mxu0  ;;  %v866_v7 = vpop.f32.mrf.mxu1 }
  0x9f   :  { %303 = vst [vmem:[%s1378_s2] sm:$0xff] %v111_v6  ;;  %v437_v12 = vmul.f32 %v111_v6, %v111_v6 }
  0xa0   :  { %319 = vst [vmem:[%s1378_s2 + $0x80] sm:$0xff] %v866_v7 }
  0xa6   :  { %v114_v10 = vpop.f32.mrf.mxu0  ;;  %v881_v11 = vpop.f32.mrf.mxu1 }
  0xa7   :  { %304 = vst [vmem:[%s1378_s2 + $0x8] sm:$0xff] %v114_v10  ;;  %v367_v13 = vadd.f32 %v114_v10, %v111_v6  ;;  %v438_v14 = vmul.f32 %v114_v10, %v114_v10  ;;  %v930_v35 = vpop.f32.mrf.mxu2  ;;  %v1006_v52 = vpop.f32.mrf.mxu3 }
  0xa8   :  { %320 = vst [vmem:[%s1378_s2 + $0x88] sm:$0xff] %v881_v11 }
  0xa9   :  { %v501_v15 = vadd.f32 %v438_v14, %v437_v12  ;;  %335 = vst [vmem:[%s1378_s2 + $0x100] sm:$0xff] %v930_v35 }
  0xaa   :  { %351 = vst [vmem:[%s1378_s2 + $0x180] sm:$0xff] %v1006_v52 }
  0xae   :  { %v117_v18 = vpop.f32.mrf.mxu0  ;;  %v896_v19 = vpop.f32.mrf.mxu1 }
  0xaf   :  { %305 = vst [vmem:[%s1378_s2 + $0x10] sm:$0xff] %v117_v18  ;;  %v368_v20 = vadd.f32 %v367_v13, %v117_v18  ;;  %v439_v21 = vmul.f32 %v117_v18, %v117_v18  ;;  %v953_v40 = vpop.f32.mrf.mxu2  ;;  %v1027_v56 = vpop.f32.mrf.mxu3 }
  0xb0   :  { %321 = vst [vmem:[%s1378_s2 + $0x90] sm:$0xff] %v896_v19 }
  0xb1   :  { %v502_v22 = vadd.f32 %v501_v15, %v439_v21  ;;  %336 = vst [vmem:[%s1378_s2 + $0x108] sm:$0xff] %v953_v40 }
  0xb2   :  { %352 = vst [vmem:[%s1378_s2 + $0x188] sm:$0xff] %v1027_v56 }
  0xb6   :  { %v120_v25 = vpop.f32.mrf.mxu0  ;;  %v911_v26 = vpop.f32.mrf.mxu1 }
  0xb7   :  { %306 = vst [vmem:[%s1378_s2 + $0x18] sm:$0xff] %v120_v25  ;;  %v369_v27 = vadd.f32 %v368_v20, %v120_v25  ;;  %v440_v28 = vmul.f32 %v120_v25, %v120_v25  ;;  %v971_v44 = vpop.f32.mrf.mxu2  ;;  %v1048_v60 = vpop.f32.mrf.mxu3 }
  0xb8   :  { %322 = vst [vmem:[%s1378_s2 + $0x98] sm:$0xff] %v911_v26 }
  0xb9   :  { %v503_v29 = vadd.f32 %v502_v22, %v440_v28  ;;  %337 = vst [vmem:[%s1378_s2 + $0x110] sm:$0xff] %v971_v44 }
  0xba   :  { %353 = vst [vmem:[%s1378_s2 + $0x190] sm:$0xff] %v1048_v60 }
  0xbe   :  { %v123_v31 = vpop.f32.mrf.mxu0  ;;  %v923_v32 = vpop.f32.mrf.mxu1 }
  0xbf   :  { %307 = vst [vmem:[%s1378_s2 + $0x20] sm:$0xff] %v123_v31  ;;  %v928_v33 = vadd.f32 %v369_v27, %v123_v31  ;;  %v441_v34 = vmul.f32 %v123_v31, %v123_v31  ;;  %v989_v48 = vpop.f32.mrf.mxu2  ;;  %v1069_v0 = vpop.f32.mrf.mxu3 }
  0xc0   :  { %323 = vst [vmem:[%s1378_s2 + $0xa0] sm:$0xff] %v923_v32 }
  0xc1   :  { %v936_v36 = vadd.f32 %v503_v29, %v441_v34  ;;  %338 = vst [vmem:[%s1378_s2 + $0x118] sm:$0xff] %v989_v48 }
  0xc2   :  { %354 = vst [vmem:[%s1378_s2 + $0x198] sm:$0xff] %v1069_v0 }
  0xc6   :  { %v945_v38 = vpop.f32.mrf.mxu0  ;;  %v947_v39 = vpop.f32.mrf.mxu1 }
  0xc7   :  { %308 = vst [vmem:[%s1378_s2 + $0x28] sm:$0xff] %v945_v38  ;;  %v1004_v51 = vpop.f32.mrf.mxu2  ;;  %v1090_v4 = vpop.f32.mrf.mxu3  ;;  %v442_v5 = vmul.f32 %v945_v38, %v945_v38  ;;  %v371_v6 = vadd.f32 %v928_v33, %v945_v38 }
  0xc8   :  { %324 = vst [vmem:[%s1378_s2 + $0xa8] sm:$0xff] %v947_v39 }
  0xc9   :  { %339 = vst [vmem:[%s1378_s2 + $0x120] sm:$0xff] %v1004_v51  ;;  %v505_v9 = vadd.f32 %v936_v36, %v442_v5 }
  0xca   :  { %355 = vst [vmem:[%s1378_s2 + $0x1a0] sm:$0xff] %v1090_v4 }
  0xce   :  { %v129_v42 = vpop.f32.mrf.mxu0  ;;  %v966_v43 = vpop.f32.mrf.mxu1 }
  0xcf   :  { %309 = vst [vmem:[%s1378_s2 + $0x30] sm:$0xff] %v129_v42  ;;  %v1025_v55 = vpop.f32.mrf.mxu2  ;;  %v443_v8 = vmul.f32 %v129_v42, %v129_v42  ;;  %v372_v10 = vadd.f32 %v371_v6, %v129_v42  ;;  %v1116_v20 = vpop.f32.mrf.mxu3 }
  0xd0   :  { %325 = vst [vmem:[%s1378_s2 + $0xb0] sm:$0xff] %v966_v43 }
  0xd1   :  { %340 = vst [vmem:[%s1378_s2 + $0x128] sm:$0xff] %v1025_v55  ;;  %v506_v15 = vadd.f32 %v505_v9, %v443_v8 }
  0xd2   :  { %356 = vst [vmem:[%s1378_s2 + $0x1a8] sm:$0xff] %v1116_v20 }
  0xd6   :  { %v132_v46 = vpop.f32.mrf.mxu0  ;;  %v984_v47 = vpop.f32.mrf.mxu1 }
  0xd7   :  { %310 = vst [vmem:[%s1378_s2 + $0x38] sm:$0xff] %v132_v46  ;;  %v1046_v59 = vpop.f32.mrf.mxu2  ;;  %v444_v12 = vmul.f32 %v132_v46, %v132_v46  ;;  %v373_v16 = vadd.f32 %v372_v10, %v132_v46  ;;  %v1137_v41 = vpop.f32.mrf.mxu3 }
  0xd8   :  { %326 = vst [vmem:[%s1378_s2 + $0xb8] sm:$0xff] %v984_v47 }
  0xd9   :  { %341 = vst [vmem:[%s1378_s2 + $0x130] sm:$0xff] %v1046_v59  ;;  %v507_v21 = vadd.f32 %v506_v15, %v444_v12 }
  0xda   :  { %357 = vst [vmem:[%s1378_s2 + $0x1b0] sm:$0xff] %v1137_v41 }
  0xde   :  { %v135_v49 = vpop.f32.mrf.mxu0  ;;  %v999_v50 = vpop.f32.mrf.mxu1 }
  0xdf   :  { %311 = vst [vmem:[%s1378_s2 + $0x40] sm:$0xff] %v135_v49  ;;  %v1067_v63 = vpop.f32.mrf.mxu2  ;;  %v445_v17 = vmul.f32 %v135_v49, %v135_v49  ;;  %v374_v22 = vadd.f32 %v373_v16, %v135_v49  ;;  %v1158_v15 = vpop.f32.mrf.mxu3 }
  0xe0   :  { %327 = vst [vmem:[%s1378_s2 + $0xc0] sm:$0xff] %v999_v50 }
  0xe1   :  { %342 = vst [vmem:[%s1378_s2 + $0x138] sm:$0xff] %v1067_v63  ;;  %v508_v24 = vadd.f32 %v507_v21, %v445_v17  ;;  %v454_v21 = vmul.f32 %v881_v11, %v881_v11 }
  0xe2   :  { %358 = vst [vmem:[%s1378_s2 + $0x1b8] sm:$0xff] %v1158_v15 }
  0xe6   :  { %v138_v53 = vpop.f32.mrf.mxu0  ;;  %v1020_v54 = vpop.f32.mrf.mxu1 }
  0xe7   :  { %312 = vst [vmem:[%s1378_s2 + $0x48] sm:$0xff] %v138_v53  ;;  %v1088_v3 = vpop.f32.mrf.mxu2  ;;  %v446_v23 = vmul.f32 %v138_v53, %v138_v53  ;;  %v375_v25 = vadd.f32 %v374_v22, %v138_v53 }
  0xe8   :  { %328 = vst [vmem:[%s1378_s2 + $0xc8] sm:$0xff] %v1020_v54 }
  0xe9   :  { %343 = vst [vmem:[%s1378_s2 + $0x140] sm:$0xff] %v1088_v3  ;;  %v509_v28 = vadd.f32 %v508_v24, %v446_v23 }
  0xee   :  { %v141_v57 = vpop.f32.mrf.mxu0  ;;  %v1041_v58 = vpop.f32.mrf.mxu1 }
  0xef   :  { %313 = vst [vmem:[%s1378_s2 + $0x50] sm:$0xff] %v141_v57  ;;  %v1114_v18 = vpop.f32.mrf.mxu2  ;;  %v447_v27 = vmul.f32 %v141_v57, %v141_v57  ;;  %v376_v29 = vadd.f32 %v375_v25, %v141_v57 }
  0xf0   :  { %329 = vst [vmem:[%s1378_s2 + $0xd0] sm:$0xff] %v1041_v58 }
  0xf1   :  { %344 = vst [vmem:[%s1378_s2 + $0x148] sm:$0xff] %v1114_v18  ;;  %v510_v34 = vadd.f32 %v509_v28, %v447_v27  ;;  %v456_v27 = vmul.f32 %v911_v26, %v911_v26 }
  0xf6   :  { %v144_v61 = vpop.f32.mrf.mxu0  ;;  %v1062_v62 = vpop.f32.mrf.mxu1 }
  0xf7   :  { %314 = vst [vmem:[%s1378_s2 + $0x58] sm:$0xff] %v144_v61  ;;  %v448_v30 = vmul.f32 %v144_v61, %v144_v61  ;;  %v377_v36 = vadd.f32 %v376_v29, %v144_v61  ;;  %v1135_v38 = vpop.f32.mrf.mxu2 }
  0xf8   :  { %330 = vst [vmem:[%s1378_s2 + $0xd8] sm:$0xff] %v1062_v62 }
  0xf9   :  { %v511_v42 = vadd.f32 %v510_v34, %v448_v30  ;;  %345 = vst [vmem:[%s1378_s2 + $0x150] sm:$0xff] %v1135_v38 }
  0xfe   :  { %v147_v1 = vpop.f32.mrf.mxu0  ;;  %v1083_v2 = vpop.f32.mrf.mxu1 }
  0xff   :  { %315 = vst [vmem:[%s1378_s2 + $0x60] sm:$0xff] %v147_v1  ;;  %v449_v37 = vmul.f32 %v147_v1, %v147_v1  ;;  %v378_v45 = vadd.f32 %v377_v36, %v147_v1  ;;  %v1156_v12 = vpop.f32.mrf.mxu2 }
 0x100   :  { %331 = vst [vmem:[%s1378_s2 + $0xe0] sm:$0xff] %v1083_v2 }
 0x101   :  { %v512_v49 = vadd.f32 %v511_v42, %v449_v37  ;;  %346 = vst [vmem:[%s1378_s2 + $0x158] sm:$0xff] %v1156_v12  ;;  %v459_v42 = vmul.f32 %v966_v43, %v966_v43 }
 0x106   :  { %v150_v13 = vpop.f32.mrf.mxu0  ;;  %v1109_v14 = vpop.f32.mrf.mxu1 }
 0x107   :  { %316 = vst [vmem:[%s1378_s2 + $0x68] sm:$0xff] %v150_v13  ;;  %v450_v46 = vmul.f32 %v150_v13, %v150_v13  ;;  %v379_v53 = vadd.f32 %v378_v45, %v150_v13  ;;  %v453_v13 = vmul.f32 %v866_v7, %v866_v7  ;;  %v1184_v30 = vpop.f32.mrf.mxu2 }
 0x108   :  { %332 = vst [vmem:[%s1378_s2 + $0xe8] sm:$0xff] %v1109_v14 }
 0x109   :  { %v513_v61 = vadd.f32 %v512_v49, %v450_v46  ;;  %347 = vst [vmem:[%s1378_s2 + $0x160] sm:$0xff] %v1184_v30 }
 0x10e   :  { %v153_v31 = vpop.f32.mrf.mxu0  ;;  %v1130_v33 = vpop.f32.mrf.mxu1 }
 0x10f   :  { %317 = vst [vmem:[%s1378_s2 + $0x70] sm:$0xff] %v153_v31  ;;  %v451_v57 = vmul.f32 %v153_v31, %v153_v31  ;;  %v380_v5 = vadd.f32 %v379_v53, %v153_v31  ;;  %v1186_v31 = vpop.f32.mrf.mxu3 }
 0x110   :  { %333 = vst [vmem:[%s1378_s2 + $0xf0] sm:$0xff] %v1130_v33 }
 0x111   :  { %v514_v1 = vadd.f32 %v513_v61, %v451_v57  ;;  %359 = vst [vmem:[%s1378_s2 + $0x1c0] sm:$0xff] %v1186_v31  ;;  %v1208_v57 = vpop.f32.mrf.mxu2 }
 0x112   :  { %348 = vst [vmem:[%s1378_s2 + $0x168] sm:$0xff] %v1208_v57 }
 0x116   :  { %v156_v6 = vpop.f32.mrf.mxu0  ;;  %v1151_v8 = vpop.f32.mrf.mxu1 }
 0x117   :  { %318 = vst [vmem:[%s1378_s2 + $0x78] sm:$0xff] %v156_v6  ;;  %v381_v9 = vadd.f32 %v380_v5, %v156_v6  ;;  %v452_v10 = vmul.f32 %v156_v6, %v156_v6  ;;  %v1210_v61 = vpop.f32.mrf.mxu3 }
 0x118   :  { %334 = vst [vmem:[%s1378_s2 + $0xf8] sm:$0xff] %v1151_v8 }
 0x119   :  { %v382_v16 = vadd.f32 %v381_v9, %v866_v7  ;;  %v515_v17 = vadd.f32 %v514_v1, %v452_v10  ;;  %v455_v7 = vmul.f32 %v896_v19, %v896_v19  ;;  %360 = vst [vmem:[%s1378_s2 + $0x1c8] sm:$0xff] %v1210_v61  ;;  %v463_v9 = vmul.f32 %v1041_v58, %v1041_v58 }
 0x11b   :  { %v383_v22 = vadd.f32 %v382_v16, %v881_v11  ;;  %v516_v23 = vadd.f32 %v515_v17, %v453_v13  ;;  %v457_v11 = vmul.f32 %v923_v32, %v923_v32  ;;  %v464_v16 = vmul.f32 %v1062_v62, %v1062_v62 }
 0x11d   :  { %v384_v24 = vadd.f32 %v383_v22, %v896_v19  ;;  %v517_v25 = vadd.f32 %v516_v23, %v454_v21  ;;  %v1232_v21 = vpop.f32.mrf.mxu2 }
 0x11e   :  { %349 = vst [vmem:[%s1378_s2 + $0x170] sm:$0xff] %v1232_v21 }
 0x11f   :  { %v385_v28 = vadd.f32 %v384_v24, %v911_v26  ;;  %v518_v29 = vadd.f32 %v517_v25, %v455_v7  ;;  %v458_v26 = vmul.f32 %v947_v39, %v947_v39  ;;  %v1234_v22 = vpop.f32.mrf.mxu3  ;;  %v466_v24 = vmul.f32 %v1109_v14, %v1109_v14 }
 0x120   :  { %361 = vst [vmem:[%s1378_s2 + $0x1d0] sm:$0xff] %v1234_v22 }
 0x121   :  { %v386_v19 = vadd.f32 %v385_v28, %v923_v32  ;;  %v519_v34 = vadd.f32 %v518_v29, %v456_v27  ;;  %v460_v32 = vmul.f32 %v984_v47, %v984_v47  ;;  %v467_v28 = vmul.f32 %v1130_v33, %v1130_v33 }
 0x123   :  { %v387_v36 = vadd.f32 %v386_v19, %v947_v39  ;;  %v520_v37 = vadd.f32 %v519_v34, %v457_v11  ;;  %v461_v39 = vmul.f32 %v999_v50, %v999_v50 }
 0x125   :  { %v521_v45 = vadd.f32 %v520_v37, %v458_v26  ;;  %v388_v46 = vadd.f32 %v387_v36, %v966_v43  ;;  %v252_v19 = vpop.f32.mrf.mxu2 }
 0x126   :  { %350 = vst [vmem:[%s1378_s2 + $0x178] sm:$0xff] %v252_v19 }
 0x127   :  { %v389_v49 = vadd.f32 %v388_v46, %v984_v47  ;;  %v522_v53 = vadd.f32 %v521_v45, %v459_v42  ;;  %v462_v47 = vmul.f32 %v1020_v54, %v1020_v54  ;;  %v1256_v34 = vpop.f32.mrf.mxu3  ;;  %v471_v42 = vmul.f32 %v971_v44, %v971_v44 }
 0x128   :  { %362 = vst [vmem:[%s1378_s2 + $0x1d8] sm:$0xff] %v1256_v34 }
 0x129   :  { %v390_v43 = vadd.f32 %v389_v49, %v999_v50  ;;  %v523_v5 = vadd.f32 %v522_v53, %v460_v32 }
 0x12b   :  { %v391_v6 = vadd.f32 %v390_v43, %v1020_v54  ;;  %v524_v1 = vadd.f32 %v523_v5, %v461_v39  ;;  %v474_v43 = vmul.f32 %v1025_v55, %v1025_v55 }
 0x12d   :  { %v392_v10 = vadd.f32 %v391_v6, %v1041_v58  ;;  %v525_v13 = vadd.f32 %v524_v1, %v462_v47  ;;  %v465_v58 = vmul.f32 %v1083_v2, %v1083_v2  ;;  %v475_v47 = vmul.f32 %v1046_v59, %v1046_v59 }
 0x12f   :  { %v393_v50 = vadd.f32 %v392_v10, %v1062_v62  ;;  %v526_v17 = vadd.f32 %v525_v13, %v463_v9  ;;  %v1277_v53 = vpop.f32.mrf.mxu3  ;;  %v476_v9 = vmul.f32 %v1067_v63, %v1067_v63 }
 0x130   :  { %363 = vst [vmem:[%s1378_s2 + $0x1e0] sm:$0xff] %v1277_v53 }
 0x131   :  { %v527_v54 = vadd.f32 %v526_v17, %v464_v16  ;;  %v394_v23 = vadd.f32 %v393_v50, %v1083_v2  ;;  %v468_v2 = vmul.f32 %v1151_v8, %v1151_v8 }
 0x133   :  { %v528_v62 = vadd.f32 %v527_v54, %v465_v58  ;;  %v395_v7 = vadd.f32 %v394_v23, %v1109_v14  ;;  %v469_v14 = vmul.f32 %v930_v35, %v930_v35  ;;  %v479_v54 = vmul.f32 %v1135_v38, %v1135_v38 }
 0x135   :  { %v529_v25 = vadd.f32 %v528_v62, %v466_v24  ;;  %v396_v27 = vadd.f32 %v395_v7, %v1130_v33  ;;  %v470_v33 = vmul.f32 %v953_v40, %v953_v40  ;;  %v480_v7 = vmul.f32 %v1156_v12, %v1156_v12 }
 0x137   :  { %v530_v29 = vadd.f32 %v529_v25, %v467_v28  ;;  %v397_v11 = vadd.f32 %v396_v27, %v1151_v8  ;;  %v481_v27 = vmul.f32 %v1184_v30, %v1184_v30 }
 0x139   :  { %v398_v26 = vadd.f32 %v397_v11, %v930_v35  ;;  %v531_v36 = vadd.f32 %v530_v29, %v468_v2  ;;  %v472_v35 = vmul.f32 %v989_v48, %v989_v48  ;;  %v482_v2 = vmul.f32 %v1208_v57, %v1208_v57 }
 0x13a   :  { %v483_v11 = vmul.f32 %v1232_v21, %v1232_v21 }
 0x13b   :  { %v399_v8 = vadd.f32 %v398_v26, %v953_v40  ;;  %v532_v37 = vadd.f32 %v531_v36, %v469_v14  ;;  %v473_v40 = vmul.f32 %v1004_v51, %v1004_v51  ;;  %v484_v14 = vmul.f32 %v252_v19, %v252_v19 }
 0x13d   :  { %v400_v45 = vadd.f32 %v399_v8, %v971_v44  ;;  %v533_v46 = vadd.f32 %v532_v37, %v470_v33  ;;  %v486_v37 = vmul.f32 %v1027_v56, %v1027_v56 }
 0x13f   :  { %v401_v32 = vadd.f32 %v400_v45, %v989_v48  ;;  %v534_v49 = vadd.f32 %v533_v46, %v471_v42 }
 0x141   :  { %v402_v39 = vadd.f32 %v401_v32, %v1004_v51  ;;  %v535_v44 = vadd.f32 %v534_v49, %v472_v35  ;;  %v1295_v51 = vpop.f32.mrf.mxu3  ;;  %v488_v35 = vmul.f32 %v1069_v0, %v1069_v0 }
 0x142   :  { %364 = vst [vmem:[%s1378_s2 + $0x1e8] sm:$0xff] %v1295_v51 }
 0x143   :  { %v403_v5 = vadd.f32 %v402_v39, %v1025_v55  ;;  %v536_v48 = vadd.f32 %v535_v44, %v473_v40  ;;  %v477_v55 = vmul.f32 %v1088_v3, %v1088_v3 }
 0x145   :  { %v537_v6 = vadd.f32 %v536_v48, %v474_v43  ;;  %v404_v1 = vadd.f32 %v403_v5, %v1046_v59  ;;  %v478_v59 = vmul.f32 %v1114_v18, %v1114_v18 }
 0x147   :  { %v405_v10 = vadd.f32 %v404_v1, %v1067_v63  ;;  %v538_v13 = vadd.f32 %v537_v6, %v475_v47 }
 0x149   :  { %v406_v50 = vadd.f32 %v405_v10, %v1088_v3  ;;  %v539_v16 = vadd.f32 %v538_v13, %v476_v9  ;;  %v297_v3 = vpop.f32.mrf.mxu3 }
 0x14a   :  { %365 = vst [vmem:[%s1378_s2 + $0x1f0] sm:$0xff] %v297_v3 }
 0x14b   :  { %v407_v17 = vadd.f32 %v406_v50, %v1114_v18  ;;  %v540_v63 = vadd.f32 %v539_v16, %v477_v55  ;;  %v496_v16 = vmul.f32 %v1256_v34, %v1256_v34 }
 0x14d   :  { %v408_v23 = vadd.f32 %v407_v17, %v1135_v38  ;;  %v541_v58 = vadd.f32 %v540_v63, %v478_v59  ;;  %v497_v63 = vmul.f32 %v1277_v53, %v1277_v53 }
 0x14f   :  { %v409_v62 = vadd.f32 %v408_v23, %v1156_v12  ;;  %v542_v24 = vadd.f32 %v541_v58, %v479_v54  ;;  %v498_v23 = vmul.f32 %v1295_v51, %v1295_v51 }
 0x151   :  { %v543_v25 = vadd.f32 %v542_v24, %v480_v7  ;;  %v410_v18 = vadd.f32 %v409_v62, %v1184_v30  ;;  %v300_v33 = vpop.f32.mrf.mxu3  ;;  %v485_v30 = vmul.f32 %v1006_v52, %v1006_v52  ;;  %v499_v62 = vmul.f32 %v297_v3, %v297_v3 }
 0x152   :  { %366 = vst [vmem:[%s1378_s2 + $0x1f8] sm:$0xff] %v300_v33  ;;  %v500_v7 = vmul.f32 %v300_v33, %v300_v33 }
 0x153   :  { %v544_v28 = vadd.f32 %v543_v25, %v481_v27  ;;  %v411_v38 = vadd.f32 %v410_v18, %v1208_v57 }
 0x155   :  { %v545_v29 = vadd.f32 %v544_v28, %v482_v2  ;;  %v412_v12 = vadd.f32 %v411_v38, %v1232_v21 }
 0x157   :  { %v546_v26 = vadd.f32 %v545_v29, %v483_v11  ;;  %v413_v36 = vadd.f32 %v412_v12, %v252_v19  ;;  %v487_v19 = vmul.f32 %v1048_v60, %v1048_v60 }
 0x159   :  { %v414_v8 = vadd.f32 %v413_v36, %v1006_v52  ;;  %v547_v57 = vadd.f32 %v546_v26, %v484_v14  ;;  %v489_v52 = vmul.f32 %v1090_v4, %v1090_v4 }
 0x15b   :  { %v415_v42 = vadd.f32 %v414_v8, %v1027_v56  ;;  %v548_v21 = vadd.f32 %v547_v57, %v485_v30  ;;  %v490_v56 = vmul.f32 %v1116_v20, %v1116_v20 }
 0x15d   :  { %v416_v45 = vadd.f32 %v415_v42, %v1048_v60  ;;  %v549_v46 = vadd.f32 %v548_v21, %v486_v37  ;;  %v491_v60 = vmul.f32 %v1137_v41, %v1137_v41 }
 0x15f   :  { %v417_v32 = vadd.f32 %v416_v45, %v1069_v0  ;;  %v550_v49 = vadd.f32 %v549_v46, %v487_v19  ;;  %v492_v0 = vmul.f32 %v1158_v15, %v1158_v15 }
 0x161   :  { %v418_v40 = vadd.f32 %v417_v32, %v1090_v4  ;;  %v551_v39 = vadd.f32 %v550_v49, %v488_v35  ;;  %v493_v4 = vmul.f32 %v1186_v31, %v1186_v31 }
 0x163   :  { %v419_v44 = vadd.f32 %v418_v40, %v1116_v20  ;;  %v552_v43 = vadd.f32 %v551_v39, %v489_v52  ;;  %v494_v20 = vmul.f32 %v1210_v61, %v1210_v61 }
 0x165   :  { %v553_v5 = vadd.f32 %v552_v43, %v490_v56  ;;  %v420_v48 = vadd.f32 %v419_v44, %v1137_v41  ;;  %v495_v41 = vmul.f32 %v1234_v22, %v1234_v22 }
 0x167   :  { %v421_v47 = vadd.f32 %v420_v48, %v1158_v15  ;;  %v554_v6 = vadd.f32 %v553_v5, %v491_v60 }
 0x169   :  { %v422_v1 = vadd.f32 %v421_v47, %v1186_v31  ;;  %v555_v9 = vadd.f32 %v554_v6, %v492_v0 }
 0x16b   :  { %v423_v10 = vadd.f32 %v422_v1, %v1210_v61  ;;  %v556_v13 = vadd.f32 %v555_v9, %v493_v4 }
 0x16d   :  { %v424_v55 = vadd.f32 %v423_v10, %v1234_v22  ;;  %v557_v50 = vadd.f32 %v556_v13, %v494_v20 }
 0x16f   :  { %v425_v15 = vadd.f32 %v424_v55, %v1256_v34  ;;  %v558_v59 = vadd.f32 %v557_v50, %v495_v41 }
 0x171   :  { %v559_v31 = vadd.f32 %v558_v59, %v496_v16  ;;  %v426_v17 = vadd.f32 %v425_v15, %v1277_v53 }
 0x173   :  { %v560_v61 = vadd.f32 %v559_v31, %v497_v63  ;;  %v427_v54 = vadd.f32 %v426_v17, %v1295_v51 }
 0x175   :  { %v561_v22 = vadd.f32 %v560_v61, %v498_v23  ;;  %v428_v58 = vadd.f32 %v427_v54, %v297_v3 }
 0x177   :  { %v562_v24 = vadd.f32 %v561_v22, %v499_v62  ;;  %v429_v25 = vadd.f32 %v428_v58, %v300_v33 }
 0x179   :  { %v430_v34 = vrot.slane %v429_v25, 4  ;;  %v563_v18 = vadd.f32 %v562_v24, %v500_v7 }
 0x17b   :  { %v431_v27 = vadd.f32 %v430_v34, %v429_v25  ;;  %v564_v28 = vrot.slane %v563_v18, 4 }
 0x17d   :  { %v432_v38 = vrot.slane %v431_v27, 2  ;;  %v565_v2 = vadd.f32 %v564_v28, %v563_v18 }
 0x17f   :  { %v433_v29 = vadd.f32 %v432_v38, %v431_v27  ;;  %v566_v53 = vrot.slane %v565_v2, 2 }
 0x181   :  { %v434_v12 = vrot.slane %v433_v29, 1  ;;  %v567_v11 = vadd.f32 %v566_v53, %v565_v2 }
 0x183   :  { %v435_v14 = vadd.f32 %v434_v12, %v433_v29  ;;  %v568_v26 = vrot.slane %v567_v11, 1 }
 0x185   :  { %436 = vst [vmem:[%s1379_s3] sm:$0x1] %v435_v14  ;;  %v569_v51 = vadd.f32 %v568_v26, %v567_v11 }
 0x187   :  { %570 = vst [vmem:[%s1380_s4] sm:$0x1] %v569_v51 }

// kernel: bottleneck_forward.7
= control target key start
LH: loop header
LB: loop body
LE: loop exit
PB: predicated region body
PF: predicated region fallthrough
CT: control target
= control target key end

     0   :  { %s538_s3 = inlined_call_operand.vmem [shape: f32[128,128], index: 3, kind: input, shape index: {}]   ;;  %s539_s1 = inlined_call_operand.vmem [shape: f32[1,128], index: 1, kind: input, shape index: {}]   ;;  %s540_s2 = inlined_call_operand.vmem [shape: f32[1,128], index: 2, kind: input, shape index: {}]   ;;  %s541_s0 = inlined_call_operand.vmem [shape: f32[128,128], index: 0, kind: input, shape index: {}]   ;;  %s542_s4 = inlined_call_operand.vmem [shape: f32[128,128], index: 4, kind: output, shape index: {0}]   ;;  %s543_s5 = inlined_call_operand.vmem [shape: f32[1,1,128], index: 5, kind: output, shape index: {1}]   ;;  %s544_s6 = inlined_call_operand.vmem [shape: f32[1,1,128], index: 6, kind: output, shape index: {2}]  }
   0x1   :  { %v107_v0 = vld [vmem:[%s538_s3 + $0x78] sm:$0xff]  ;;  %v106_v1 = vld [vmem:[%s538_s3 + $0x70] sm:$0xff]  ;;  %v105_v2 = vld [vmem:[%s538_s3 + $0x68] sm:$0xff] }
   0x2   :  { %108 = vmatpush.msra.mxu0 %v107_v0  ;;  %261 = vmatpush.msra.mxu1 %v107_v0  ;;  %v104_v3 = vld [vmem:[%s538_s3 + $0x60] sm:$0xff]  ;;  %v103_v4 = vld [vmem:[%s538_s3 + $0x58] sm:$0xff]  ;;  %v102_v5 = vld [vmem:[%s538_s3 + $0x50] sm:$0xff] }
   0x3   :  { %262 = vmatpush.msra.mxu2 %v107_v0  ;;  %263 = vmatpush.msra.mxu3 %v107_v0  ;;  %v101_v6 = vld [vmem:[%s538_s3 + $0x48] sm:$0xff]  ;;  %v100_v7 = vld [vmem:[%s538_s3 + $0x40] sm:$0xff]  ;;  %v99_v8 = vld [vmem:[%s538_s3 + $0x38] sm:$0xff] }
   0x4   :  { %109 = vmatpush.msra.mxu0 %v106_v1  ;;  %264 = vmatpush.msra.mxu1 %v106_v1  ;;  %v98_v9 = vld [vmem:[%s538_s3 + $0x30] sm:$0xff]  ;;  %v379_v10 = vld [vmem:[%s539_s1] ss:$0 sm:$0xff]  ;;  %v97_v13 = vld [vmem:[%s538_s3 + $0x28] sm:$0xff] }
   0x5   :  { %265 = vmatpush.msra.mxu2 %v106_v1  ;;  %266 = vmatpush.msra.mxu3 %v106_v1  ;;  %v20_v11 = vld [vmem:[%s541_s0] sm:$0xff]  ;;  %v95_v20 = vld [vmem:[%s538_s3 + $0x18] sm:$0xff]  ;;  %v94_v23 = vld [vmem:[%s538_s3 + $0x10] sm:$0xff] }
   0x6   :  { %110 = vmatpush.msra.mxu0 %v105_v2  ;;  %267 = vmatpush.msra.mxu1 %v105_v2  ;;  %v24_v12 = vld [vmem:[%s541_s0 + $0x20] sm:$0xff]  ;;  %v40_v17 = vmul.f32 %v379_v10, %v20_v11  ;;  %v21_v26 = vld [vmem:[%s541_s0 + $0x8] sm:$0xff]  ;;  %v22_v44 = vld [vmem:[%s541_s0 + $0x10] sm:$0xff] }
   0x7   :  { %268 = vmatpush.msra.mxu2 %v105_v2  ;;  %269 = vmatpush.msra.mxu3 %v105_v2  ;;  %v28_v14 = vld [vmem:[%s541_s0 + $0x40] sm:$0xff]  ;;  %v44_v19 = vmul.f32 %v379_v10, %v24_v12  ;;  %v25_v27 = vld [vmem:[%s541_s0 + $0x28] sm:$0xff]  ;;  %v41_v35 = vmul.f32 %v379_v10, %v21_v26  ;;  %v26_v45 = vld [vmem:[%s541_s0 + $0x30] sm:$0xff]  ;;  %v42_v51 = vmul.f32 %v379_v10, %v22_v44 }
   0x8   :  { %111 = vmatpush.msra.mxu0 %v104_v3  ;;  %270 = vmatpush.msra.mxu1 %v104_v3  ;;  %v32_v15 = vld [vmem:[%s541_s0 + $0x60] sm:$0xff]  ;;  %v48_v21 = vmul.f32 %v379_v10, %v28_v14  ;;  %v93_v28 = vld [vmem:[%s538_s3 + $0x8] sm:$0xff]  ;;  %v45_v37 = vmul.f32 %v379_v10, %v25_v27  ;;  %v30_v48 = vld [vmem:[%s541_s0 + $0x50] sm:$0xff]  ;;  %v46_v53 = vmul.f32 %v379_v10, %v26_v45 }
   0x9   :  { %271 = vmatpush.msra.mxu2 %v104_v3  ;;  %272 = vmatpush.msra.mxu3 %v104_v3  ;;  %v96_v16 = vld [vmem:[%s538_s3 + $0x20] sm:$0xff]  ;;  %v52_v22 = vmul.f32 %v379_v10, %v32_v15  ;;  %v29_v31 = vld [vmem:[%s541_s0 + $0x48] sm:$0xff]  ;;  %v34_v49 = vld [vmem:[%s541_s0 + $0x70] sm:$0xff]  ;;  %v50_v55 = vmul.f32 %v379_v10, %v30_v48 }
   0xa   :  { %112 = vmatpush.msra.mxu0 %v103_v4  ;;  %273 = vmatpush.msra.mxu1 %v103_v4  ;;  %v403_v18 = vld [vmem:[%s540_s2] ss:$0 sm:$0xff]  ;;  %v33_v32 = vld [vmem:[%s541_s0 + $0x68] sm:$0xff]  ;;  %v49_v39 = vmul.f32 %v379_v10, %v29_v31  ;;  %v54_v57 = vmul.f32 %v379_v10, %v34_v49  ;;  %v23_v60 = vld [vmem:[%s541_s0 + $0x18] sm:$0xff] }
   0xb   :  { %274 = vmatpush.msra.mxu2 %v103_v4  ;;  %275 = vmatpush.msra.mxu3 %v103_v4  ;;  %v60_v24 = vadd.f32 %v403_v18, %v40_v17  ;;  %v64_v25 = vadd.f32 %v403_v18, %v44_v19  ;;  %v68_v29 = vadd.f32 %v403_v18, %v48_v21  ;;  %v92_v33 = vld [vmem:[%s538_s3] sm:$0xff]  ;;  %v27_v61 = vld [vmem:[%s541_s0 + $0x38] sm:$0xff] }
   0xc   :  { %113 = vmatpush.msra.mxu0 %v102_v5  ;;  %276 = vmatpush.msra.mxu1 %v102_v5  ;;  %v72_v30 = vadd.f32 %v403_v18, %v52_v22  ;;  %v53_v41 = vmul.f32 %v379_v10, %v33_v32  ;;  %v61_v42 = vadd.f32 %v403_v18, %v41_v35  ;;  %v31_v0 = vld [vmem:[%s541_s0 + $0x58] sm:$0xff] }
   0xd   :  { %277 = vmatpush.msra.mxu2 %v102_v5  ;;  %278 = vmatpush.msra.mxu3 %v102_v5  ;;  %v76_v34 = vmax.f32 %v60_v24, 0.0  ;;  %v80_v36 = vmax.f32 %v64_v25, 0.0  ;;  %v84_v38 = vmax.f32 %v68_v29, 0.0  ;;  %v65_v43 = vadd.f32 %v403_v18, %v45_v37  ;;  %v35_v1 = vld [vmem:[%s541_s0 + $0x78] sm:$0xff] }
   0xe   :  { %114 = vmatpush.msra.mxu0 %v101_v6  ;;  %279 = vmatpush.msra.mxu1 %v101_v6  ;;  %v88_v40 = vmax.f32 %v72_v30, 0.0  ;;  %v69_v46 = vadd.f32 %v403_v18, %v49_v39  ;;  %v73_v47 = vadd.f32 %v403_v18, %v53_v41  ;;  %v77_v50 = vmax.f32 %v61_v42, 0.0 }
   0xf   :  { %280 = vmatpush.msra.mxu2 %v101_v6  ;;  %281 = vmatpush.msra.mxu3 %v101_v6  ;;  %v81_v52 = vmax.f32 %v65_v43, 0.0  ;;  %v62_v58 = vadd.f32 %v403_v18, %v42_v51  ;;  %v66_v59 = vadd.f32 %v403_v18, %v46_v53  ;;  %v70_v62 = vadd.f32 %v403_v18, %v50_v55 }
  0x10   :  { %115 = vmatpush.msra.mxu0 %v100_v7  ;;  %282 = vmatpush.msra.mxu1 %v100_v7  ;;  %v85_v54 = vmax.f32 %v69_v46, 0.0  ;;  %v89_v56 = vmax.f32 %v73_v47, 0.0  ;;  %v74_v63 = vadd.f32 %v403_v18, %v54_v57  ;;  %v43_v3 = vmul.f32 %v379_v10, %v23_v60 }
  0x11   :  { %283 = vmatpush.msra.mxu2 %v100_v7  ;;  %284 = vmatpush.msra.mxu3 %v100_v7  ;;  %v78_v2 = vmax.f32 %v62_v58, 0.0  ;;  %v82_v4 = vmax.f32 %v66_v59, 0.0  ;;  %v47_v5 = vmul.f32 %v379_v10, %v27_v61  ;;  %v86_v6 = vmax.f32 %v70_v62, 0.0 }
  0x12   :  { %116 = vmatpush.msra.mxu0 %v99_v8  ;;  %285 = vmatpush.msra.mxu1 %v99_v8  ;;  %v51_v7 = vmul.f32 %v379_v10, %v31_v0  ;;  %v63_v11 = vadd.f32 %v403_v18, %v43_v3 }
  0x13   :  { %286 = vmatpush.msra.mxu2 %v99_v8  ;;  %287 = vmatpush.msra.mxu3 %v99_v8  ;;  %v90_v8 = vmax.f32 %v74_v63, 0.0  ;;  %v67_v12 = vadd.f32 %v403_v18, %v47_v5 }
  0x14   :  { %117 = vmatpush.msra.mxu0 %v98_v9  ;;  %288 = vmatpush.msra.mxu1 %v98_v9  ;;  %v79_v15 = vmax.f32 %v63_v11, 0.0 }
  0x15   :  { %289 = vmatpush.msra.mxu2 %v98_v9  ;;  %290 = vmatpush.msra.mxu3 %v98_v9  ;;  %v55_v9 = vmul.f32 %v379_v10, %v35_v1 }
  0x16   :  { %118 = vmatpush.msra.mxu0 %v97_v13  ;;  %291 = vmatpush.msra.mxu1 %v97_v13 }
  0x17   :  { %292 = vmatpush.msra.mxu2 %v97_v13  ;;  %293 = vmatpush.msra.mxu3 %v97_v13  ;;  %v71_v13 = vadd.f32 %v403_v18, %v51_v7  ;;  %v75_v14 = vadd.f32 %v403_v18, %v55_v9 }
  0x18   :  { %119 = vmatpush.msra.mxu0 %v96_v16  ;;  %294 = vmatpush.msra.mxu1 %v96_v16 }
  0x19   :  { %295 = vmatpush.msra.mxu2 %v96_v16  ;;  %296 = vmatpush.msra.mxu3 %v96_v16  ;;  %v83_v16 = vmax.f32 %v67_v12, 0.0  ;;  %v87_v17 = vmax.f32 %v71_v13, 0.0  ;;  %v91_v19 = vmax.f32 %v75_v14, 0.0 }
  0x1a   :  { %120 = vmatpush.msra.mxu0 %v95_v20  ;;  %297 = vmatpush.msra.mxu1 %v95_v20 }
  0x1b   :  { %298 = vmatpush.msra.mxu2 %v95_v20  ;;  %299 = vmatpush.msra.mxu3 %v95_v20 }
  0x1c   :  { %121 = vmatpush.msra.mxu0 %v94_v23  ;;  %300 = vmatpush.msra.mxu1 %v94_v23 }
  0x1d   :  { %301 = vmatpush.msra.mxu2 %v94_v23  ;;  %302 = vmatpush.msra.mxu3 %v94_v23 }
  0x1e   :  { %122 = vmatpush.msra.mxu0 %v93_v28  ;;  %303 = vmatpush.msra.mxu1 %v93_v28 }
  0x1f   :  { %304 = vmatpush.msra.mxu2 %v93_v28  ;;  %305 = vmatpush.msra.mxu3 %v93_v28 }
  0x20   :  { %123 = vmatpush.msra.mxu0 %v92_v33  ;;  %306 = vmatpush.msra.mxu1 %v92_v33 }
  0x21   :  { %124 = vmatmul.f32.vlgmr.msra.gmra.mxu0 %v76_v34  ;;  %136 = vmatmul.f32.vlgmr.msra.gmra.mxu1 %v80_v36 }
  0x22   :  { %307 = vmatpush.msra.mxu2 %v92_v33  ;;  %308 = vmatpush.msra.mxu3 %v92_v33 }
  0x23   :  { %148 = vmatmul.f32.vlgmr.msra.gmra.mxu2 %v84_v38  ;;  %160 = vmatmul.f32.vlgmr.msra.gmra.mxu3 %v88_v40 }
  0x29   :  { %127 = vmatmul.f32.gmra.mxu0 %v77_v50  ;;  %139 = vmatmul.f32.gmra.mxu1 %v81_v52 }
  0x2b   :  { %151 = vmatmul.f32.gmra.mxu2 %v85_v54  ;;  %163 = vmatmul.f32.gmra.mxu3 %v89_v56 }
  0x31   :  { %130 = vmatmul.f32.gmra.mxu0 %v78_v2  ;;  %142 = vmatmul.f32.gmra.mxu1 %v82_v4 }
  0x33   :  { %154 = vmatmul.f32.gmra.mxu2 %v86_v6  ;;  %166 = vmatmul.f32.gmra.mxu3 %v90_v8 }
  0x39   :  { %133 = vmatmul.f32.gmra.mxu0 %v79_v15  ;;  %145 = vmatmul.f32.gmra.mxu1 %v83_v16 }
  0x3b   :  { %157 = vmatmul.f32.gmra.mxu2 %v87_v17  ;;  %169 = vmatmul.f32.gmra.mxu3 %v91_v19 }
  0x9e   :  { %v125_v10 = vpop.f32.mrf.mxu0  ;;  %v137_v20 = vpop.f32.mrf.mxu1 }
  0x9f   :  { %173 = vst [vmem:[%s542_s4] sm:$0xff] %v125_v10  ;;  %v211_v29 = vmul.f32 %v125_v10, %v125_v10  ;;  %v215_v41 = vmul.f32 %v137_v20, %v137_v20 }
  0xa0   :  { %177 = vst [vmem:[%s542_s4 + $0x20] sm:$0xff] %v137_v20 }
  0xa6   :  { %v128_v21 = vpop.f32.mrf.mxu0  ;;  %v140_v18 = vpop.f32.mrf.mxu1 }
  0xa7   :  { %174 = vst [vmem:[%s542_s4 + $0x8] sm:$0xff] %v128_v21  ;;  %v149_v22 = vpop.f32.mrf.mxu2  ;;  %v161_v23 = vpop.f32.mrf.mxu3  ;;  %v212_v28 = vmul.f32 %v128_v21, %v128_v21  ;;  %v189_v30 = vadd.f32 %v128_v21, %v125_v10  ;;  %v216_v44 = vmul.f32 %v140_v18, %v140_v18 }
  0xa8   :  { %178 = vst [vmem:[%s542_s4 + $0x28] sm:$0xff] %v140_v18  ;;  %v219_v55 = vmul.f32 %v149_v22, %v149_v22  ;;  %v223_v3 = vmul.f32 %v161_v23, %v161_v23 }
  0xa9   :  { %181 = vst [vmem:[%s542_s4 + $0x40] sm:$0xff] %v149_v22  ;;  %v227_v32 = vadd.f32 %v212_v28, %v211_v29 }
  0xaa   :  { %185 = vst [vmem:[%s542_s4 + $0x60] sm:$0xff] %v161_v23 }
  0xae   :  { %v131_v24 = vpop.f32.mrf.mxu0  ;;  %v143_v25 = vpop.f32.mrf.mxu1 }
  0xaf   :  { %175 = vst [vmem:[%s542_s4 + $0x10] sm:$0xff] %v131_v24  ;;  %v152_v26 = vpop.f32.mrf.mxu2  ;;  %v164_v27 = vpop.f32.mrf.mxu3  ;;  %v213_v31 = vmul.f32 %v131_v24, %v131_v24  ;;  %v190_v33 = vadd.f32 %v189_v30, %v131_v24  ;;  %v217_v48 = vmul.f32 %v143_v25, %v143_v25 }
  0xb0   :  { %179 = vst [vmem:[%s542_s4 + $0x30] sm:$0xff] %v143_v25  ;;  %v220_v58 = vmul.f32 %v152_v26, %v152_v26  ;;  %v224_v6 = vmul.f32 %v164_v27, %v164_v27 }
  0xb1   :  { %182 = vst [vmem:[%s542_s4 + $0x48] sm:$0xff] %v152_v26  ;;  %v228_v36 = vadd.f32 %v227_v32, %v213_v31 }
  0xb2   :  { %186 = vst [vmem:[%s542_s4 + $0x68] sm:$0xff] %v164_v27 }
  0xb6   :  { %v134_v34 = vpop.f32.mrf.mxu0  ;;  %v146_v35 = vpop.f32.mrf.mxu1 }
  0xb7   :  { %176 = vst [vmem:[%s542_s4 + $0x18] sm:$0xff] %v134_v34  ;;  %v191_v37 = vadd.f32 %v190_v33, %v134_v34  ;;  %v214_v38 = vmul.f32 %v134_v34, %v134_v34  ;;  %v155_v39 = vpop.f32.mrf.mxu2  ;;  %v167_v40 = vpop.f32.mrf.mxu3  ;;  %v218_v50 = vmul.f32 %v146_v35, %v146_v35 }
  0xb8   :  { %180 = vst [vmem:[%s542_s4 + $0x38] sm:$0xff] %v146_v35  ;;  %v221_v62 = vmul.f32 %v155_v39, %v155_v39  ;;  %v225_v11 = vmul.f32 %v167_v40, %v167_v40 }
  0xb9   :  { %v192_v42 = vadd.f32 %v191_v37, %v137_v20  ;;  %v229_v43 = vadd.f32 %v228_v36, %v214_v38  ;;  %183 = vst [vmem:[%s542_s4 + $0x50] sm:$0xff] %v155_v39 }
  0xba   :  { %187 = vst [vmem:[%s542_s4 + $0x70] sm:$0xff] %v167_v40 }
  0xbb   :  { %v230_v45 = vadd.f32 %v229_v43, %v215_v41  ;;  %v193_v46 = vadd.f32 %v192_v42, %v140_v18 }
  0xbd   :  { %v194_v47 = vadd.f32 %v193_v46, %v143_v25  ;;  %v231_v49 = vadd.f32 %v230_v45, %v216_v44 }
  0xbf   :  { %v232_v51 = vadd.f32 %v231_v49, %v217_v48  ;;  %v195_v52 = vadd.f32 %v194_v47, %v146_v35  ;;  %v158_v53 = vpop.f32.mrf.mxu2  ;;  %v170_v54 = vpop.f32.mrf.mxu3 }
  0xc0   :  { %184 = vst [vmem:[%s542_s4 + $0x58] sm:$0xff] %v158_v53  ;;  %v222_v0 = vmul.f32 %v158_v53, %v158_v53  ;;  %v226_v13 = vmul.f32 %v170_v54, %v170_v54 }
  0xc1   :  { %v196_v56 = vadd.f32 %v195_v52, %v149_v22  ;;  %v233_v57 = vadd.f32 %v232_v51, %v218_v50  ;;  %188 = vst [vmem:[%s542_s4 + $0x78] sm:$0xff] %v170_v54 }
  0xc3   :  { %v234_v59 = vadd.f32 %v233_v57, %v219_v55  ;;  %v197_v60 = vadd.f32 %v196_v56, %v152_v26 }
  0xc5   :  { %v198_v61 = vadd.f32 %v197_v60, %v155_v39  ;;  %v235_v63 = vadd.f32 %v234_v59, %v220_v58 }
  0xc7   :  { %v236_v1 = vadd.f32 %v235_v63, %v221_v62  ;;  %v199_v2 = vadd.f32 %v198_v61, %v158_v53 }
  0xc9   :  { %v200_v4 = vadd.f32 %v199_v2, %v161_v23  ;;  %v237_v5 = vadd.f32 %v236_v1, %v222_v0 }
  0xcb   :  { %v238_v7 = vadd.f32 %v237_v5, %v223_v3  ;;  %v201_v8 = vadd.f32 %v200_v4, %v164_v27 }
  0xcd   :  { %v202_v9 = vadd.f32 %v201_v8, %v167_v40  ;;  %v239_v12 = vadd.f32 %v238_v7, %v224_v6 }
  0xcf   :  { %v240_v14 = vadd.f32 %v239_v12, %v225_v11  ;;  %v203_v15 = vadd.f32 %v202_v9, %v170_v54 }
  0xd1   :  { %v204_v16 = vrot.slane %v203_v15, 4  ;;  %v241_v17 = vadd.f32 %v240_v14, %v226_v13 }
  0xd3   :  { %v205_v19 = vadd.f32 %v204_v16, %v203_v15  ;;  %v242_v10 = vrot.slane %v241_v17, 4 }
  0xd5   :  { %v206_v20 = vrot.slane %v205_v19, 2  ;;  %v243_v21 = vadd.f32 %v242_v10, %v241_v17 }
  0xd7   :  { %v207_v18 = vadd.f32 %v206_v20, %v205_v19  ;;  %v244_v22 = vrot.slane %v243_v21, 2 }
  0xd9   :  { %v208_v24 = vrot.slane %v207_v18, 1  ;;  %v245_v23 = vadd.f32 %v244_v22, %v243_v21 }
  0xdb   :  { %v209_v25 = vadd.f32 %v208_v24, %v207_v18  ;;  %v246_v26 = vrot.slane %v245_v23, 1 }
  0xdd   :  { %210 = vst [vmem:[%s543_s5] sm:$0x1] %v209_v25  ;;  %v247_v27 = vadd.f32 %v246_v26, %v245_v23 }
  0xdf   :  { %248 = vst [vmem:[%s544_s6] sm:$0x1] %v247_v27 }

// kernel: bottleneck_forward.6
= control target key start
LH: loop header
LB: loop body
LE: loop exit
PB: predicated region body
PF: predicated region fallthrough
CT: control target
= control target key end

     0   :  { %s1465_s21 = smov 0   ;;  %s2353_s0 = inlined_call_operand.vmem [shape: f32[2,2,2,8,8,128], index: 0, kind: input, shape index: {}]   ;;  %s2354_s1 = inlined_call_operand.vmem [shape: f32[1,128], index: 1, kind: input, shape index: {}]   ;;  %s2355_s2 = inlined_call_operand.vmem [shape: f32[1,128], index: 2, kind: input, shape index: {}]   ;;  %s2356_s3 = inlined_call_operand.vmem [shape: f32[1152,128], index: 3, kind: input, shape index: {}]   ;;  %s2357_s4 = inlined_call_operand.vmem [shape: f32[128,128], index: 4, kind: output, shape index: {0}]   ;;  %s2358_s5 = inlined_call_operand.vmem [shape: f32[2,1,128], index: 5, kind: output, shape index: {1}]   ;;  %s2359_s6 = inlined_call_operand.vmem [shape: f32[2,1,128], index: 6, kind: output, shape index: {2}]  }
   0x1 LB: > { %s1471_s22 = sadd.s32 4294967295, %s1427_s21   ;;  %p1338_p0 = scmp.ge.s32.totalorder %s1427_s21, 1  ;;  %s1427_s21 = sphi %s1465_s21, %s17_s21  }
   0x2   : > { %p217_p1 = scmp.lt.s32.totalorder %s1427_s21, 3 }
   0x4   : > { %p218_p2 = pnand %p1338_p0, %p217_p1 }
   0x5   : > { %p253_p3 = scmp.lt.s32.totalorder (!%p218_p2), %s1471_s22, 1 }
   0x6   : > { %221 = sbr.rel (%p218_p2) target bundleno = 355 (0x163), region = 36 }
   0xb   : > { %v590_v0 = vld [vmem:[%s2356_s3 + $0xf8] sm:$0xff]  ;;  %v589_v1 = vld [vmem:[%s2356_s3 + $0xf0] sm:$0xff]  ;;  %v1429_v2 = vmov 0.0   ;;  %v588_v3 = vld [vmem:[%s2356_s3 + $0xe8] sm:$0xff]  ;;  %s1487_s29 = scalar_select %p253_p3, %s1471_s22, 1 }
   0xc   : > { %1370 = vmatpush.msra.mxu1 %v590_v0  ;;  %591 = vmatpush.msra.mxu0 %v590_v0  ;;  %314 = vst [vmem:[#allocation2 + $0x160] sm:$0xff] %v1429_v2  ;;  %v696_v4 = vld [vmem:[%s2356_s3 + $0x178] sm:$0xff]  ;;  %v695_v5 = vld [vmem:[%s2356_s3 + $0x170] sm:$0xff]  ;;  %v587_v6 = vld [vmem:[%s2356_s3 + $0xe0] sm:$0xff] }
   0xd   : > { %315 = vst [vmem:[#allocation2 + $0x168] sm:$0x1] %v1429_v2  ;;  %697 = vmatpush.msra.mxu2 %v696_v4  ;;  %s1369_s12 = sshll.u32 %s1487_s29, 8  ;;  %v694_v7 = vld [vmem:[%s2356_s3 + $0x168] sm:$0xff]  ;;  %v586_v8 = vld [vmem:[%s2356_s3 + $0xd8] sm:$0xff]  ;;  %v585_v9 = vld [vmem:[%s2356_s3 + $0xd0] sm:$0xff]  ;;  %s266_s16 = scalar_lea.vmem %s2358_s5, %s1487_s29 }
   0xe   : > { %1371 = vmatpush.msra.mxu1 %v589_v1  ;;  %592 = vmatpush.msra.mxu0 %v589_v1  ;;  %s1506_s17 = scalar_lea.vmem %s2353_s0, %s1369_s12  ;;  %v693_v10 = vld [vmem:[%s2356_s3 + $0x160] sm:$0xff]  ;;  %v692_v11 = vld [vmem:[%s2356_s3 + $0x158] sm:$0xff]  ;;  %v584_v12 = vld [vmem:[%s2356_s3 + $0xc8] sm:$0xff]  ;;  %290 = vst [vmem:[#allocation2 + $0xa0] sm:$0xff] %v1429_v2  ;;  %s269_s20 = scalar_lea.vmem %s2359_s6, %s1487_s29 }
   0xf   : > { %698 = vmatpush.msra.mxu2 %v695_v5  ;;  %v769_v13 = vld [vmem:[%s2356_s3 + $0x1f8] sm:$0xff]  ;;  %v1530_v15 = vld [vmem:[%s2354_s1] ss:$0 sm:$0xff]  ;;  %v691_v17 = vld [vmem:[%s2356_s3 + $0x150] sm:$0xff]  ;;  %292 = vst [vmem:[#allocation2 + $0xb0] sm:$0xff] %v1429_v2 }
  0x10   : > { %1372 = vmatpush.msra.mxu1 %v588_v3  ;;  %593 = vmatpush.msra.mxu0 %v588_v3  ;;  %v1354_v14 = vld [vmem:[%s1506_s17 + $0x98] sm:$0xff]  ;;  %v1535_v16 = vld [vmem:[%s2355_s2] ss:$0 sm:$0xff]  ;;  %v690_v20 = vld [vmem:[%s2356_s3 + $0x148] sm:$0xff]  ;;  %294 = vst [vmem:[#allocation2 + $0xc0] sm:$0xff] %v1429_v2 }
  0x11   : > { %699 = vmatpush.msra.mxu2 %v694_v7  ;;  %770 = vmatpush.msra.mxu3 %v769_v13  ;;  %v457_v18 = vmul.f32 %v1530_v15, %v1354_v14  ;;  %v583_v19 = vld [vmem:[%s2356_s3 + $0xc0] sm:$0xff]  ;;  %v582_v22 = vld [vmem:[%s2356_s3 + $0xb8] sm:$0xff]  ;;  %v581_v25 = vld [vmem:[%s2356_s3 + $0xb0] sm:$0xff]  ;;  %296 = vst [vmem:[#allocation2 + $0xd0] sm:$0xff] %v1429_v2 }
  0x12   : > { %1373 = vmatpush.msra.mxu1 %v587_v6  ;;  %594 = vmatpush.msra.mxu0 %v587_v6  ;;  %v689_v23 = vld [vmem:[%s2356_s3 + $0x140] sm:$0xff]  ;;  %v580_v26 = vld [vmem:[%s2356_s3 + $0xa8] sm:$0xff]  ;;  %v688_v27 = vld [vmem:[%s2356_s3 + $0x138] sm:$0xff]  ;;  %298 = vst [vmem:[#allocation2 + $0xe0] sm:$0xff] %v1429_v2 }
  0x13   : > { %700 = vmatpush.msra.mxu2 %v693_v10  ;;  %v1548_v21 = vadd.f32 %v1535_v16, %v457_v18  ;;  %v768_v28 = vld [vmem:[%s2356_s3 + $0x1f0] sm:$0xff]  ;;  %v579_v29 = vld [vmem:[%s2356_s3 + $0xa0] sm:$0xff]  ;;  %v767_v31 = vld [vmem:[%s2356_s3 + $0x1e8] sm:$0xff]  ;;  %300 = vst [vmem:[#allocation2 + $0xf0] sm:$0xff] %v1429_v2 }
  0x14   : > { %1374 = vmatpush.msra.mxu1 %v586_v8  ;;  %595 = vmatpush.msra.mxu0 %v586_v8  ;;  %v687_v30 = vld [vmem:[%s2356_s3 + $0x130] sm:$0xff]  ;;  %v578_v32 = vld [vmem:[%s2356_s3 + $0x98] sm:$0xff]  ;;  %v686_v33 = vld [vmem:[%s2356_s3 + $0x128] sm:$0xff]  ;;  %302 = vst [vmem:[#allocation2 + $0x100] sm:$0xff] %v1429_v2 }
  0x15   : > { %701 = vmatpush.msra.mxu2 %v692_v11  ;;  %v477_v24 = vmax.f32 %v1548_v21, 0.0  ;;  %771 = vmatpush.msra.mxu3 %v768_v28  ;;  %v766_v34 = vld [vmem:[%s2356_s3 + $0x1e0] sm:$0xff]  ;;  %v577_v35 = vld [vmem:[%s2356_s3 + $0x90] sm:$0xff]  ;;  %v765_v37 = vld [vmem:[%s2356_s3 + $0x1d8] sm:$0xff]  ;;  %304 = vst [vmem:[#allocation2 + $0x110] sm:$0xff] %v1429_v2 }
  0x16   : > { %1375 = vmatpush.msra.mxu1 %v585_v9  ;;  %596 = vmatpush.msra.mxu0 %v585_v9  ;;  %v685_v36 = vld [vmem:[%s2356_s3 + $0x120] sm:$0xff]  ;;  %v576_v39 = vld [vmem:[%s2356_s3 + $0x88] sm:$0xff]  ;;  %v684_v40 = vld [vmem:[%s2356_s3 + $0x118] sm:$0xff]  ;;  %306 = vst [vmem:[#allocation2 + $0x120] sm:$0xff] %v1429_v2 }
  0x17   : > { %702 = vmatpush.msra.mxu2 %v691_v17  ;;  %486 = vst [vmem:[#allocation2 + $0x161] sm:$0xff] %v477_v24  ;;  %772 = vmatpush.msra.mxu3 %v767_v31  ;;  %v1355_v38 = vld [vmem:[%s1506_s17 + $0xa0] sm:$0xff]  ;;  %v764_v41 = vld [vmem:[%s2356_s3 + $0x1d0] sm:$0xff]  ;;  %v763_v45 = vld [vmem:[%s2356_s3 + $0x1c8] sm:$0xff] }
  0x18   : > { %1376 = vmatpush.msra.mxu1 %v584_v12  ;;  %597 = vmatpush.msra.mxu0 %v584_v12  ;;  %v575_v42 = vld [vmem:[%s2356_s3 + $0x80] sm:$0xff]  ;;  %v458_v43 = vmul.f32 %v1530_v15, %v1355_v38  ;;  %v683_v44 = vld [vmem:[%s2356_s3 + $0x110] sm:$0xff]  ;;  %v842_v46 = vld [vmem:[%s2356_s3 + $0x278] sm:$0xff]  ;;  %307 = vst [vmem:[#allocation2 + $0x128] sm:$0x1] %v1429_v2 }
  0x19   : > { %703 = vmatpush.msra.mxu2 %v690_v20  ;;  %773 = vmatpush.msra.mxu3 %v766_v34  ;;  %v565_v47 = vld [vmem:[%s2356_s3 + $0x78] sm:$0xff]  ;;  %v682_v48 = vld [vmem:[%s2356_s3 + $0x108] sm:$0xff]  ;;  %v841_v49 = vld [vmem:[%s2356_s3 + $0x270] sm:$0xff]  ;;  %324 = vst [vmem:[#allocation2 + $0x1b0] sm:$0xff] %v1429_v2 }
  0x1a   : > { %1377 = vmatpush.msra.mxu1 %v583_v19  ;;  %598 = vmatpush.msra.mxu0 %v583_v19  ;;  %v762_v50 = vld [vmem:[%s2356_s3 + $0x1c0] sm:$0xff]  ;;  %v564_v51 = vld [vmem:[%s2356_s3 + $0x70] sm:$0xff]  ;;  %v1639_v52 = vadd.f32 %v1535_v16, %v458_v43  ;;  %v840_v54 = vld [vmem:[%s2356_s3 + $0x268] sm:$0xff]  ;;  %325 = vst [vmem:[#allocation2 + $0x1b8] sm:$0x1] %v1429_v2 }
  0x1b   : > { %704 = vmatpush.msra.mxu2 %v689_v23  ;;  %774 = vmatpush.msra.mxu3 %v765_v37  ;;  %v681_v53 = vld [vmem:[%s2356_s3 + $0x100] sm:$0xff]  ;;  %v761_v55 = vld [vmem:[%s2356_s3 + $0x1b8] sm:$0xff]  ;;  %v1356_v56 = vld [vmem:[%s1506_s17 + $0xa8] sm:$0xff]  ;;  %326 = vst [vmem:[#allocation2 + $0x1c0] sm:$0xff] %v1429_v2 }
  0x1c   : > { %1378 = vmatpush.msra.mxu1 %v582_v22  ;;  %599 = vmatpush.msra.mxu0 %v582_v22  ;;  %v563_v57 = vld [vmem:[%s2356_s3 + $0x68] sm:$0xff]  ;;  %v839_v58 = vld [vmem:[%s2356_s3 + $0x260] sm:$0xff]  ;;  %v760_v59 = vld [vmem:[%s2356_s3 + $0x1b0] sm:$0xff]  ;;  %v478_v61 = vmax.f32 %v1639_v52, 0.0  ;;  %v459_v62 = vmul.f32 %v1530_v15, %v1356_v56  ;;  %328 = vst [vmem:[#allocation2 + $0x1d0] sm:$0xff] %v1429_v2 }
  0x1d   : > { %705 = vmatpush.msra.mxu2 %v688_v27  ;;  %775 = vmatpush.msra.mxu3 %v764_v41  ;;  %v562_v60 = vld [vmem:[%s2356_s3 + $0x60] sm:$0xff]  ;;  %v838_v63 = vld [vmem:[%s2356_s3 + $0x258] sm:$0xff]  ;;  %v759_v1 = vld [vmem:[%s2356_s3 + $0x1a8] sm:$0xff]  ;;  %330 = vst [vmem:[#allocation2 + $0x1e0] sm:$0xff] %v1429_v2 }
  0x1e   : > { %1379 = vmatpush.msra.mxu1 %v581_v25  ;;  %600 = vmatpush.msra.mxu0 %v581_v25  ;;  %v561_v0 = vld [vmem:[%s2356_s3 + $0x58] sm:$0xff]  ;;  %v837_v3 = vld [vmem:[%s2356_s3 + $0x250] sm:$0xff]  ;;  %v1687_v5 = vadd.f32 %v1535_v16, %v459_v62  ;;  %v758_v6 = vld [vmem:[%s2356_s3 + $0x1a0] sm:$0xff]  ;;  %332 = vst [vmem:[#allocation2 + $0x1f0] sm:$0xff] %v1429_v2 }
  0x1f   : > { %706 = vmatpush.msra.mxu2 %v687_v30  ;;  %776 = vmatpush.msra.mxu3 %v763_v45  ;;  %v560_v4 = vld [vmem:[%s2356_s3 + $0x50] sm:$0xff]  ;;  %v836_v7 = vld [vmem:[%s2356_s3 + $0x248] sm:$0xff]  ;;  %v757_v10 = vld [vmem:[%s2356_s3 + $0x198] sm:$0xff]  ;;  %334 = vst [vmem:[#allocation2 + $0x200] sm:$0xff] %v1429_v2 }
  0x20   : > { %1380 = vmatpush.msra.mxu1 %v580_v26  ;;  %601 = vmatpush.msra.mxu0 %v580_v26  ;;  %v1357_v8 = vld [vmem:[%s1506_s17 + $0xb0] sm:$0xff]  ;;  %v559_v9 = vld [vmem:[%s2356_s3 + $0x48] sm:$0xff]  ;;  %v1351_v11 = vld [vmem:[%s1506_s17 + $0x80] sm:$0xff]  ;;  %v479_v14 = vmax.f32 %v1687_v5, 0.0  ;;  %336 = vst [vmem:[#allocation2 + $0x210] sm:$0xff] %v1429_v2 }
  0x21   : > { %707 = vmatpush.msra.mxu2 %v686_v33  ;;  %777 = vmatpush.msra.mxu3 %v762_v50  ;;  %v835_v12 = vld [vmem:[%s2356_s3 + $0x240] sm:$0xff]  ;;  %v460_v17 = vmul.f32 %v1530_v15, %v1357_v8  ;;  %v756_v18 = vld [vmem:[%s2356_s3 + $0x190] sm:$0xff]  ;;  %v988_v19 = vld [vmem:[%s2356_s3 + $0x378] sm:$0xff]  ;;  %v454_v21 = vmul.f32 %v1530_v15, %v1351_v11  ;;  %338 = vst [vmem:[#allocation2 + $0x220] sm:$0xff] %v1429_v2 }
  0x22   : > { %1381 = vmatpush.msra.mxu1 %v579_v29  ;;  %602 = vmatpush.msra.mxu0 %v579_v29  ;;  %v558_v13 = vld [vmem:[%s2356_s3 + $0x40] sm:$0xff]  ;;  %v987_v20 = vld [vmem:[%s2356_s3 + $0x370] sm:$0xff]  ;;  %v557_v22 = vld [vmem:[%s2356_s3 + $0x38] sm:$0xff]  ;;  %340 = vst [vmem:[#allocation2 + $0x230] sm:$0xff] %v1429_v2 }
  0x23   : > { %708 = vmatpush.msra.mxu2 %v685_v36  ;;  %778 = vmatpush.msra.mxu3 %v761_v55  ;;  %v834_v23 = vld [vmem:[%s2356_s3 + $0x238] sm:$0xff]  ;;  %v1735_v25 = vadd.f32 %v1535_v16, %v460_v17  ;;  %v986_v26 = vld [vmem:[%s2356_s3 + $0x368] sm:$0xff]  ;;  %v833_v27 = vld [vmem:[%s2356_s3 + $0x230] sm:$0xff]  ;;  %v1750_v31 = vadd.f32 %v1535_v16, %v454_v21 }
  0x24   : > { %1382 = vmatpush.msra.mxu1 %v578_v32  ;;  %603 = vmatpush.msra.mxu0 %v578_v32  ;;  %v567_v28 = vld [vmem:[#allocation2 + $0x121] sm:$0xff]  ;;  %v553_v41 = vld [vmem:[%s2356_s3 + $0x18] sm:$0xff]  ;;  %v1353_v45 = vld [vmem:[%s1506_s17 + $0x90] sm:$0xff] }
  0x25   : > { %709 = vmatpush.msra.mxu2 %v684_v40  ;;  %779 = vmatpush.msra.mxu3 %v760_v59  ;;  %v755_v29 = vld [vmem:[%s2356_s3 + $0x188] sm:$0xff]  ;;  %v985_v30 = vld [vmem:[%s2356_s3 + $0x360] sm:$0xff]  ;;  %v480_v37 = vmax.f32 %v1735_v25, 0.0  ;;  %v984_v50 = vld [vmem:[%s2356_s3 + $0x358] sm:$0xff] }
  0x26   : > { %1383 = vmatpush.msra.mxu1 %v577_v35  ;;  %604 = vmatpush.msra.mxu0 %v577_v35  ;;  %v555_v32 = vld [vmem:[%s2356_s3 + $0x28] sm:$0xff]  ;;  %v754_v35 = vld [vmem:[%s2356_s3 + $0x180] sm:$0xff]  ;;  %v983_v55 = vld [vmem:[%s2356_s3 + $0x350] sm:$0xff] }
  0x27   : > { %710 = vmatpush.msra.mxu2 %v683_v44  ;;  %780 = vmatpush.msra.mxu3 %v759_v1  ;;  %v832_v33 = vld [vmem:[%s2356_s3 + $0x228] sm:$0xff]  ;;  %v554_v36 = vld [vmem:[%s2356_s3 + $0x20] sm:$0xff]  ;;  %v915_v62 = vld [vmem:[%s2356_s3 + $0x2f8] sm:$0xff] }
  0x28   : > { %1384 = vmatpush.msra.mxu1 %v576_v39  ;;  %605 = vmatpush.msra.mxu0 %v576_v39  ;;  %v1352_v34 = vld [vmem:[%s1506_s17 + $0x88] sm:$0xff]  ;;  %v831_v38 = vld [vmem:[%s2356_s3 + $0x220] sm:$0xff]  ;;  %v474_v39 = vmax.f32 %v1750_v31, 0.0 }
  0x29   : > { %711 = vmatpush.msra.mxu2 %v682_v48  ;;  %781 = vmatpush.msra.mxu3 %v758_v6  ;;  %v455_v40 = vmul.f32 %v1530_v15, %v1352_v34  ;;  %v1359_v43 = vld [vmem:[%s1506_s17 + $0xc0] sm:$0xff]  ;;  %v1061_v48 = vld [vmem:[%s2356_s3 + $0x3f8] sm:$0xff]  ;;  %v828_v56 = vld [vmem:[%s2356_s3 + $0x208] sm:$0xff] }
  0x2a   : > { %1385 = vmatpush.msra.mxu1 %v575_v42  ;;  %606 = vmatpush.msra.mxu0 %v575_v42  ;;  %v552_v42 = vld [vmem:[%s2356_s3 + $0x10] sm:$0xff]  ;;  %v1784_v44 = vld [vmem:[%s2354_s1] ss:$0 sm:$0xff]  ;;  %v982_v11 = vld [vmem:[%s2356_s3 + $0x348] sm:$0xff] }
  0x2b   : > { %619 = vmatmul.f32.vlgmr.msra.gmra.mxu1 %v477_v24  ;;  %712 = vmatpush.msra.mxu2 %v681_v53  ;;  %v556_v24 = vld [vmem:[%s2356_s3 + $0x30] sm:$0xff]  ;;  %v1827_v59 = vld [vmem:[%s2355_s2] ss:$0 sm:$0xff] }
  0x2c   : > { %843 = vmatpush.msrb.mxu0 %v842_v46  ;;  %632 = vmatpush.msrb.mxu1 %v565_v47  ;;  %v1791_v46 = vadd.f32 %v1535_v16, %v455_v40  ;;  %v551_v47 = vld [vmem:[%s2356_s3 + $0x8] sm:$0xff]  ;;  %v1060_v53 = vld [vmem:[%s2356_s3 + $0x3f0] sm:$0xff]  ;;  %v827_v1 = vld [vmem:[%s2356_s3 + $0x200] sm:$0xff] }
  0x2d   : > { %782 = vmatpush.msra.mxu3 %v757_v10  ;;  %989 = vmatpush.msrb.mxu2 %v988_v19  ;;  %v1852_v6 = vld [vmem:[%s2354_s1] ss:$0 sm:$0xff]  ;;  %v913_v10 = vld [vmem:[%s2356_s3 + $0x2e8] sm:$0xff] }
  0x2e   : > { %844 = vmatpush.msrb.mxu0 %v841_v49  ;;  %633 = vmatpush.msrb.mxu1 %v564_v51  ;;  %v830_v49 = vld [vmem:[%s2356_s3 + $0x218] sm:$0xff]  ;;  %v829_v51 = vld [vmem:[%s2356_s3 + $0x210] sm:$0xff]  ;;  %v912_v17 = vld [vmem:[%s2356_s3 + $0x2e0] sm:$0xff] }
  0x2f   : > { %783 = vmatpush.msra.mxu3 %v756_v18  ;;  %990 = vmatpush.msrb.mxu2 %v987_v20  ;;  %v1885_v19 = vld [vmem:[%s2355_s2] ss:$0 sm:$0xff]  ;;  %v1344_v20 = vld [vmem:[%s1506_s17 + $0x48] sm:$0xff] }
  0x30   : > { %845 = vmatpush.msrb.mxu0 %v840_v54  ;;  %634 = vmatpush.msrb.mxu1 %v563_v57  ;;  %v550_v54 = vld [vmem:[%s2356_s3] sm:$0xff]  ;;  %v475_v57 = vmax.f32 %v1791_v46, 0.0 }
  0x31   : > { %607 = vmatmul.f32.vlgmr.msra.gmra.mxu0 %v567_v28  ;;  %991 = vmatpush.msrb.mxu2 %v986_v26  ;;  %v1896_v26 = vld [vmem:[%s2355_s2] ss:$0 sm:$0xff]  ;;  %v1361_v28 = vld [vmem:[%s1506_s17 + $0xd0] sm:$0xff] }
  0x32   : > { %846 = vmatpush.msrb.mxu0 %v839_v58  ;;  %635 = vmatpush.msrb.mxu1 %v562_v60  ;;  %v504_v58 = vmul.f32 %v1784_v44, %v1359_v43  ;;  %v456_v60 = vmul.f32 %v1530_v15, %v1353_v45  ;;  %v914_v15 = vld [vmem:[%s2356_s3 + $0x2f0] sm:$0xff]  ;;  %v506_v40 = vmul.f32 %v1784_v44, %v1361_v28  ;;  %v1930_v43 = vld [vmem:[%s2356_s3 + $0x478] sm:$0xff] }
  0x33   : > { %622 = vmatmul.f32.gmra.mxu1 %v478_v61  ;;  %784 = vmatpush.msra.mxu3 %v755_v29  ;;  %v1345_v29 = vld [vmem:[%s1506_s17 + $0x50] sm:$0xff] }
  0x34   : > { %847 = vmatpush.msrb.mxu0 %v838_v63  ;;  %636 = vmatpush.msrb.mxu1 %v561_v0  ;;  %v1343_v63 = vld [vmem:[%s1506_s17 + $0x40] sm:$0xff]  ;;  %v1858_v8 = vadd.f32 %v1535_v16, %v456_v60  ;;  %v910_v45 = vld [vmem:[%s2356_s3 + $0x2d0] sm:$0xff]  ;;  %v518_v60 = vadd.f32 %v1827_v59, %v506_v40 }
  0x35   : > { %992 = vmatpush.msrb.mxu2 %v985_v30  ;;  %785 = vmatpush.msra.mxu3 %v754_v35  ;;  %v1838_v0 = vld [vmem:[%s2354_s1] ss:$0 sm:$0xff]  ;;  %v343_v30 = vld [vmem:[%s1506_s17 + $0x8] sm:$0xff] }
  0x36   : > { %848 = vmatpush.msrb.mxu0 %v837_v3  ;;  %637 = vmatpush.msrb.mxu1 %v560_v4  ;;  %v673_v3 = vld [vmem:[#allocation2 + $0x1b1] sm:$0xff]  ;;  %v1360_v4 = vld [vmem:[%s1506_s17 + $0xc8] sm:$0xff]  ;;  %v1058_v16 = vld [vmem:[%s2356_s3 + $0x3e0] sm:$0xff]  ;;  %v404_v18 = vmul.f32 %v1838_v0, %v1343_v63 }
  0x37   : > { %1062 = vmatpush.msrb.mxu3 %v1061_v48  ;;  %993 = vmatpush.msrb.mxu2 %v984_v50  ;;  %v355_v48 = vmul.f32 %v1852_v6, %v343_v30  ;;  %v979_v50 = vld [vmem:[%s2356_s3 + $0x330] sm:$0xff]  ;;  %v977_v30 = vld [vmem:[%s2356_s3 + $0x320] sm:$0xff] }
  0x38   : > { %849 = vmatpush.msrb.mxu0 %v836_v7  ;;  %638 = vmatpush.msrb.mxu1 %v559_v9  ;;  %v516_v7 = vadd.f32 %v1827_v59, %v504_v58  ;;  %v1059_v9 = vld [vmem:[%s2356_s3 + $0x3e8] sm:$0xff]  ;;  %v1347_v58 = vld [vmem:[%s1506_s17 + $0x60] sm:$0xff] }
  0x39   : > { %610 = vmatmul.f32.gmra.mxu0 %v474_v39  ;;  %1063 = vmatpush.msrb.mxu3 %v1060_v53 }
  0x3a   : > { %850 = vmatpush.msrb.mxu0 %v835_v12  ;;  %639 = vmatpush.msrb.mxu1 %v558_v13  ;;  %v342_v12 = vld [vmem:[%s1506_s17] sm:$0xff]  ;;  %v1888_v21 = vmax.f32 %v516_v7, 0.0 }
  0x3b   : > { %625 = vmatmul.f32.gmra.mxu1 %v479_v14  ;;  %994 = vmatpush.msrb.mxu2 %v983_v55  ;;  %v981_v13 = vld [vmem:[%s2356_s3 + $0x340] sm:$0xff] }
  0x3c   : > { %640 = vmatpush.msrb.mxu1 %v557_v22  ;;  %851 = vmatpush.msrb.mxu0 %v834_v23  ;;  %v476_v22 = vmax.f32 %v1858_v8, 0.0  ;;  %v505_v23 = vmul.f32 %v1784_v44, %v1360_v4  ;;  %533 = vst [vmem:[#allocation2 + $0x1c1] sm:$0xff] %v1888_v21 }
  0x3d   : > { %713 = vmatmul.f32.vlgmr.msra.gmra.mxu2 %v673_v3  ;;  %1064 = vmatpush.msrb.mxu3 %v1059_v9  ;;  %v367_v3 = vadd.f32 %v1896_v26, %v355_v48  ;;  %v408_v9 = vmul.f32 %v1838_v0, %v1347_v58 }
  0x3e   : > { %641 = vmatpush.msrb.mxu1 %v556_v24  ;;  %852 = vmatpush.msrb.mxu0 %v833_v27  ;;  %v354_v24 = vmul.f32 %v1852_v6, %v342_v12  ;;  %v405_v27 = vmul.f32 %v1838_v0, %v1344_v20  ;;  %v517_v34 = vadd.f32 %v1827_v59, %v505_v23  ;;  %v978_v20 = vld [vmem:[%s2356_s3 + $0x328] sm:$0xff]  ;;  %v1054_v23 = vld [vmem:[%s2356_s3 + $0x3c0] sm:$0xff] }
  0x3f   : > { %995 = vmatpush.msrb.mxu2 %v982_v11  ;;  %1065 = vmatpush.msrb.mxu3 %v1058_v16  ;;  %v1973_v11 = vld [vmem:[%s2356_s3 + $0x470] sm:$0xff]  ;;  %v909_v16 = vld [vmem:[%s2356_s3 + $0x2c8] sm:$0xff] }
  0x40   : > { %642 = vmatpush.msrb.mxu1 %v555_v32  ;;  %853 = vmatpush.msrb.mxu0 %v832_v33  ;;  %v1346_v32 = vld [vmem:[%s1506_s17 + $0x58] sm:$0xff]  ;;  %v1909_v33 = vadd.f32 %v1885_v19, %v404_v18  ;;  %v366_v35 = vadd.f32 %v1896_v26, %v354_v24  ;;  %v1994_v24 = vld [vmem:[%s2356_s3 + $0x468] sm:$0xff] }
  0x41   : > { %613 = vmatmul.f32.gmra.mxu0 %v475_v57  ;;  %996 = vmatpush.msrb.mxu2 %v981_v13  ;;  %v1980_v13 = vmax.f32 %v518_v60, 0.0 }
  0x42   : > { %643 = vmatpush.msrb.mxu1 %v554_v36  ;;  %854 = vmatpush.msrb.mxu0 %v831_v38  ;;  %v1057_v36 = vld [vmem:[%s2356_s3 + $0x3d8] sm:$0xff]  ;;  %v424_v53 = vmax.f32 %v1909_v33, 0.0  ;;  %v374_v55 = vmax.f32 %v366_v35, 0.0  ;;  %v2011_v35 = vadd.f32 %v1885_v19, %v408_v9 }
  0x43   : > { %628 = vmatmul.f32.gmra.mxu1 %v480_v37  ;;  %v980_v38 = vld [vmem:[%s2356_s3 + $0x338] sm:$0xff]  ;;  %1066 = vmatpush.msrb.mxu3 %v1057_v36  ;;  %535 = vst [vmem:[#allocation2 + $0x1e1] sm:$0xff] %v1980_v13 }
  0x44   : > { %644 = vmatpush.msrb.mxu1 %v553_v41  ;;  %855 = vmatpush.msrb.mxu0 %v830_v49  ;;  %v406_v41 = vmul.f32 %v1838_v0, %v1345_v29  ;;  %v1362_v49 = vld [vmem:[%s1506_s17 + $0xd8] sm:$0xff]  ;;  %433 = vst [vmem:[#allocation2 + $0xa1] sm:$0xff] %v424_v53  ;;  %v908_v29 = vld [vmem:[%s2356_s3 + $0x2c0] sm:$0xff] }
  0x45   : > { %716 = vmatmul.f32.gmra.mxu2 %v1888_v21  ;;  %v507_v63 = vmul.f32 %v1784_v44, %v1362_v49 }
  0x46   : > { %645 = vmatpush.msrb.mxu1 %v552_v42  ;;  %856 = vmatpush.msrb.mxu0 %v829_v51  ;;  %v1056_v42 = vld [vmem:[%s2356_s3 + $0x3d0] sm:$0xff]  ;;  %v407_v51 = vmul.f32 %v1838_v0, %v1346_v32  ;;  %v345_v32 = vld [vmem:[%s1506_s17 + $0x18] sm:$0xff] }
  0x47   : > { %997 = vmatpush.msrb.mxu2 %v980_v38  ;;  %1067 = vmatpush.msrb.mxu3 %v1056_v42  ;;  %v519_v18 = vadd.f32 %v1827_v59, %v507_v63  ;;  %v357_v36 = vmul.f32 %v1852_v6, %v345_v32  ;;  %v1348_v38 = vld [vmem:[%s1506_s17 + $0x68] sm:$0xff]  ;;  %v1053_v63 = vld [vmem:[%s2356_s3 + $0x3b8] sm:$0xff]  ;;  %v1365_v32 = vld [vmem:[%s1506_s17 + $0xf0] sm:$0xff] }
  0x48   : > { %646 = vmatpush.msrb.mxu1 %v551_v47  ;;  %857 = vmatpush.msrb.mxu0 %v828_v56  ;;  %v1936_v47 = vadd.f32 %v1885_v19, %v405_v27  ;;  %v344_v56 = vld [vmem:[%s1506_s17 + $0x10] sm:$0xff]  ;;  %v1960_v4 = vadd.f32 %v1885_v19, %v407_v51  ;;  %v375_v27 = vmax.f32 %v367_v3, 0.0  ;;  %v409_v42 = vmul.f32 %v1838_v0, %v1348_v38  ;;  %v907_v3 = vld [vmem:[%s2356_s3 + $0x2b8] sm:$0xff] }
  0x49   : > { %616 = vmatmul.f32.gmra.mxu0 %v476_v22  ;;  %998 = vmatpush.msrb.mxu2 %v979_v50  ;;  %v356_v7 = vmul.f32 %v1852_v6, %v344_v56  ;;  %v2024_v48 = vmax.f32 %v519_v18, 0.0  ;;  %v2028_v49 = vadd.f32 %v1896_v26, %v357_v36  ;;  %v428_v56 = vmax.f32 %v2011_v35, 0.0 }
  0x4a   : > { %647 = vmatpush.msrb.mxu1 %v550_v54  ;;  %858 = vmatpush.msrb.mxu0 %v827_v1  ;;  %v1946_v54 = vmax.f32 %v517_v34, 0.0  ;;  %v425_v1 = vmax.f32 %v1936_v47, 0.0  ;;  %v427_v28 = vmax.f32 %v1960_v4, 0.0  ;;  %v2031_v50 = vadd.f32 %v1885_v19, %v409_v42  ;;  %v1041_v47 = vld [vmem:[#allocation2 + $0x161] sm:$0xff] }
  0x4b   : > { %648 = vmatmul.f32.vlgmr.msrb.gmra.mxu1 %v1429_v2  ;;  %v911_v2 = vld [vmem:[%s2356_s3 + $0x2d8] sm:$0xff]  ;;  %999 = vmatpush.msrb.mxu2 %v978_v20  ;;  %v2007_v34 = vadd.f32 %v1896_v26, %v356_v7  ;;  %v746_v51 = vld [vmem:[#allocation2 + $0xa0] sm:$0xff]  ;;  %536 = vst [vmem:[#allocation2 + $0x1f1] sm:$0xff] %v2024_v48  ;;  %v377_v9 = vmax.f32 %v2028_v49, 0.0  ;;  %v902_v49 = vld [vmem:[%s2356_s3 + $0x290] sm:$0xff] }
  0x4c   : > { %916 = vmatpush.msra.mxu1 %v915_v62  ;;  %1135 = vmatpush.msra.mxu0 %v1930_v43  ;;  %v1952_v62 = vadd.f32 %v1885_v19, %v406_v41  ;;  %534 = vst [vmem:[#allocation2 + $0x1d1] sm:$0xff] %v1946_v54  ;;  %v976_v7 = vld [vmem:[%s2356_s3 + $0x318] sm:$0xff]  ;;  %v429_v18 = vmax.f32 %v2031_v50, 0.0 }
  0x4d   : > { %719 = vmatmul.f32.gmra.mxu2 %v1946_v54  ;;  %434 = vst [vmem:[#allocation2 + $0xb1] sm:$0xff] %v425_v1  ;;  %786 = vmatmul.f32.vlgmr.msra.gmra.mxu3 %v746_v51 }
  0x4e   : > { %917 = vmatpush.msra.mxu1 %v914_v15  ;;  %v1363_v15 = vld [vmem:[%s1506_s17 + $0xe0] sm:$0xff]  ;;  %1136 = vmatpush.msra.mxu0 %v1973_v11  ;;  %436 = vst [vmem:[#allocation2 + $0xd1] sm:$0xff] %v427_v28 }
  0x4f   : > { %v508_v12 = vmul.f32 %v1784_v44, %v1363_v15  ;;  %1000 = vmatpush.msrb.mxu2 %v977_v30  ;;  %v2048_v15 = vld [vmem:[%s2356_s3 + $0x460] sm:$0xff]  ;;  %437 = vst [vmem:[#allocation2 + $0xe1] sm:$0xff] %v428_v56 }
  0x50   : > { %918 = vmatpush.msra.mxu1 %v913_v10  ;;  %v1055_v10 = vld [vmem:[%s2356_s3 + $0x3c8] sm:$0xff]  ;;  %1137 = vmatpush.msra.mxu0 %v1994_v24  ;;  %438 = vst [vmem:[#allocation2 + $0xf1] sm:$0xff] %v429_v18 }
  0x51   : > { %859 = vmatmul.f32.vlgmr.msrb.gmra.mxu0 %v374_v55  ;;  %1068 = vmatpush.msrb.mxu3 %v1055_v10  ;;  %v520_v40 = vadd.f32 %v1827_v59, %v508_v12  ;;  %v376_v55 = vmax.f32 %v2007_v34, 0.0  ;;  %v1052_v10 = vld [vmem:[%s2356_s3 + $0x3b0] sm:$0xff]  ;;  %v2065_v12 = vld [vmem:[%s2356_s3 + $0x458] sm:$0xff] }
  0x52   : > { %919 = vmatpush.msra.mxu1 %v912_v17  ;;  %v426_v17 = vmax.f32 %v1952_v62, 0.0  ;;  %1138 = vmatpush.msra.mxu0 %v2048_v15  ;;  %v1349_v34 = vld [vmem:[%s1506_s17 + $0x70] sm:$0xff] }
  0x53   : > { %1069 = vmatpush.msrb.mxu3 %v1054_v23  ;;  %v2040_v60 = vmax.f32 %v520_v40, 0.0  ;;  %v2071_v20 = vld [vmem:[#allocation2 + $0x1d0] sm:$0xff]  ;;  %1001 = vmatpush.msrb.mxu2 %v976_v7  ;;  %v410_v38 = vmul.f32 %v1838_v0, %v1349_v34  ;;  %v347_v34 = vld [vmem:[%s1506_s17 + $0x28] sm:$0xff] }
  0x54   : > { %920 = vmatpush.msra.mxu1 %v911_v2  ;;  %v1364_v2 = vld [vmem:[%s1506_s17 + $0xe8] sm:$0xff]  ;;  %435 = vst [vmem:[#allocation2 + $0xc1] sm:$0xff] %v426_v17  ;;  %1139 = vmatpush.msra.mxu0 %v2065_v12  ;;  %v747_v36 = vld [vmem:[#allocation2 + $0xb0] sm:$0xff] }
  0x55   : > { %v509_v41 = vmul.f32 %v1784_v44, %v1364_v2  ;;  %722 = vmatmul.f32.gmra.mxu2 %v1980_v13  ;;  %1070 = vmatpush.msrb.mxu3 %v1053_v63  ;;  %537 = vst [vmem:[#allocation2 + $0x201] sm:$0xff] %v2040_v60  ;;  %v510_v2 = vmul.f32 %v1784_v44, %v1365_v32  ;;  %v2106_v63 = vld [vmem:[%s2356_s3 + $0x450] sm:$0xff]  ;;  %v973_v32 = vld [vmem:[%s2356_s3 + $0x300] sm:$0xff] }
  0x56   : > { %921 = vmatpush.msra.mxu1 %v910_v45  ;;  %v2020_v45 = vld [vmem:[#allocation2 + $0x1c0] sm:$0xff]  ;;  %v2096_v42 = vadd.f32 %v1885_v19, %v410_v38  ;;  %789 = vmatmul.f32.gmra.mxu3 %v747_v36  ;;  %v1350_v36 = vld [vmem:[%s1506_s17 + $0x78] sm:$0xff] }
  0x57   : > { %651 = vmatmul.f32.gmra.mxu1 %v2020_v45  ;;  %v521_v58 = vadd.f32 %v1827_v59, %v509_v41  ;;  %1071 = vmatpush.msrb.mxu3 %v1052_v10  ;;  %v522_v41 = vadd.f32 %v1827_v59, %v510_v2  ;;  %v974_v10 = vld [vmem:[%s2356_s3 + $0x308] sm:$0xff]  ;;  %v359_v2 = vmul.f32 %v1852_v6, %v347_v34  ;;  %v2171_v34 = vld [vmem:[#allocation2 + $0x1f0] sm:$0xff] }
  0x58   : > { %922 = vmatpush.msra.mxu1 %v909_v16  ;;  %v906_v16 = vld [vmem:[%s2356_s3 + $0x2b0] sm:$0xff]  ;;  %1140 = vmatpush.msra.mxu0 %v2106_v63  ;;  %v411_v38 = vmul.f32 %v1838_v0, %v1350_v36  ;;  %v1049_v0 = vld [vmem:[%s2356_s3 + $0x398] sm:$0xff] }
  0x59   : > { %862 = vmatmul.f32.gmra.mxu0 %v375_v27  ;;  %v2075_v23 = vmax.f32 %v521_v58, 0.0  ;;  %v975_v27 = vld [vmem:[%s2356_s3 + $0x310] sm:$0xff]  ;;  %v1051_v58 = vld [vmem:[%s2356_s3 + $0x3a8] sm:$0xff]  ;;  %v2111_v7 = vmax.f32 %v522_v41, 0.0 }
  0x5a   : > { %923 = vmatpush.msra.mxu1 %v908_v29  ;;  %v346_v29 = vld [vmem:[%s1506_s17 + $0x20] sm:$0xff]  ;;  %1002 = vmatpush.msrb.mxu2 %v975_v27  ;;  %v430_v27 = vmax.f32 %v2096_v42, 0.0 }
  0x5b   : > { %v358_v30 = vmul.f32 %v1852_v6, %v346_v29  ;;  %538 = vst [vmem:[#allocation2 + $0x211] sm:$0xff] %v2075_v23  ;;  %1072 = vmatpush.msrb.mxu3 %v1051_v58  ;;  %v2120_v29 = vld [vmem:[#allocation2 + $0x1e0] sm:$0xff]  ;;  %v371_v58 = vadd.f32 %v1896_v26, %v359_v2  ;;  %v749_v2 = vld [vmem:[#allocation2 + $0xd0] sm:$0xff] }
  0x5c   : > { %924 = vmatpush.msra.mxu1 %v907_v3  ;;  %v905_v3 = vld [vmem:[%s2356_s3 + $0x2a8] sm:$0xff]  ;;  %539 = vst [vmem:[#allocation2 + $0x221] sm:$0xff] %v2111_v7  ;;  %1003 = vmatpush.msrb.mxu2 %v974_v10  ;;  %v748_v41 = vld [vmem:[#allocation2 + $0xc0] sm:$0xff] }
  0x5d   : > { %v2092_v40 = vadd.f32 %v1896_v26, %v358_v30  ;;  %725 = vmatmul.f32.gmra.mxu2 %v2024_v48  ;;  %v904_v30 = vld [vmem:[%s2356_s3 + $0x2a0] sm:$0xff]  ;;  %439 = vst [vmem:[#allocation2 + $0x101] sm:$0xff] %v430_v27  ;;  %v379_v10 = vmax.f32 %v371_v58, 0.0  ;;  %v1125_v58 = vld [vmem:[%s2356_s3 + $0x430] sm:$0xff] }
  0x5e   : > { %925 = vmatpush.msra.mxu1 %v906_v16  ;;  %v1050_v16 = vld [vmem:[%s2356_s3 + $0x3a0] sm:$0xff]  ;;  %1004 = vmatpush.msrb.mxu2 %v973_v32  ;;  %v1126_v32 = vld [vmem:[%s2356_s3 + $0x438] sm:$0xff] }
  0x5f   : > { %654 = vmatmul.f32.gmra.mxu1 %v2071_v20  ;;  %v378_v51 = vmax.f32 %v2092_v40, 0.0  ;;  %1073 = vmatpush.msrb.mxu3 %v1050_v16  ;;  %v1127_v16 = vld [vmem:[%s2356_s3 + $0x440] sm:$0xff] }
  0x60   : > { %926 = vmatpush.msra.mxu1 %v905_v3  ;;  %1386 = vmatpush.msra.mxu2 %v1930_v43  ;;  %v2146_v3 = vadd.f32 %v1885_v19, %v411_v38  ;;  %v903_v19 = vld [vmem:[%s2356_s3 + $0x298] sm:$0xff]  ;;  %v1048_v43 = vld [vmem:[%s2356_s3 + $0x390] sm:$0xff]  ;;  %v900_v40 = vld [vmem:[%s2356_s3 + $0x280] sm:$0xff] }
  0x61   : > { %865 = vmatmul.f32.gmra.mxu0 %v376_v55  ;;  %v2126_v55 = vld [vmem:[%s2356_s3 + $0x448] sm:$0xff]  ;;  %792 = vmatmul.f32.gmra.mxu3 %v748_v41 }
  0x62   : > { %1141 = vmatpush.msra.mxu0 %v2126_v55  ;;  %927 = vmatpush.msra.mxu1 %v904_v30  ;;  %v431_v30 = vmax.f32 %v2146_v3, 0.0 }
  0x63   : > { %1074 = vmatpush.msrb.mxu3 %v1049_v0  ;;  %1387 = vmatpush.msra.mxu2 %v1973_v11  ;;  %v1047_v11 = vld [vmem:[%s2356_s3 + $0x388] sm:$0xff] }
  0x64   : > { %1142 = vmatpush.msra.mxu0 %v1127_v16  ;;  %928 = vmatpush.msra.mxu1 %v903_v19  ;;  %440 = vst [vmem:[#allocation2 + $0x111] sm:$0xff] %v431_v30  ;;  %v1124_v0 = vld [vmem:[%s2356_s3 + $0x428] sm:$0xff]  ;;  %v1123_v19 = vld [vmem:[%s2356_s3 + $0x420] sm:$0xff] }
  0x65   : > { %728 = vmatmul.f32.gmra.mxu2 %v2040_v60  ;;  %1075 = vmatpush.msrb.mxu3 %v1048_v43  ;;  %v349_v43 = vld [vmem:[%s1506_s17 + $0x38] sm:$0xff] }
  0x66   : > { %1143 = vmatpush.msra.mxu0 %v1126_v32  ;;  %929 = vmatpush.msra.mxu1 %v902_v49  ;;  %v361_v49 = vmul.f32 %v1852_v6, %v349_v43 }
  0x67   : > { %657 = vmatmul.f32.gmra.mxu1 %v2120_v29  ;;  %1388 = vmatpush.msra.mxu2 %v1994_v24  ;;  %v901_v24 = vld [vmem:[%s2356_s3 + $0x288] sm:$0xff] }
  0x68   : > { %1076 = vmatpush.msrb.mxu3 %v1047_v11  ;;  %1144 = vmatpush.msra.mxu0 %v1125_v58 }
  0x69   : > { %868 = vmatmul.f32.gmra.mxu0 %v377_v9  ;;  %v348_v9 = vld [vmem:[%s1506_s17 + $0x30] sm:$0xff]  ;;  %1389 = vmatpush.msra.mxu2 %v2048_v15  ;;  %v1046_v15 = vld [vmem:[%s2356_s3 + $0x380] sm:$0xff] }
  0x6a   : > { %v360_v36 = vmul.f32 %v1852_v6, %v348_v9  ;;  %795 = vmatmul.f32.gmra.mxu3 %v749_v2  ;;  %930 = vmatpush.msra.mxu1 %v901_v24  ;;  %v750_v9 = vld [vmem:[#allocation2 + $0xe0] sm:$0xff]  ;;  %v1121_v6 = vld [vmem:[%s2356_s3 + $0x410] sm:$0xff] }
  0x6b   : > { %1077 = vmatpush.msrb.mxu3 %v1046_v15  ;;  %1390 = vmatpush.msra.mxu2 %v2065_v12  ;;  %v1122_v12 = vld [vmem:[%s2356_s3 + $0x418] sm:$0xff] }
  0x6c   : > { %v372_v38 = vadd.f32 %v1896_v26, %v360_v36  ;;  %1145 = vmatpush.msra.mxu0 %v1124_v0  ;;  %931 = vmatpush.msra.mxu1 %v900_v40  ;;  %v373_v36 = vadd.f32 %v1896_v26, %v361_v49  ;;  %v1120_v26 = vld [vmem:[%s2356_s3 + $0x408] sm:$0xff] }
  0x6d   : > { %731 = vmatmul.f32.gmra.mxu2 %v2075_v23 }
  0x6e   : > { %v380_v41 = vmax.f32 %v372_v38, 0.0  ;;  %1391 = vmatpush.msra.mxu2 %v2106_v63  ;;  %1146 = vmatpush.msra.mxu0 %v1123_v19  ;;  %v381_v2 = vmax.f32 %v373_v36, 0.0  ;;  %v548_v63 = vld [vmem:[#allocation2 + $0x210] sm:$0xff] }
  0x6f   : > { %660 = vmatmul.f32.gmra.mxu1 %v2171_v34  ;;  %v753_v38 = vld [vmem:[#allocation2 + $0x110] sm:$0xff] }
  0x70   : > { %1392 = vmatpush.msra.mxu2 %v2126_v55  ;;  %1147 = vmatpush.msra.mxu0 %v1122_v12  ;;  %v751_v55 = vld [vmem:[#allocation2 + $0xf0] sm:$0xff] }
  0x71   : > { %871 = vmatmul.f32.gmra.mxu0 %v378_v51  ;;  %v2202_v51 = vld [vmem:[#allocation2 + $0x200] sm:$0xff] }
  0x72   : > { %798 = vmatmul.f32.gmra.mxu3 %v750_v9  ;;  %1393 = vmatpush.msra.mxu2 %v1127_v16  ;;  %v549_v16 = vld [vmem:[#allocation2 + $0x220] sm:$0xff] }
  0x73   : > { %1148 = vmatpush.msra.mxu0 %v1121_v6 }
  0x74   : > { %1394 = vmatpush.msra.mxu2 %v1126_v32  ;;  %v752_v32 = vld [vmem:[#allocation2 + $0x100] sm:$0xff] }
  0x75   : > { %734 = vmatmul.f32.gmra.mxu2 %v2111_v7  ;;  %1149 = vmatpush.msra.mxu0 %v1120_v26 }
  0x76   : > { %1395 = vmatpush.msra.mxu2 %v1125_v58 }
  0x77   : > { %663 = vmatmul.f32.gmra.mxu1 %v2202_v51 }
  0x78   : > { %1396 = vmatpush.msra.mxu2 %v1124_v0 }
  0x79   : > { %874 = vmatmul.f32.gmra.mxu0 %v379_v10  ;;  %v1119_v10 = vld [vmem:[%s2356_s3 + $0x400] sm:$0xff] }
  0x7a   : > { %801 = vmatmul.f32.gmra.mxu3 %v751_v55  ;;  %1397 = vmatpush.msra.mxu2 %v1123_v19 }
  0x7b   : > { %1150 = vmatpush.msra.mxu0 %v1119_v10 }
  0x7c   : > { %1398 = vmatpush.msra.mxu2 %v1122_v12 }
  0x7d   : > { %1005 = vmatmul.f32.vlgmr.msrb.gmra.mxu2 %v2020_v45  ;;  %v1366_v45 = vld [vmem:[%s1506_s17 + $0xf8] sm:$0xff] }
  0x7e   : > { %1399 = vmatpush.msra.mxu2 %v1121_v6 }
  0x7f   : > { %666 = vmatmul.f32.gmra.mxu1 %v548_v63 }
  0x80   : > { %1400 = vmatpush.msra.mxu2 %v1120_v26 }
  0x81   : > { %877 = vmatmul.f32.gmra.mxu0 %v380_v41  ;;  %v511_v41 = vmul.f32 %v1784_v44, %v1366_v45  ;;  %v1419_v44 = vld [vmem:[%s2354_s1] ss:$0 sm:$0xff] }
  0x82   : > { %804 = vmatmul.f32.gmra.mxu3 %v752_v32  ;;  %1401 = vmatpush.msra.mxu2 %v1119_v10 }
  0x85   : > { %1008 = vmatmul.f32.gmra.mxu2 %v2071_v20  ;;  %v523_v20 = vadd.f32 %v1827_v59, %v511_v41  ;;  %v1420_v59 = vld [vmem:[%s2355_s2] ss:$0 sm:$0xff] }
  0x87   : > { %669 = vmatmul.f32.gmra.mxu1 %v549_v16  ;;  %v531_v33 = vmax.f32 %v523_v20, 0.0 }
  0x89   : > { %880 = vmatmul.f32.gmra.mxu0 %v381_v2  ;;  %540 = vst [vmem:[#allocation2 + $0x231] sm:$0xff] %v531_v33 }
  0x8a   : > { %807 = vmatmul.f32.gmra.mxu3 %v753_v38 }
  0x8d   : > { %1011 = vmatmul.f32.gmra.mxu2 %v2120_v29 }
  0x8f   : > { %932 = vmatmul.f32.vlgmr.msra.gmra.mxu1 %v424_v53 }
  0x90   : > { %v972_v62 = vld [vmem:[#allocation2 + $0x230] sm:$0xff] }
  0x91   : > { %1151 = vmatmul.f32.vlgmr.msra.gmra.mxu0 %v1888_v21 }
  0x92   : > { %1078 = vmatmul.f32.vlgmr.msrb.gmra.mxu3 %v474_v39  ;;  %v1358_v39 = vld [vmem:[%s1506_s17 + $0xb8] sm:$0xff]  ;;  %s1341_s17 = sshll.u32 %s1471_s22, 3 }
  0x93   : > { %v461_v46 = vmul.f32 %v1419_v44, %v1358_v39  ;;  %p259_p4 = scmp.lt.s32.totalorder %s1341_s17, 15 }
  0x95   : > { %1014 = vmatmul.f32.gmra.mxu2 %v2171_v34  ;;  %v473_v21 = vadd.f32 %v1420_v59, %v461_v46  ;;  %s2361_s17 = smov (!%p259_p4, %s1341_s17), 15 }
  0x96   : > { %s1342_s11 = sshll.u32 %s2361_s17, 3 }
  0x97   : > { %935 = vmatmul.f32.gmra.mxu1 %v425_v1  ;;  %v481_v8 = vmax.f32 %v473_v21, 0.0  ;;  %s2315_s13 = scalar_lea.vmem %s2357_s4, %s1342_s11 }
  0x99   : > { %1154 = vmatmul.f32.gmra.mxu0 %v1946_v54 }
  0x9a   : > { %1081 = vmatmul.f32.gmra.mxu3 %v475_v57 }
  0x9d   : > { %1017 = vmatmul.f32.gmra.mxu2 %v2202_v51 }
  0x9f   : > { %938 = vmatmul.f32.gmra.mxu1 %v426_v17 }
  0xa1   : > { %1157 = vmatmul.f32.gmra.mxu0 %v1980_v13 }
  0xa2   : > { %1084 = vmatmul.f32.gmra.mxu3 %v476_v22 }
  0xa5   : > { %1020 = vmatmul.f32.gmra.mxu2 %v548_v63 }
  0xa7   : > { %941 = vmatmul.f32.gmra.mxu1 %v427_v28 }
  0xa8   : > { %v2242_v53 = vpop.f32.mrf.mxu1 }
  0xa9   : > { %1160 = vmatmul.f32.gmra.mxu0 %v2024_v48 }
  0xaa   : > { %1087 = vmatmul.f32.gmra.mxu3 %v1041_v47 }
  0xad   : > { %1023 = vmatmul.f32.gmra.mxu2 %v549_v16 }
  0xae   : > { %v608_v54 = vpop.f32.mrf.mxu0 }
  0xaf   : > { %944 = vmatmul.f32.gmra.mxu1 %v428_v56 }
  0xb0   : > { %v2250_v31 = vpop.f32.mrf.mxu1 }
  0xb1   : > { %1163 = vmatmul.f32.gmra.mxu0 %v2040_v60 }
  0xb2   : > { %1090 = vmatmul.f32.gmra.mxu3 %v478_v61 }
  0xb5   : > { %1026 = vmatmul.f32.gmra.mxu2 %v972_v62 }
  0xb6   : > { %v611_v1 = vpop.f32.mrf.mxu0 }
  0xb7   : > { %947 = vmatmul.f32.gmra.mxu1 %v429_v18 }
  0xb8   : > { %v2261_v57 = vpop.f32.mrf.mxu1 }
  0xb9   : > { %1166 = vmatmul.f32.gmra.mxu0 %v2075_v23 }
  0xba   : > { %1093 = vmatmul.f32.gmra.mxu3 %v479_v14 }
  0xbd   : > { %1169 = vmatmul.f32.vlgmr.msra.gmra.mxu2 %v2111_v7 }
  0xbe   : > { %v614_v4 = vpop.f32.mrf.mxu0 }
  0xbf   : > { %950 = vmatmul.f32.gmra.mxu1 %v430_v27 }
  0xc0   : > { %v2269_v22 = vpop.f32.mrf.mxu1  ;;  %v714_v28 = vpop.f32.mrf.mxu2 }
  0xc2   : > { %1096 = vmatmul.f32.gmra.mxu3 %v480_v37 }
  0xc5   : > { %1172 = vmatmul.f32.gmra.mxu2 %v531_v33 }
  0xc6   : > { %v617_v48 = vpop.f32.mrf.mxu0 }
  0xc7   : > { %953 = vmatmul.f32.gmra.mxu1 %v431_v30 }
  0xc8   : > { %v649_v13 = vpop.f32.mrf.mxu1  ;;  %v717_v52 = vpop.f32.mrf.mxu2 }
  0xc9   : > { %v650_v17 = vadd.f32 %v649_v13, %v608_v54 }
  0xca   : > { %1099 = vmatmul.f32.gmra.mxu3 %v481_v8 }
  0xcb   : > { %v738_v35 = vadd.f32 %v714_v28, %v650_v17 }
  0xce   : > { %v860_v61 = vpop.f32.mrf.mxu0 }
  0xd0   : > { %v720_v50 = vpop.f32.mrf.mxu2  ;;  %v787_v18 = vpop.f32.mrf.mxu3 }
  0xd1   : > { %v811_v32 = vadd.f32 %v787_v18, %v738_v35 }
  0xd3   : > { %v884_v45 = vadd.f32 %v860_v61, %v811_v32 }
  0xd4   : > { %v652_v56 = vpop.f32.mrf.mxu1 }
  0xd5   : > { %v653_v5 = vadd.f32 %v652_v56, %v611_v1 }
  0xd6   : > { %v863_v60 = vpop.f32.mrf.mxu0 }
  0xd7   : > { %v739_v14 = vadd.f32 %v717_v52, %v653_v5 }
  0xd8   : > { %v723_v23 = vpop.f32.mrf.mxu2 }
  0xd9   : > { %v790_v3 = vpop.f32.mrf.mxu3 }
  0xda   : > { %v812_v44 = vadd.f32 %v790_v3, %v739_v14 }
  0xdc   : > { %v655_v42 = vpop.f32.mrf.mxu1  ;;  %v885_v59 = vadd.f32 %v863_v60, %v812_v44 }
  0xdd   : > { %v656_v7 = vadd.f32 %v655_v42, %v614_v4 }
  0xde   : > { %v866_v27 = vpop.f32.mrf.mxu0 }
  0xdf   : > { %v740_v29 = vadd.f32 %v720_v50, %v656_v7 }
  0xe0   : > { %v2285_v30 = vpop.f32.mrf.mxu2 }
  0xe4   : > { %v658_v25 = vpop.f32.mrf.mxu1  ;;  %v793_v58 = vpop.f32.mrf.mxu3 }
  0xe5   : > { %v659_v37 = vadd.f32 %v658_v25, %v617_v48  ;;  %v813_v4 = vadd.f32 %v793_v58, %v740_v29 }
  0xe6   : > { %v869_v34 = vpop.f32.mrf.mxu0 }
  0xe7   : > { %v741_v11 = vadd.f32 %v723_v23, %v659_v37  ;;  %v886_v28 = vadd.f32 %v866_v27, %v813_v4 }
  0xe8   : > { %v2287_v24 = vpop.f32.mrf.mxu2 }
  0xec   : > { %v661_v15 = vpop.f32.mrf.mxu1 }
  0xed   : > { %v796_v40 = vpop.f32.mrf.mxu3  ;;  %v662_v14 = vadd.f32 %v661_v15, %v2242_v53 }
  0xee   : > { %v2289_v0 = vpop.f32.mrf.mxu0  ;;  %v814_v5 = vadd.f32 %v796_v40, %v741_v11 }
  0xef   : > { %v742_v3 = vadd.f32 %v2285_v30, %v662_v14 }
  0xf0   : > { %v2291_v51 = vpop.f32.mrf.mxu2  ;;  %v887_v29 = vadd.f32 %v869_v34, %v814_v5 }
  0xf4   : > { %v664_v19 = vpop.f32.mrf.mxu1 }
  0xf5   : > { %v799_v49 = vpop.f32.mrf.mxu3  ;;  %v665_v11 = vadd.f32 %v664_v19, %v2250_v31 }
  0xf6   : > { %v2293_v43 = vpop.f32.mrf.mxu0 }
  0xf7   : > { %v743_v30 = vadd.f32 %v2287_v24, %v665_v11 }
  0xf8   : > { %v2295_v9 = vpop.f32.mrf.mxu2 }
  0xfc   : > { %v2297_v36 = vpop.f32.mrf.mxu1 }
  0xfd   : > { %v2301_v12 = vpop.f32.mrf.mxu3  ;;  %v668_v31 = vadd.f32 %v2297_v36, %v2261_v57 }
  0xfe   : > { %v2299_v2 = vpop.f32.mrf.mxu0 }
 0x100   : > { %v1006_v6 = vpop.f32.mrf.mxu2 }
 0x104   : > { %v2303_v63 = vpop.f32.mrf.mxu1 }
 0x105   : > { %v2307_v55 = vpop.f32.mrf.mxu3  ;;  %v671_v57 = vadd.f32 %v2303_v63, %v2269_v22 }
 0x106   : > { %v2305_v26 = vpop.f32.mrf.mxu0 }
 0x108   : > { %v1009_v10 = vpop.f32.mrf.mxu2 }
 0x10c   : > { %v933_v16 = vpop.f32.mrf.mxu1 }
 0x10d   : > { %v2310_v41 = vpop.f32.mrf.mxu3  ;;  %v957_v33 = vadd.f32 %v933_v16, %v884_v45  ;;  %v815_v16 = vadd.f32 %v799_v49, %v742_v3  ;;  %v816_v49 = vadd.f32 %v2301_v12, %v743_v30 }
 0x10e   : > { %v1152_v38 = vpop.f32.mrf.mxu0 }
 0x10f   : > { %v1030_v46 = vadd.f32 %v1006_v6, %v957_v33  ;;  %v888_v34 = vadd.f32 %v2289_v0, %v815_v16  ;;  %v889_v24 = vadd.f32 %v2293_v43, %v816_v49 }
 0x110   : > { %v1012_v20 = vpop.f32.mrf.mxu2 }
 0x114   : > { %v936_v39 = vpop.f32.mrf.mxu1 }
 0x115   : > { %v1079_v47 = vpop.f32.mrf.mxu3  ;;  %v958_v62 = vadd.f32 %v936_v39, %v885_v59 }
 0x116   : > { %v1155_v21 = vpop.f32.mrf.mxu0  ;;  %v1103_v8 = vadd.f32 %v1079_v47, %v1030_v46 }
 0x117   : > { %v1031_v17 = vadd.f32 %v1009_v10, %v958_v62 }
 0x118   : > { %v1015_v54 = vpop.f32.mrf.mxu2  ;;  %v1176_v13 = vadd.f32 %v1152_v38, %v1103_v8 }
 0x11a   : > { %1184 = vst [vmem:[%s2315_s13] sm:$0xff] %v1176_v13  ;;  %v1206_v18 = vmul.f32 %v1176_v13, %v1176_v13 }
 0x11c   : > { %v939_v1 = vpop.f32.mrf.mxu1 }
 0x11d   : > { %v1082_v35 = vpop.f32.mrf.mxu3  ;;  %v959_v61 = vadd.f32 %v939_v1, %v886_v28 }
 0x11e   : > { %v1104_v52 = vadd.f32 %v1082_v35, %v1031_v17  ;;  %v1158_v56 = vpop.f32.mrf.mxu0 }
 0x11f   : > { %v1032_v7 = vadd.f32 %v1012_v20, %v959_v61 }
 0x120   : > { %v1018_v48 = vpop.f32.mrf.mxu2  ;;  %v1177_v60 = vadd.f32 %v1155_v21, %v1104_v52 }
 0x122   : > { %1185 = vst [vmem:[%s2315_s13 + $0x8] sm:$0xff] %v1177_v60  ;;  %v1192_v23 = vadd.f32 %v1177_v60, %v1176_v13  ;;  %v1207_v42 = vmul.f32 %v1177_v60, %v1177_v60 }
 0x124   : > { %v942_v50 = vpop.f32.mrf.mxu1  ;;  %v1214_v27 = vadd.f32 %v1207_v42, %v1206_v18 }
 0x125   : > { %v1085_v25 = vpop.f32.mrf.mxu3  ;;  %v960_v6 = vadd.f32 %v942_v50, %v887_v29 }
 0x126   : > { %v1105_v58 = vadd.f32 %v1085_v25, %v1032_v7  ;;  %v1161_v15 = vpop.f32.mrf.mxu0 }
 0x127   : > { %v1033_v38 = vadd.f32 %v1015_v54, %v960_v6  ;;  %v744_v54 = vadd.f32 %v2291_v51, %v668_v31  ;;  %v745_v51 = vadd.f32 %v2295_v9, %v671_v57 }
 0x128   : > { %v1021_v37 = vpop.f32.mrf.mxu2  ;;  %v1178_v53 = vadd.f32 %v1158_v56, %v1105_v58 }
 0x129   : > { %v817_v12 = vadd.f32 %v2307_v55, %v744_v54  ;;  %v818_v22 = vadd.f32 %v2310_v41, %v745_v51 }
 0x12a   : > { %1186 = vst [vmem:[%s2315_s13 + $0x10] sm:$0xff] %v1178_v53  ;;  %v1193_v40 = vadd.f32 %v1192_v23, %v1178_v53  ;;  %v1208_v32 = vmul.f32 %v1178_v53, %v1178_v53 }
 0x12b   : > { %v890_v43 = vadd.f32 %v2299_v2, %v817_v12  ;;  %v891_v2 = vadd.f32 %v2305_v26, %v818_v22 }
 0x12c   : > { %v945_v10 = vpop.f32.mrf.mxu1  ;;  %v1215_v45 = vadd.f32 %v1214_v27, %v1208_v32 }
 0x12d   : > { %v1088_v20 = vpop.f32.mrf.mxu3  ;;  %v961_v39 = vadd.f32 %v945_v10, %v888_v34 }
 0x12e   : > { %v1106_v33 = vadd.f32 %v1088_v20, %v1033_v38  ;;  %v1164_v0 = vpop.f32.mrf.mxu0 }
 0x12f   : > { %v1034_v47 = vadd.f32 %v1018_v48, %v961_v39 }
 0x130   : > { %v1024_v44 = vpop.f32.mrf.mxu2  ;;  %v1179_v19 = vadd.f32 %v1161_v15, %v1106_v33 }
 0x132   : > { %1187 = vst [vmem:[%s2315_s13 + $0x18] sm:$0xff] %v1179_v19  ;;  %v1194_v59 = vadd.f32 %v1193_v40, %v1179_v19  ;;  %v1209_v21 = vmul.f32 %v1179_v19, %v1179_v19 }
 0x134   : > { %v948_v46 = vpop.f32.mrf.mxu1  ;;  %v1216_v8 = vadd.f32 %v1215_v45, %v1209_v21 }
 0x135   : > { %v1091_v62 = vpop.f32.mrf.mxu3  ;;  %v962_v4 = vadd.f32 %v948_v46, %v889_v24 }
 0x136   : > { %v1107_v1 = vadd.f32 %v1091_v62, %v1034_v47  ;;  %v1167_v50 = vpop.f32.mrf.mxu0 }
 0x137   : > { %v1035_v48 = vadd.f32 %v1021_v37, %v962_v4 }
 0x138   : > { %v1180_v36 = vadd.f32 %v1164_v0, %v1107_v1  ;;  %v1027_v13 = vpop.f32.mrf.mxu2 }
 0x13a   : > { %1188 = vst [vmem:[%s2315_s13 + $0x20] sm:$0xff] %v1180_v36  ;;  %v1195_v28 = vadd.f32 %v1194_v59, %v1180_v36  ;;  %v1210_v35 = vmul.f32 %v1180_v36, %v1180_v36 }
 0x13c   : > { %v951_v17 = vpop.f32.mrf.mxu1  ;;  %v1217_v52 = vadd.f32 %v1216_v8, %v1210_v35 }
 0x13d   : > { %v1094_v61 = vpop.f32.mrf.mxu3  ;;  %v963_v55 = vadd.f32 %v951_v17, %v890_v43 }
 0x13e   : > { %v1108_v56 = vadd.f32 %v1094_v61, %v1035_v48 }
 0x13f   : > { %v1036_v60 = vadd.f32 %v1024_v44, %v963_v55 }
 0x140   : > { %v1181_v63 = vadd.f32 %v1167_v50, %v1108_v56  ;;  %v1170_v18 = vpop.f32.mrf.mxu2 }
 0x142   : > { %1189 = vst [vmem:[%s2315_s13 + $0x28] sm:$0xff] %v1181_v63  ;;  %v1196_v5 = vadd.f32 %v1195_v28, %v1181_v63  ;;  %v1211_v14 = vmul.f32 %v1181_v63, %v1181_v63 }
 0x144   : > { %v954_v23 = vpop.f32.mrf.mxu1  ;;  %v1218_v42 = vadd.f32 %v1217_v52, %v1211_v14 }
 0x145   : > { %v1097_v9 = vpop.f32.mrf.mxu3  ;;  %v964_v29 = vadd.f32 %v954_v23, %v891_v2 }
 0x146   : > { %v1109_v7 = vadd.f32 %v1097_v9, %v1036_v60 }
 0x147   : > { %v1037_v37 = vadd.f32 %v1027_v13, %v964_v29 }
 0x148   : > { %v1182_v3 = vadd.f32 %v1170_v18, %v1109_v7  ;;  %v1173_v6 = vpop.f32.mrf.mxu2 }
 0x14a   : > { %1190 = vst [vmem:[%s2315_s13 + $0x30] sm:$0xff] %v1182_v3  ;;  %v1197_v27 = vadd.f32 %v1196_v5, %v1182_v3  ;;  %v1212_v25 = vmul.f32 %v1182_v3, %v1182_v3 }
 0x14c   : > { %v1219_v41 = vadd.f32 %v1218_v42, %v1212_v25 }
 0x14d   : > { %v1100_v58 = vpop.f32.mrf.mxu3 }
 0x14e   : > { %v1110_v10 = vadd.f32 %v1100_v58, %v1037_v37 }
 0x150   : > { %v1183_v16 = vadd.f32 %v1173_v6, %v1110_v10 }
 0x152   : > { %1191 = vst [vmem:[%s2315_s13 + $0x38] sm:$0xff] %v1183_v16  ;;  %v1198_v11 = vadd.f32 %v1197_v27, %v1183_v16  ;;  %v1213_v53 = vmul.f32 %v1183_v16, %v1183_v16 }
 0x154   : > { %v1199_v26 = vrot.slane %v1198_v11, 4  ;;  %v1220_v15 = vadd.f32 %v1219_v41, %v1213_v53 }
 0x156   : > { %v1200_v40 = vadd.f32 %v1199_v26, %v1198_v11  ;;  %v1221_v32 = vrot.slane %v1220_v15, 4 }
 0x158   : > { %v1201_v38 = vrot.slane %v1200_v40, 2  ;;  %v1222_v34 = vadd.f32 %v1221_v32, %v1220_v15 }
 0x15a   : > { %v1202_v30 = vadd.f32 %v1201_v38, %v1200_v40  ;;  %v1223_v45 = vrot.slane %v1222_v34, 2 }
 0x15c   : > { %v1203_v20 = vrot.slane %v1202_v30, 1  ;;  %v1224_v33 = vadd.f32 %v1223_v45, %v1222_v34 }
 0x15e   : > { %v1204_v39 = vadd.f32 %v1203_v20, %v1202_v30  ;;  %v1225_v44 = vrot.slane %v1224_v33, 1 }
 0x160   : > { %1205 = vst [vmem:[%s266_s16] sm:$0x1] %v1204_v39  ;;  %v1226_v46 = vadd.f32 %v1225_v44, %v1224_v33 }
 0x162   : > { %1227 = vst [vmem:[%s269_s20] sm:$0x1] %v1226_v46 }
 0x163 PF: > { %s17_s21 = sadd.s32 1, %s1427_s21  }
 0x164   : > { %p14_p5 = scmp.ge.s32.totalorder %s17_s21, 4  }
 0x166   :  { %16 = sbr.rel (!%p14_p5) target bundleno = 1 (0x1), region = 99 }

// kernel: bottleneck_forward.8
= control target key start
LH: loop header
LB: loop body
LE: loop exit
PB: predicated region body
PF: predicated region fallthrough
CT: control target
= control target key end

     0   :  { %s422_s1 = inlined_call_operand.vmem [shape: f32[128,128], index: 1, kind: input, shape index: {}]   ;;  %s423_s0 = inlined_call_operand.vmem [shape: f32[128,128], index: 0, kind: input, shape index: {}]   ;;  %s424_s2 = inlined_call_operand.vmem [shape: f32[128,128], index: 2, kind: output, shape index: {0}]   ;;  %s425_s3 = inlined_call_operand.vmem [shape: f32[1,1,128], index: 3, kind: output, shape index: {1}]   ;;  %s426_s4 = inlined_call_operand.vmem [shape: f32[1,1,128], index: 4, kind: output, shape index: {2}]  }
   0x1   :  { %v45_v0 = vld [vmem:[%s422_s1 + $0x78] sm:$0xff]  ;;  %v44_v1 = vld [vmem:[%s422_s1 + $0x70] sm:$0xff]  ;;  %v43_v2 = vld [vmem:[%s422_s1 + $0x68] sm:$0xff] }
   0x2   :  { %46 = vmatpush.msra.mxu0 %v45_v0  ;;  %199 = vmatpush.msra.mxu1 %v45_v0  ;;  %v42_v3 = vld [vmem:[%s422_s1 + $0x60] sm:$0xff]  ;;  %v41_v4 = vld [vmem:[%s422_s1 + $0x58] sm:$0xff]  ;;  %v40_v5 = vld [vmem:[%s422_s1 + $0x50] sm:$0xff] }
   0x3   :  { %200 = vmatpush.msra.mxu2 %v45_v0  ;;  %201 = vmatpush.msra.mxu3 %v45_v0  ;;  %v39_v6 = vld [vmem:[%s422_s1 + $0x48] sm:$0xff]  ;;  %v38_v7 = vld [vmem:[%s422_s1 + $0x40] sm:$0xff]  ;;  %v37_v8 = vld [vmem:[%s422_s1 + $0x38] sm:$0xff] }
   0x4   :  { %47 = vmatpush.msra.mxu0 %v44_v1  ;;  %202 = vmatpush.msra.mxu1 %v44_v1  ;;  %v36_v9 = vld [vmem:[%s422_s1 + $0x30] sm:$0xff]  ;;  %v35_v10 = vld [vmem:[%s422_s1 + $0x28] sm:$0xff]  ;;  %v34_v11 = vld [vmem:[%s422_s1 + $0x20] sm:$0xff] }
   0x5   :  { %203 = vmatpush.msra.mxu2 %v44_v1  ;;  %204 = vmatpush.msra.mxu3 %v44_v1  ;;  %v33_v12 = vld [vmem:[%s422_s1 + $0x18] sm:$0xff]  ;;  %v32_v13 = vld [vmem:[%s422_s1 + $0x10] sm:$0xff]  ;;  %v31_v14 = vld [vmem:[%s422_s1 + $0x8] sm:$0xff] }
   0x6   :  { %48 = vmatpush.msra.mxu0 %v43_v2  ;;  %205 = vmatpush.msra.mxu1 %v43_v2  ;;  %v30_v15 = vld [vmem:[%s422_s1] sm:$0xff]  ;;  %v15_v20 = vld [vmem:[%s423_s0 + $0x8] sm:$0xff]  ;;  %v16_v24 = vld [vmem:[%s423_s0 + $0x10] sm:$0xff] }
   0x7   :  { %206 = vmatpush.msra.mxu2 %v43_v2  ;;  %207 = vmatpush.msra.mxu3 %v43_v2  ;;  %v14_v16 = vld [vmem:[%s423_s0] sm:$0xff]  ;;  %v19_v21 = vld [vmem:[%s423_s0 + $0x28] sm:$0xff]  ;;  %v20_v25 = vld [vmem:[%s423_s0 + $0x30] sm:$0xff] }
   0x8   :  { %49 = vmatpush.msra.mxu0 %v42_v3  ;;  %208 = vmatpush.msra.mxu1 %v42_v3  ;;  %v18_v17 = vld [vmem:[%s423_s0 + $0x20] sm:$0xff]  ;;  %v23_v22 = vld [vmem:[%s423_s0 + $0x48] sm:$0xff]  ;;  %v24_v26 = vld [vmem:[%s423_s0 + $0x50] sm:$0xff] }
   0x9   :  { %209 = vmatpush.msra.mxu2 %v42_v3  ;;  %210 = vmatpush.msra.mxu3 %v42_v3  ;;  %v22_v18 = vld [vmem:[%s423_s0 + $0x40] sm:$0xff]  ;;  %v27_v23 = vld [vmem:[%s423_s0 + $0x68] sm:$0xff]  ;;  %v28_v27 = vld [vmem:[%s423_s0 + $0x70] sm:$0xff] }
   0xa   :  { %50 = vmatpush.msra.mxu0 %v41_v4  ;;  %211 = vmatpush.msra.mxu1 %v41_v4  ;;  %v26_v19 = vld [vmem:[%s423_s0 + $0x60] sm:$0xff]  ;;  %v17_v28 = vld [vmem:[%s423_s0 + $0x18] sm:$0xff] }
   0xb   :  { %212 = vmatpush.msra.mxu2 %v41_v4  ;;  %213 = vmatpush.msra.mxu3 %v41_v4  ;;  %v21_v29 = vld [vmem:[%s423_s0 + $0x38] sm:$0xff] }
   0xc   :  { %51 = vmatpush.msra.mxu0 %v40_v5  ;;  %214 = vmatpush.msra.mxu1 %v40_v5  ;;  %v25_v30 = vld [vmem:[%s423_s0 + $0x58] sm:$0xff] }
   0xd   :  { %215 = vmatpush.msra.mxu2 %v40_v5  ;;  %216 = vmatpush.msra.mxu3 %v40_v5  ;;  %v29_v31 = vld [vmem:[%s423_s0 + $0x78] sm:$0xff] }
   0xe   :  { %52 = vmatpush.msra.mxu0 %v39_v6  ;;  %217 = vmatpush.msra.mxu1 %v39_v6 }
   0xf   :  { %218 = vmatpush.msra.mxu2 %v39_v6  ;;  %219 = vmatpush.msra.mxu3 %v39_v6 }
  0x10   :  { %53 = vmatpush.msra.mxu0 %v38_v7  ;;  %220 = vmatpush.msra.mxu1 %v38_v7 }
  0x11   :  { %221 = vmatpush.msra.mxu2 %v38_v7  ;;  %222 = vmatpush.msra.mxu3 %v38_v7 }
  0x12   :  { %54 = vmatpush.msra.mxu0 %v37_v8  ;;  %223 = vmatpush.msra.mxu1 %v37_v8 }
  0x13   :  { %224 = vmatpush.msra.mxu2 %v37_v8  ;;  %225 = vmatpush.msra.mxu3 %v37_v8 }
  0x14   :  { %55 = vmatpush.msra.mxu0 %v36_v9  ;;  %226 = vmatpush.msra.mxu1 %v36_v9 }
  0x15   :  { %227 = vmatpush.msra.mxu2 %v36_v9  ;;  %228 = vmatpush.msra.mxu3 %v36_v9 }
  0x16   :  { %56 = vmatpush.msra.mxu0 %v35_v10  ;;  %229 = vmatpush.msra.mxu1 %v35_v10 }
  0x17   :  { %230 = vmatpush.msra.mxu2 %v35_v10  ;;  %231 = vmatpush.msra.mxu3 %v35_v10 }
  0x18   :  { %57 = vmatpush.msra.mxu0 %v34_v11  ;;  %232 = vmatpush.msra.mxu1 %v34_v11 }
  0x19   :  { %233 = vmatpush.msra.mxu2 %v34_v11  ;;  %234 = vmatpush.msra.mxu3 %v34_v11 }
  0x1a   :  { %58 = vmatpush.msra.mxu0 %v33_v12  ;;  %235 = vmatpush.msra.mxu1 %v33_v12 }
  0x1b   :  { %236 = vmatpush.msra.mxu2 %v33_v12  ;;  %237 = vmatpush.msra.mxu3 %v33_v12 }
  0x1c   :  { %59 = vmatpush.msra.mxu0 %v32_v13  ;;  %238 = vmatpush.msra.mxu1 %v32_v13 }
  0x1d   :  { %239 = vmatpush.msra.mxu2 %v32_v13  ;;  %240 = vmatpush.msra.mxu3 %v32_v13 }
  0x1e   :  { %60 = vmatpush.msra.mxu0 %v31_v14  ;;  %241 = vmatpush.msra.mxu1 %v31_v14 }
  0x1f   :  { %242 = vmatpush.msra.mxu2 %v31_v14  ;;  %243 = vmatpush.msra.mxu3 %v31_v14 }
  0x20   :  { %61 = vmatpush.msra.mxu0 %v30_v15  ;;  %244 = vmatpush.msra.mxu1 %v30_v15 }
  0x21   :  { %62 = vmatmul.f32.vlgmr.msra.gmra.mxu0 %v14_v16  ;;  %74 = vmatmul.f32.vlgmr.msra.gmra.mxu1 %v18_v17 }
  0x22   :  { %245 = vmatpush.msra.mxu2 %v30_v15  ;;  %246 = vmatpush.msra.mxu3 %v30_v15 }
  0x23   :  { %86 = vmatmul.f32.vlgmr.msra.gmra.mxu2 %v22_v18  ;;  %98 = vmatmul.f32.vlgmr.msra.gmra.mxu3 %v26_v19 }
  0x29   :  { %65 = vmatmul.f32.gmra.mxu0 %v15_v20  ;;  %77 = vmatmul.f32.gmra.mxu1 %v19_v21 }
  0x2b   :  { %89 = vmatmul.f32.gmra.mxu2 %v23_v22  ;;  %101 = vmatmul.f32.gmra.mxu3 %v27_v23 }
  0x31   :  { %68 = vmatmul.f32.gmra.mxu0 %v16_v24  ;;  %80 = vmatmul.f32.gmra.mxu1 %v20_v25 }
  0x33   :  { %92 = vmatmul.f32.gmra.mxu2 %v24_v26  ;;  %104 = vmatmul.f32.gmra.mxu3 %v28_v27 }
  0x39   :  { %71 = vmatmul.f32.gmra.mxu0 %v17_v28  ;;  %83 = vmatmul.f32.gmra.mxu1 %v21_v29 }
  0x3b   :  { %95 = vmatmul.f32.gmra.mxu2 %v25_v30  ;;  %107 = vmatmul.f32.gmra.mxu3 %v29_v31 }
  0x9e   :  { %v63_v32 = vpop.f32.mrf.mxu0  ;;  %v75_v33 = vpop.f32.mrf.mxu1 }
  0x9f   :  { %111 = vst [vmem:[%s424_s2] sm:$0xff] %v63_v32  ;;  %v149_v43 = vmul.f32 %v63_v32, %v63_v32  ;;  %v153_v55 = vmul.f32 %v75_v33, %v75_v33 }
  0xa0   :  { %115 = vst [vmem:[%s424_s2 + $0x20] sm:$0xff] %v75_v33 }
  0xa6   :  { %v66_v34 = vpop.f32.mrf.mxu0  ;;  %v78_v35 = vpop.f32.mrf.mxu1 }
  0xa7   :  { %112 = vst [vmem:[%s424_s2 + $0x8] sm:$0xff] %v66_v34  ;;  %v87_v36 = vpop.f32.mrf.mxu2  ;;  %v99_v37 = vpop.f32.mrf.mxu3  ;;  %v150_v42 = vmul.f32 %v66_v34, %v66_v34  ;;  %v127_v44 = vadd.f32 %v66_v34, %v63_v32  ;;  %v154_v58 = vmul.f32 %v78_v35, %v78_v35 }
  0xa8   :  { %116 = vst [vmem:[%s424_s2 + $0x28] sm:$0xff] %v78_v35  ;;  %v157_v5 = vmul.f32 %v87_v36, %v87_v36  ;;  %v161_v17 = vmul.f32 %v99_v37, %v99_v37 }
  0xa9   :  { %119 = vst [vmem:[%s424_s2 + $0x40] sm:$0xff] %v87_v36  ;;  %v165_v46 = vadd.f32 %v150_v42, %v149_v43 }
  0xaa   :  { %123 = vst [vmem:[%s424_s2 + $0x60] sm:$0xff] %v99_v37 }
  0xae   :  { %v69_v38 = vpop.f32.mrf.mxu0  ;;  %v81_v39 = vpop.f32.mrf.mxu1 }
  0xaf   :  { %113 = vst [vmem:[%s424_s2 + $0x10] sm:$0xff] %v69_v38  ;;  %v90_v40 = vpop.f32.mrf.mxu2  ;;  %v102_v41 = vpop.f32.mrf.mxu3  ;;  %v151_v45 = vmul.f32 %v69_v38, %v69_v38  ;;  %v128_v47 = vadd.f32 %v127_v44, %v69_v38  ;;  %v155_v62 = vmul.f32 %v81_v39, %v81_v39 }
  0xb0   :  { %117 = vst [vmem:[%s424_s2 + $0x30] sm:$0xff] %v81_v39  ;;  %v158_v8 = vmul.f32 %v90_v40, %v90_v40  ;;  %v162_v20 = vmul.f32 %v102_v41, %v102_v41 }
  0xb1   :  { %120 = vst [vmem:[%s424_s2 + $0x48] sm:$0xff] %v90_v40  ;;  %v166_v50 = vadd.f32 %v165_v46, %v151_v45 }
  0xb2   :  { %124 = vst [vmem:[%s424_s2 + $0x68] sm:$0xff] %v102_v41 }
  0xb6   :  { %v72_v48 = vpop.f32.mrf.mxu0  ;;  %v84_v49 = vpop.f32.mrf.mxu1 }
  0xb7   :  { %114 = vst [vmem:[%s424_s2 + $0x18] sm:$0xff] %v72_v48  ;;  %v129_v51 = vadd.f32 %v128_v47, %v72_v48  ;;  %v152_v52 = vmul.f32 %v72_v48, %v72_v48  ;;  %v93_v53 = vpop.f32.mrf.mxu2  ;;  %v105_v54 = vpop.f32.mrf.mxu3  ;;  %v156_v0 = vmul.f32 %v84_v49, %v84_v49 }
  0xb8   :  { %118 = vst [vmem:[%s424_s2 + $0x38] sm:$0xff] %v84_v49  ;;  %v159_v12 = vmul.f32 %v93_v53, %v93_v53  ;;  %v163_v24 = vmul.f32 %v105_v54, %v105_v54 }
  0xb9   :  { %v130_v56 = vadd.f32 %v129_v51, %v75_v33  ;;  %v167_v57 = vadd.f32 %v166_v50, %v152_v52  ;;  %121 = vst [vmem:[%s424_s2 + $0x50] sm:$0xff] %v93_v53 }
  0xba   :  { %125 = vst [vmem:[%s424_s2 + $0x70] sm:$0xff] %v105_v54 }
  0xbb   :  { %v168_v59 = vadd.f32 %v167_v57, %v153_v55  ;;  %v131_v60 = vadd.f32 %v130_v56, %v78_v35 }
  0xbd   :  { %v132_v61 = vadd.f32 %v131_v60, %v81_v39  ;;  %v169_v63 = vadd.f32 %v168_v59, %v154_v58 }
  0xbf   :  { %v170_v1 = vadd.f32 %v169_v63, %v155_v62  ;;  %v133_v2 = vadd.f32 %v132_v61, %v84_v49  ;;  %v96_v3 = vpop.f32.mrf.mxu2  ;;  %v108_v4 = vpop.f32.mrf.mxu3 }
  0xc0   :  { %122 = vst [vmem:[%s424_s2 + $0x58] sm:$0xff] %v96_v3  ;;  %v160_v14 = vmul.f32 %v96_v3, %v96_v3  ;;  %v164_v26 = vmul.f32 %v108_v4, %v108_v4 }
  0xc1   :  { %v134_v6 = vadd.f32 %v133_v2, %v87_v36  ;;  %v171_v7 = vadd.f32 %v170_v1, %v156_v0  ;;  %126 = vst [vmem:[%s424_s2 + $0x78] sm:$0xff] %v108_v4 }
  0xc3   :  { %v172_v9 = vadd.f32 %v171_v7, %v157_v5  ;;  %v135_v10 = vadd.f32 %v134_v6, %v90_v40 }
  0xc5   :  { %v136_v11 = vadd.f32 %v135_v10, %v93_v53  ;;  %v173_v13 = vadd.f32 %v172_v9, %v158_v8 }
  0xc7   :  { %v174_v15 = vadd.f32 %v173_v13, %v159_v12  ;;  %v137_v16 = vadd.f32 %v136_v11, %v96_v3 }
  0xc9   :  { %v138_v18 = vadd.f32 %v137_v16, %v99_v37  ;;  %v175_v19 = vadd.f32 %v174_v15, %v160_v14 }
  0xcb   :  { %v176_v21 = vadd.f32 %v175_v19, %v161_v17  ;;  %v139_v22 = vadd.f32 %v138_v18, %v102_v41 }
  0xcd   :  { %v140_v23 = vadd.f32 %v139_v22, %v105_v54  ;;  %v177_v25 = vadd.f32 %v176_v21, %v162_v20 }
  0xcf   :  { %v178_v27 = vadd.f32 %v177_v25, %v163_v24  ;;  %v141_v28 = vadd.f32 %v140_v23, %v108_v4 }
  0xd1   :  { %v142_v29 = vrot.slane %v141_v28, 4  ;;  %v179_v30 = vadd.f32 %v178_v27, %v164_v26 }
  0xd3   :  { %v143_v31 = vadd.f32 %v142_v29, %v141_v28  ;;  %v180_v32 = vrot.slane %v179_v30, 4 }
  0xd5   :  { %v144_v33 = vrot.slane %v143_v31, 2  ;;  %v181_v34 = vadd.f32 %v180_v32, %v179_v30 }
  0xd7   :  { %v145_v35 = vadd.f32 %v144_v33, %v143_v31  ;;  %v182_v36 = vrot.slane %v181_v34, 2 }
  0xd9   :  { %v146_v38 = vrot.slane %v145_v35, 1  ;;  %v183_v37 = vadd.f32 %v182_v36, %v181_v34 }
  0xdb   :  { %v147_v39 = vadd.f32 %v146_v38, %v145_v35  ;;  %v184_v40 = vrot.slane %v183_v37, 1 }
  0xdd   :  { %148 = vst [vmem:[%s425_s3] sm:$0x1] %v147_v39  ;;  %v185_v41 = vadd.f32 %v184_v40, %v183_v37 }
  0xdf   :  { %186 = vst [vmem:[%s426_s4] sm:$0x1] %v185_v41 }

// kernel: bottleneck_forward.9
= control target key start
LH: loop header
LB: loop body
LE: loop exit
PB: predicated region body
PF: predicated region fallthrough
CT: control target
= control target key end

     0   :  { %13 = vsyncpa [#allocation3], 0  ;;  %s529_s0 = inlined_call_operand.vmem [shape: f32[128,128], index: 0, kind: input, shape index: {}]   ;;  %s530_s1 = inlined_call_operand.vmem [shape: f32[1,128], index: 1, kind: input, shape index: {}]   ;;  %s531_s2 = inlined_call_operand.vmem [shape: f32[1,128], index: 2, kind: input, shape index: {}]   ;;  %s532_s3 = inlined_call_operand.vmem [shape: f32[128,128], index: 3, kind: input, shape index: {}]   ;;  %s533_s4 = inlined_call_operand.vmem [shape: f32[1,128], index: 4, kind: input, shape index: {}]   ;;  %s534_s5 = inlined_call_operand.vmem [shape: f32[1,128], index: 5, kind: input, shape index: {}]   ;;  %s535_s6 = inlined_call_operand.hbm [shape: f32[128,128], index: 6, kind: output, shape index: {0}]   ;;  %s536_s7 = inlined_call_operand.hbm [shape: f32[128,128], index: 7, kind: output, shape index: {1}]  }
   0x1   :  { %v27_v0 = vld [vmem:[%s529_s0] sm:$0xff]  ;;  %v28_v7 = vld [vmem:[%s529_s0 + $0x8] sm:$0xff]  ;;  %v29_v13 = vld [vmem:[%s529_s0 + $0x10] sm:$0xff] }
   0x2   :  { %v349_v1 = vld [vmem:[%s530_s1] ss:$0 sm:$0xff]  ;;  %v84_v8 = vld [vmem:[%s532_s3 + $0x8] sm:$0xff]  ;;  %v85_v14 = vld [vmem:[%s532_s3 + $0x10] sm:$0xff] }
   0x3   :  { %v354_v2 = vld [vmem:[%s531_s2] ss:$0 sm:$0xff]  ;;  %v47_v4 = vmul.f32 %v349_v1, %v27_v0  ;;  %v48_v11 = vmul.f32 %v349_v1, %v28_v7  ;;  %v30_v15 = vld [vmem:[%s529_s0 + $0x18] sm:$0xff]  ;;  %v49_v16 = vmul.f32 %v349_v1, %v29_v13  ;;  %v32_v26 = vld [vmem:[%s529_s0 + $0x28] sm:$0xff] }
   0x4   :  { %v83_v3 = vld [vmem:[%s532_s3] sm:$0xff]  ;;  %v50_v18 = vmul.f32 %v349_v1, %v30_v15  ;;  %v86_v19 = vld [vmem:[%s532_s3 + $0x18] sm:$0xff]  ;;  %v88_v27 = vld [vmem:[%s532_s3 + $0x28] sm:$0xff]  ;;  %v52_v32 = vmul.f32 %v349_v1, %v32_v26 }
   0x5   :  { %v363_v5 = vld [vmem:[%s533_s4] ss:$0 sm:$0xff]  ;;  %v67_v9 = vadd.f32 %v354_v2, %v47_v4  ;;  %v68_v23 = vadd.f32 %v354_v2, %v48_v11  ;;  %v33_v28 = vld [vmem:[%s529_s0 + $0x30] sm:$0xff]  ;;  %v69_v29 = vadd.f32 %v354_v2, %v49_v16  ;;  %v34_v42 = vld [vmem:[%s529_s0 + $0x38] sm:$0xff] }
   0x6   :  { %v368_v6 = vld [vmem:[%s534_s5] ss:$0 sm:$0xff]  ;;  %v103_v10 = vmul.f32 %v363_v5, %v83_v3  ;;  %v104_v12 = vmul.f32 %v363_v5, %v84_v8  ;;  %v105_v17 = vmul.f32 %v363_v5, %v85_v14  ;;  %v106_v24 = vmul.f32 %v363_v5, %v86_v19  ;;  %v89_v33 = vld [vmem:[%s532_s3 + $0x30] sm:$0xff]  ;;  %v90_v43 = vld [vmem:[%s532_s3 + $0x38] sm:$0xff] }
   0x7   :  { %v31_v20 = vld [vmem:[%s529_s0 + $0x20] sm:$0xff]  ;;  %v70_v30 = vadd.f32 %v354_v2, %v50_v18  ;;  %v108_v37 = vmul.f32 %v363_v5, %v88_v27  ;;  %v72_v40 = vadd.f32 %v354_v2, %v52_v32  ;;  %v53_v41 = vmul.f32 %v349_v1, %v33_v28  ;;  %v36_v58 = vld [vmem:[%s529_s0 + $0x48] sm:$0xff]  ;;  %v37_v60 = vld [vmem:[%s529_s0 + $0x50] sm:$0xff] }
   0x8   :  { %v87_v21 = vld [vmem:[%s532_s3 + $0x20] sm:$0xff]  ;;  %v119_v22 = vadd.f32 %v103_v10, %v67_v9  ;;  %v51_v25 = vmul.f32 %v349_v1, %v31_v20  ;;  %v120_v35 = vadd.f32 %v104_v12, %v68_v23  ;;  %v121_v38 = vadd.f32 %v105_v17, %v69_v29  ;;  %v92_v59 = vld [vmem:[%s532_s3 + $0x48] sm:$0xff]  ;;  %v93_v3 = vld [vmem:[%s532_s3 + $0x50] sm:$0xff] }
   0x9   :  { %v107_v31 = vmul.f32 %v363_v5, %v87_v21  ;;  %v122_v39 = vadd.f32 %v106_v24, %v70_v30  ;;  %v109_v47 = vmul.f32 %v363_v5, %v89_v33  ;;  %v124_v50 = vadd.f32 %v108_v37, %v72_v40  ;;  %v35_v52 = vld [vmem:[%s529_s0 + $0x40] sm:$0xff] }
   0xa   :  { %v139_v34 = vadd.f32 %v368_v6, %v119_v22  ;;  %v71_v36 = vadd.f32 %v354_v2, %v51_v25  ;;  %v140_v45 = vadd.f32 %v368_v6, %v120_v35  ;;  %v141_v48 = vadd.f32 %v368_v6, %v121_v38  ;;  %v91_v53 = vld [vmem:[%s532_s3 + $0x40] sm:$0xff] }
   0xb   :  { %v142_v49 = vadd.f32 %v368_v6, %v122_v39  ;;  %v73_v51 = vadd.f32 %v354_v2, %v53_v41  ;;  %v54_v56 = vmul.f32 %v349_v1, %v34_v42  ;;  %v110_v57 = vmul.f32 %v363_v5, %v90_v43 }
   0xc   :  { %v155_v44 = vmax.f32 %v139_v34, 0.0  ;;  %187 = vst [vmem:[#allocation4] sm:$0xff] %v139_v34  ;;  %v123_v46 = vadd.f32 %v107_v31, %v71_v36  ;;  %v156_v54 = vmax.f32 %v140_v45, 0.0  ;;  %v157_v61 = vmax.f32 %v141_v48, 0.0 }
   0xd   :  { %188 = vst [vmem:[#allocation4 + $0x8] sm:$0xff] %v140_v45  ;;  %v158_v62 = vmax.f32 %v142_v49, 0.0  ;;  %v144_v63 = vadd.f32 %v368_v6, %v124_v50  ;;  %v125_v0 = vadd.f32 %v109_v47, %v73_v51 }
   0xe   :  { %171 = vst [vmem:[#allocation2] sm:$0xff] %v155_v44  ;;  %v143_v55 = vadd.f32 %v368_v6, %v123_v46 }
   0xf   :  { %14 = vsyncpa [#allocation5], 0  ;;  %172 = vst [vmem:[#allocation2 + $0x8] sm:$0xff] %v156_v54  ;;  %v74_v7 = vadd.f32 %v354_v2, %v54_v56  ;;  %v55_v8 = vmul.f32 %v349_v1, %v35_v52  ;;  %v111_v9 = vmul.f32 %v363_v5, %v91_v53  ;;  %v38_v10 = vld [vmem:[%s529_s0 + $0x58] sm:$0xff]  ;;  %v160_v12 = vmax.f32 %v144_v63, 0.0  ;;  %v39_v16 = vld [vmem:[%s529_s0 + $0x60] sm:$0xff] }
  0x10   :  { %v159_v4 = vmax.f32 %v143_v55, 0.0  ;;  %v94_v11 = vld [vmem:[%s532_s3 + $0x58] sm:$0xff]  ;;  %173 = vst [vmem:[#allocation2 + $0x10] sm:$0xff] %v157_v61  ;;  %v145_v13 = vadd.f32 %v368_v6, %v125_v0  ;;  %v56_v14 = vmul.f32 %v349_v1, %v36_v58  ;;  %v112_v15 = vmul.f32 %v363_v5, %v92_v59  ;;  %v95_v21 = vld [vmem:[%s532_s3 + $0x60] sm:$0xff]  ;;  %v40_v22 = vld [vmem:[%s529_s0 + $0x68] sm:$0xff]  ;;  %s209_s17 = sshll.u32 %s535_s6, 4  ;;  %s210_s17 = int_to_ptr.hbm [resolvable:$true] %s209_s17 }
  0x11   :  { %189 = vst [vmem:[#allocation4 + $0x10] sm:$0xff] %v141_v48  ;;  %v126_v17 = vadd.f32 %v110_v57, %v74_v7  ;;  %v75_v18 = vadd.f32 %v354_v2, %v55_v8  ;;  %v57_v19 = vmul.f32 %v349_v1, %v37_v60  ;;  %v113_v20 = vmul.f32 %v363_v5, %v93_v3  ;;  %v96_v31 = vld [vmem:[%s532_s3 + $0x68] sm:$0xff]  ;;  %v41_v36 = vld [vmem:[%s529_s0 + $0x70] sm:$0xff]  ;;  %v42_v46 = vld [vmem:[%s529_s0 + $0x78] sm:$0xff]  ;;  %s299_s0 = smov [#allocation2]   ;;  %s300_s18 = smov [#allocation4]  }
  0x12   :  { %174 = vst [vmem:[#allocation2 + $0x18] sm:$0xff] %v158_v62  ;;  %v161_v23 = vmax.f32 %v145_v13, 0.0  ;;  %v76_v24 = vadd.f32 %v354_v2, %v56_v14  ;;  %v58_v25 = vmul.f32 %v349_v1, %v38_v10  ;;  %v114_v26 = vmul.f32 %v363_v5, %v94_v11  ;;  %v97_v41 = vld [vmem:[%s532_s3 + $0x70] sm:$0xff]  ;;  %v98_v48 = vld [vmem:[%s532_s3 + $0x78] sm:$0xff]  ;;  %s207_s3 = sshll.u32 %s299_s0, 4  ;;  %s220_s19 = sshll.u32 %s300_s18, 4  ;;  %s208_s3 = int_to_ptr.vmem [resolvable:$true] %s207_s3  ;;  %s221_s19 = int_to_ptr.vmem [resolvable:$true] %s220_s19 }
  0x13   :  { %190 = vst [vmem:[#allocation4 + $0x18] sm:$0xff] %v142_v49  ;;  %v146_v27 = vadd.f32 %v368_v6, %v126_v17  ;;  %v127_v28 = vadd.f32 %v111_v9, %v75_v18  ;;  %v77_v29 = vadd.f32 %v354_v2, %v57_v19  ;;  %v59_v30 = vmul.f32 %v349_v1, %v39_v16  ;;  %s222_s22 = sshll.u32 %s536_s7, 4  ;;  %s301_s23 = smov 128   ;;  %s223_s22 = int_to_ptr.hbm [resolvable:$true] %s222_s22 }
  0x14   :  { %175 = vst [vmem:[#allocation2 + $0x20] sm:$0xff] %v159_v4  ;;  %v128_v32 = vadd.f32 %v112_v15, %v76_v24  ;;  %v78_v33 = vadd.f32 %v354_v2, %v58_v25  ;;  %v115_v34 = vmul.f32 %v363_v5, %v95_v21  ;;  %v60_v35 = vmul.f32 %v349_v1, %v40_v22  ;;  %s302_s24 = smov 8  }
  0x15   :  { %191 = vst [vmem:[#allocation4 + $0x20] sm:$0xff] %v143_v55  ;;  %v162_v37 = vmax.f32 %v146_v27, 0.0  ;;  %v147_v38 = vadd.f32 %v368_v6, %v127_v28  ;;  %v129_v39 = vadd.f32 %v113_v20, %v77_v29  ;;  %v79_v40 = vadd.f32 %v354_v2, %v59_v30 }
  0x16   :  { %176 = vst [vmem:[#allocation2 + $0x28] sm:$0xff] %v160_v12  ;;  %v148_v42 = vadd.f32 %v368_v6, %v128_v32  ;;  %v130_v43 = vadd.f32 %v114_v26, %v78_v33  ;;  %v80_v44 = vadd.f32 %v354_v2, %v60_v35  ;;  %v116_v45 = vmul.f32 %v363_v5, %v96_v31 }
  0x17   :  { %192 = vst [vmem:[#allocation4 + $0x28] sm:$0xff] %v144_v63  ;;  %v61_v47 = vmul.f32 %v349_v1, %v41_v36  ;;  %v163_v49 = vmax.f32 %v147_v38, 0.0  ;;  %v149_v50 = vadd.f32 %v368_v6, %v129_v39  ;;  %v131_v51 = vadd.f32 %v115_v34, %v79_v40 }
  0x18   :  { %177 = vst [vmem:[#allocation2 + $0x30] sm:$0xff] %v161_v23  ;;  %v117_v52 = vmul.f32 %v363_v5, %v97_v41  ;;  %v62_v54 = vmul.f32 %v349_v1, %v42_v46  ;;  %v164_v55 = vmax.f32 %v148_v42, 0.0  ;;  %v150_v56 = vadd.f32 %v368_v6, %v130_v43 }
  0x19   :  { %193 = vst [vmem:[#allocation4 + $0x30] sm:$0xff] %v145_v13  ;;  %v81_v53 = vadd.f32 %v354_v2, %v61_v47  ;;  %v132_v57 = vadd.f32 %v116_v45, %v80_v44  ;;  %v118_v58 = vmul.f32 %v363_v5, %v98_v48  ;;  %v165_v60 = vmax.f32 %v149_v50, 0.0 }
  0x1a   :  { %178 = vst [vmem:[#allocation2 + $0x38] sm:$0xff] %v162_v37  ;;  %v82_v59 = vadd.f32 %v354_v2, %v62_v54  ;;  %v151_v61 = vadd.f32 %v368_v6, %v131_v51  ;;  %v166_v63 = vmax.f32 %v150_v56, 0.0 }
  0x1b   :  { %194 = vst [vmem:[#allocation4 + $0x38] sm:$0xff] %v146_v27  ;;  %v133_v62 = vadd.f32 %v117_v52, %v81_v53  ;;  %v152_v1 = vadd.f32 %v368_v6, %v132_v57 }
  0x1c   :  { %179 = vst [vmem:[#allocation2 + $0x40] sm:$0xff] %v163_v49  ;;  %v134_v0 = vadd.f32 %v118_v58, %v82_v59  ;;  %v167_v3 = vmax.f32 %v151_v61, 0.0 }
  0x1d   :  { %195 = vst [vmem:[#allocation4 + $0x40] sm:$0xff] %v147_v38  ;;  %v153_v4 = vadd.f32 %v368_v6, %v133_v62  ;;  %v168_v5 = vmax.f32 %v152_v1, 0.0 }
  0x1e   :  { %180 = vst [vmem:[#allocation2 + $0x48] sm:$0xff] %v164_v55  ;;  %v154_v2 = vadd.f32 %v368_v6, %v134_v0 }
  0x1f   :  { %196 = vst [vmem:[#allocation4 + $0x48] sm:$0xff] %v148_v42  ;;  %v169_v7 = vmax.f32 %v153_v4, 0.0 }
  0x20   :  { %181 = vst [vmem:[#allocation2 + $0x50] sm:$0xff] %v165_v60  ;;  %v170_v8 = vmax.f32 %v154_v2, 0.0 }
  0x21   :  { %197 = vst [vmem:[#allocation4 + $0x50] sm:$0xff] %v149_v50 }
  0x22   :  { %182 = vst [vmem:[#allocation2 + $0x58] sm:$0xff] %v166_v63 }
  0x23   :  { %198 = vst [vmem:[#allocation4 + $0x58] sm:$0xff] %v150_v56 }
  0x24   :  { %183 = vst [vmem:[#allocation2 + $0x60] sm:$0xff] %v167_v3 }
  0x25   :  { %199 = vst [vmem:[#allocation4 + $0x60] sm:$0xff] %v151_v61 }
  0x26   :  { %184 = vst [vmem:[#allocation2 + $0x68] sm:$0xff] %v168_v5 }
  0x27   :  { %200 = vst [vmem:[#allocation4 + $0x68] sm:$0xff] %v152_v1 }
  0x28   :  { %185 = vst [vmem:[#allocation2 + $0x70] sm:$0xff] %v169_v7 }
  0x29   :  { %201 = vst [vmem:[#allocation4 + $0x70] sm:$0xff] %v153_v4 }
  0x2a   :  { %186 = vst [vmem:[#allocation2 + $0x78] sm:$0xff] %v170_v8 }
  0x2b   :  { %202 = vst [vmem:[#allocation4 + $0x78] sm:$0xff] %v154_v2  ;;  %215 = dma.vmem_to_hbm [thread:$0]  %s208_s3, 2048, %s210_s17, [#allocation3], %s301_s23, %s301_s23, %s302_s24  }
  0x2c   :  { %228 = dma.vmem_to_hbm [thread:$0]  %s221_s19, 2048, %s223_s22, [#allocation5], %s301_s23, %s301_s23, %s302_s24  }
  0x2d   :  { %295 = dma.done.wait [#allocation3], 2048  }
  0x2e   :  { %296 = vsyncadd [#allocation3], 4294965248 }
  0x2f   :  { %297 = dma.done.wait [#allocation5], 2048  }
  0x30   :  { %298 = vsyncadd [#allocation5], 4294965248 }
  0x31   :  { %237 = vsyncpa [#allocation3], 1 }
  0x32   :  { %238 = vsyncpa [#allocation5], 1 }

</bundles_post_ra>
